<compile_context>
chip_gen: v6e
topology: v6e:2x2x1
jax: 0.10.0
libtpu: 0.0.40
codegen_flags: <defaults>
</compile_context>

<pallas_src>
import functools
import math

import jax
import jax.numpy as jnp
from jax.experimental import pallas as pl
from jax.experimental.pallas import tpu as pltpu


def _round_up(x, m):
    return ((x + m - 1) // m) * m


def _cdiv(a, b):
    return -(-a // b)


def _vmem_limit_bytes():
    # ~85% of physical VMEM: ~108 MiB on v5e/v6e (128 MiB), ~54 MiB on v7x (64 MiB).
    try:
        cap = int(pltpu.get_tpu_info().vmem_capacity_bytes)
    except Exception:
        cap = 64 * 1024 * 1024
    return min(int(cap * 0.85), 110 * 1024 * 1024)


# --------------------------------------------------------------------------------------
# Kernel: one grid step = (one batch block of Bb elements, one encoder layer).
# --------------------------------------------------------------------------------------
def fused_encoder_kernel(
    x_ref,                                   # (Bb*S_pad, E_pad)  input activations
    wqkv_ref, bqkv_ref,                      # (E_pad, 3*EH) bf16, (1, 3*EH) f32
    wo_ref, bo_ref,                          # (EH, E_pad)   bf16, (1, E_pad) f32
    ln1w_ref, ln1b_ref,                      # (1, E_pad) f32
    w1_ref, b1_ref,                          # (E_pad, F_pad) bf16, (1, F_pad) f32
    w2_ref, b2_ref,                          # (F_pad, E_pad) bf16, (1, E_pad) f32
    ln2w_ref, ln2b_ref,                      # (1, E_pad) f32
    o_ref,                                   # (Bb*S_pad, E_pad)  output (written at last layer)
    h_scr,                                   # VMEM (Bb*S_pad, E_pad)  f32  : activation carry
    qkv_scr,                                 # VMEM (Bb*S_pad, 3*EH)   bf16 : fused q|k|v
    ctx_scr,                                 # VMEM (Bb*S_pad, EH)     bf16 : per-head context
    *, num_heads, head_dim, real_emb, real_seq, seq_pad, batch_block,
):
    M, E_pad = h_scr.shape
    EH = qkv_scr.shape[1] // 3               # H * hd_pad
    H = num_heads
    hd_pad = EH // H
    S_pad = seq_pad
    Bb = batch_block
    scale = 1.0 / math.sqrt(head_dim)        # PyTorch scales by the *real* head dim
    inv_e = 1.0 / real_emb
    layer = pl.program_id(1)

    # Load input activations into the resident VMEM carry at the first layer.
    @pl.when(layer == 0)
    def _():
        h_scr[...] = x_ref[...].astype(jnp.float32)

    # Lane mask over the real embedding columns (padded lanes excluded from LN stats).
    col = jax.lax.broadcasted_iota(jnp.int32, (1, E_pad), 1)
    emb_mask = (col < real_emb).astype(jnp.float32)

    # Key mask: padded key rows must not contribute to any softmax (static Python check).
    if seq_pad > real_seq:
        kcol = jax.lax.broadcasted_iota(jnp.int32, (1, seq_pad), 1)
        key_bias = jnp.where(kcol < real_seq, 0.0, -1e30).astype(jnp.float32)

    def layer_norm(y, w, b, eps=1e-5):
        # y: (M, E_pad) f32 with zeros in padded lanes; statistics over the real E only.
        mean = jnp.sum(y, axis=-1, keepdims=True) * inv_e
        diff = (y - mean) * emb_mask
        var = jnp.sum(diff * diff, axis=-1, keepdims=True) * inv_e
        return (y - mean) * jax.lax.rsqrt(var + eps) * w + b

    x = h_scr[...]                                        # (M, E_pad) f32
    xb = x.astype(jnp.bfloat16)

    # ---- fused QKV projection: bf16 MXU matmul, f32 accumulation; park result in bf16 ----
    qkv = jnp.dot(xb, wqkv_ref[...], preferred_element_type=jnp.float32) + bqkv_ref[...]
    qkv_scr[...] = qkv.astype(jnp.bfloat16)

    # ---- multi-head self-attention: 128-aligned lane slices per head, no transposes ----
    def attend_one_head(row0, col0):
        qh = qkv_scr[pl.ds(row0, S_pad), pl.ds(col0, hd_pad)]
        kh = qkv_scr[pl.ds(row0, S_pad), pl.ds(EH + col0, hd_pad)]
        vh = qkv_scr[pl.ds(row0, S_pad), pl.ds(2 * EH + col0, hd_pad)]
        s = jax.lax.dot_general(                          # q @ k^T, contract last dims
            qh, kh, (((1,), (1,)), ((), ())),
            preferred_element_type=jnp.float32) * scale   # (S_pad, S_pad) f32
        if seq_pad > real_seq:
            s = s + key_bias
        s = s - jnp.max(s, axis=-1, keepdims=True)
        p = jnp.exp(s)
        denom = jnp.sum(p, axis=-1, keepdims=True)
        ctx = jnp.dot(p.astype(jnp.bfloat16), vh,
                      preferred_element_type=jnp.float32)            # (S_pad, hd_pad)
        # fold 1/denom into the small (S_pad, hd_pad) ctx instead of the (S,S) probs
        ctx_scr[pl.ds(row0, S_pad), pl.ds(col0, hd_pad)] = (
            ctx * pl.reciprocal(denom, approx=True)).astype(jnp.bfloat16)

    for b in range(Bb):                                   # attention is per batch element
        row0 = b * S_pad
        if H <= 8:
            # small head counts: static unroll (one (S,S) temp live at a time is still fine)
            for h in range(H):
                attend_one_head(row0, h * hd_pad)
        else:
            # large head counts: rolled loop bounds live ranges to one head at a time
            def head_body(h, carry):
                attend_one_head(row0, pl.multiple_of(h * hd_pad, 128))
                return carry
            jax.lax.fori_loop(0, H, head_body, 0, unroll=2)

    attn = jnp.dot(ctx_scr[...], wo_ref[...],
                   preferred_element_type=jnp.float32) + bo_ref[...]

    # residual + LN1   (dropout1 == identity in eval mode)
    h1 = layer_norm(attn + x, ln1w_ref[...], ln1b_ref[...])

    # ---- FFN: Linear -> ReLU -> Linear ----
    f1 = jnp.dot(h1.astype(jnp.bfloat16), w1_ref[...],
                 preferred_element_type=jnp.float32) + b1_ref[...]
    f1 = jnp.maximum(f1, 0.0)
    f2 = jnp.dot(f1.astype(jnp.bfloat16), w2_ref[...],
                 preferred_element_type=jnp.float32) + b2_ref[...]

    # residual + LN2   (dropout2 == identity in eval mode)
    out = layer_norm(f2 + h1, ln2w_ref[...], ln2b_ref[...])

    h_scr[...] = out                                      # carry to the next layer

    @pl.when(layer == pl.num_programs(1) - 1)
    def _():
        o_ref[...] = out.astype(o_ref.dtype)


# --------------------------------------------------------------------------------------
# Host-side parameter packing: transpose to (in, out), pad to lane-dense dims, cast bf16,
# and stack all layers into (L, ...) arrays so one pallas_call runs the whole stack.
# --------------------------------------------------------------------------------------
def pack_params(layer_params, num_heads):
    E = layer_params[0]["wqkv"].shape[1]
    F = layer_params[0]["w1"].shape[0]
    H = num_heads
    assert E % H == 0
    hd = E // H
    # 128-aligned head blocks -> unmasked lane stores + full-depth MXU contractions.
    # Activation lane width stays at round_up(E,128) so the head padding does not
    # inflate the QKV / out-proj / FFN weight matrices.
    hd_pad = _round_up(hd, 128)
    EH = H * hd_pad                       # lane width of each of q / k / v and of ctx
    E_pad = _round_up(E, 128)             # lane width of activations
    F_pad = _round_up(F, 128)

    def qkv_t_pad(w):      # (E, E) torch (out,in) -> (E_pad, EH) (in, head-major out)
        wt = w.T.reshape(E, H, hd)
        wt = jnp.pad(wt, ((0, E_pad - E), (0, 0), (0, hd_pad - hd)))
        return wt.reshape(E_pad, EH)

    def head_bias_pad(b):  # (E,) -> (EH,) per-head padded
        return jnp.pad(b.reshape(H, hd), ((0, 0), (0, hd_pad - hd))).reshape(EH)

    def pad_vec(b, n_pad):  # (n,) -> (1, n_pad)
        return jnp.pad(b.reshape(-1), (0, n_pad - b.size))[None, :]

    def pack_layer(p):
        wqkv, bqkv = p["wqkv"], p["bqkv"].reshape(3 * E)
        wq, wk, wv = wqkv[:E], wqkv[E:2 * E], wqkv[2 * E:]
        bq, bk, bv = bqkv[:E], bqkv[E:2 * E], bqkv[2 * E:]
        wqkv_t = jnp.concatenate([qkv_t_pad(wq), qkv_t_pad(wk), qkv_t_pad(wv)], axis=1)
        bqkv_p = jnp.concatenate(
            [head_bias_pad(bq), head_bias_pad(bk), head_bias_pad(bv)])[None, :]
        # out_proj: its input rows index the concatenated (head, hd_pad) context layout
        wo_t = p["wo"].T.reshape(H, hd, E)
        wo_t = jnp.pad(wo_t, ((0, 0), (0, hd_pad - hd), (0, E_pad - E))).reshape(EH, E_pad)
        return dict(
            wqkv_t=wqkv_t.astype(jnp.bfloat16), bqkv=bqkv_p,
            wo_t=wo_t.astype(jnp.bfloat16), bo=pad_vec(p["bo"], E_pad),
            ln1w=pad_vec(p["ln1w"], E_pad), ln1b=pad_vec(p["ln1b"], E_pad),
            w1_t=jnp.pad(p["w1"].T, ((0, E_pad - E), (0, F_pad - F))).astype(jnp.bfloat16),
            b1=pad_vec(p["b1"], F_pad),
            w2_t=jnp.pad(p["w2"].T, ((0, F_pad - F), (0, E_pad - E))).astype(jnp.bfloat16),
            b2=pad_vec(p["b2"], E_pad),
            ln2w=pad_vec(p["ln2w"], E_pad), ln2b=pad_vec(p["ln2b"], E_pad),
        )

    per_layer = [pack_layer(p) for p in layer_params]
    stacked = {name: jnp.stack([lp[name] for lp in per_layer], axis=0) for name in per_layer[0]}
    meta = {"E": E, "E_pad": E_pad, "EH": EH, "F": F, "F_pad": F_pad,
            "hd": hd, "hd_pad": hd_pad}
    return stacked, meta


_PARAM_ORDER = ("wqkv_t", "bqkv", "wo_t", "bo", "ln1w", "ln1b",
                "w1_t", "b1", "w2_t", "b2", "ln2w", "ln2b")


def transformer_encoder(x, layer_params, num_heads, batch_block=None):
    """Run the full encoder stack in a single fused pallas_call."""
    B, S, E = x.shape
    stacked, meta = pack_params(layer_params, num_heads)
    E_pad, EH = meta["E_pad"], meta["EH"]
    L = stacked["wqkv_t"].shape[0]

    # Pad S to a multiple of 16 (bf16 sublane packing); padded keys are masked in-kernel.
    S_pad = _round_up(S, 16)

    # Batch block: fuse rows into the MXU M dimension (>=256 rows where possible) while
    # keeping the per-step scratch slabs small.  Larger Bb also cuts weight HBM traffic
    # to ceil(B/Bb) reads per layer.
    if batch_block is None:
        rows_target = 256
        batch_block = min(B, max(1, _cdiv(rows_target, S_pad)))
        bytes_per_row = 4 * E_pad + 8 * EH            # f32 carry + bf16 qkv + bf16 ctx
        max_rows = max(S_pad, (8 * 1024 * 1024) // bytes_per_row)
        batch_block = max(1, min(batch_block, max_rows // S_pad))
    Bb = batch_block
    NB = _cdiv(B, Bb)
    B_pad = NB * Bb
    M = Bb * S_pad

    # Pad + flatten activations to a lane-dense 2-D slab: row = b * S_pad + s.
    x_pad = jnp.zeros((B_pad, S_pad, E_pad), x.dtype).at[:B, :S, :E].set(x)
    x2d = x_pad.reshape(B_pad * S_pad, E_pad)

    params = [stacked[name] for name in _PARAM_ORDER]

    def weight_spec(arr):
        # Block over the layer axis only; full (lane-dense) extent in the last two dims.
        return pl.BlockSpec((None,) + arr.shape[1:], lambda nb, l: (l, 0, 0))

    in_specs = [pl.BlockSpec((M, E_pad), lambda nb, l: (nb, 0))]
    in_specs += [weight_spec(a) for a in params]
    out_specs = pl.BlockSpec((M, E_pad), lambda nb, l: (nb, 0))

    kernel = functools.partial(
        fused_encoder_kernel,
        num_heads=num_heads,
        head_dim=E // num_heads,
        real_emb=E,
        real_seq=S,
        seq_pad=S_pad,
        batch_block=Bb,
    )

    out2d = pl.pallas_call(
        kernel,
        out_shape=jax.ShapeDtypeStruct((B_pad * S_pad, E_pad), x.dtype),
        grid_spec=pltpu.PrefetchScalarGridSpec(
            num_scalar_prefetch=0,
            grid=(NB, L),                                  # batch blocks (parallel), layers (carry)
            in_specs=in_specs,
            out_specs=out_specs,
            scratch_shapes=[
                pltpu.VMEM((M, E_pad), jnp.float32),       # activation carried across layers
                pltpu.VMEM((M, 3 * EH), jnp.bfloat16),     # fused q|k|v (bf16, MXU-ready)
                pltpu.VMEM((M, EH), jnp.bfloat16),         # per-head context assembly (bf16)
            ],
        ),
        compiler_params=pltpu.CompilerParams(
            dimension_semantics=("parallel", "arbitrary"),
            vmem_limit_bytes=_vmem_limit_bytes(),
        ),
    )(x2d, *params)

    return out2d.reshape(B_pad, S_pad, E_pad)[:B, :S, :E]


# --------------------------------------------------------------------------------------
# Parameter init (PyTorch-like layouts) and a pure-JAX f32 reference for validation.
# --------------------------------------------------------------------------------------
def init_block_params(key, emb_dim, ffn_hidden_dim):
    ks = jax.random.split(key, 5)
    s_e = 1.0 / math.sqrt(emb_dim)
    s_h = 1.0 / math.sqrt(ffn_hidden_dim)
    return {
        # nn.MultiheadAttention: in_proj_weight (3E, E), in_proj_bias (3E,) zeros,
        # out_proj = Linear(E, E) with zero bias (PyTorch MHA default init).
        "wqkv": jax.random.uniform(ks[0], (3 * emb_dim, emb_dim), jnp.float32, -s_e, s_e),
        "bqkv": jnp.zeros((3 * emb_dim,), jnp.float32),
        "wo": jax.random.uniform(ks[1], (emb_dim, emb_dim), jnp.float32, -s_e, s_e),
        "bo": jnp.zeros((emb_dim,), jnp.float32),
        "ln1w": jnp.ones((emb_dim,), jnp.float32),
        "ln1b": jnp.zeros((emb_dim,), jnp.float32),
        # FFN: Linear(E, H) then Linear(H, E)   (PyTorch weight layout: (out, in))
        "w1": jax.random.uniform(ks[2], (ffn_hidden_dim, emb_dim), jnp.float32, -s_e, s_e),
        "b1": jax.random.uniform(ks[3], (ffn_hidden_dim,), jnp.float32, -s_e, s_e),
        "w2": jax.random.uniform(ks[4], (emb_dim, ffn_hidden_dim), jnp.float32, -s_h, s_h),
        "b2": jnp.zeros((emb_dim,), jnp.float32),
        "ln2w": jnp.ones((emb_dim,), jnp.float32),
        "ln2b": jnp.zeros((emb_dim,), jnp.float32),
    }


def encoder_reference(x, layer_params, num_heads):
    """Pure-JAX f32 reference (eval-mode PyTorch TransformerEncoder semantics)."""
    B, S, E = x.shape
    H = num_heads
    hd = E // H

    def ln(y, w, b, eps=1e-5):
        m = jnp.mean(y, axis=-1, keepdims=True)
        v = jnp.mean((y - m) ** 2, axis=-1, keepdims=True)
        return (y - m) * jax.lax.rsqrt(v + eps) * w + b

    for p in layer_params:
        qkv = x @ p["wqkv"].T + p["bqkv"]
        q, k, v = qkv[..., :E], qkv[..., E:2 * E], qkv[..., 2 * E:]
        qh = q.reshape(B, S, H, hd).transpose(0, 2, 1, 3)
        kh = k.reshape(B, S, H, hd).transpose(0, 2, 1, 3)
        vh = v.reshape(B, S, H, hd).transpose(0, 2, 1, 3)
        s = jnp.einsum("bhqd,bhkd->bhqk", qh, kh) / math.sqrt(hd)
        a = jax.nn.softmax(s, axis=-1)
        ctx = jnp.einsum("bhqk,bhkd->bhqd", a, vh).transpose(0, 2, 1, 3).reshape(B, S, E)
        attn = ctx @ p["wo"].T + p["bo"]
        h1 = ln(attn + x, p["ln1w"], p["ln1b"])
        f = jnp.maximum(h1 @ p["w1"].T + p["b1"], 0.0) @ p["w2"].T + p["b2"]
        x = ln(f + h1, p["ln2w"], p["ln2b"])
    return x


if __name__ == "__main__":
    # small shapes implied by the module: (batch, seq, embedding_dim)
    B, S, E = 2, 8, 32
    num_heads = 4
    ffn_hidden_dim = 64
    num_layers = 2

    key = jax.random.PRNGKey(0)
    kx, kp = jax.random.split(key)
    x = jax.random.normal(kx, (B, S, E), dtype=jnp.float32)

    layer_keys = jax.random.split(kp, num_layers)
    layer_params = [init_block_params(k, E, ffn_hidden_dim) for k in layer_keys]

    out = transformer_encoder(x, layer_params, num_heads)
    out = jax.block_until_ready(out)

    assert out.shape == (B, S, E) and out.dtype == jnp.float32
    assert bool(jnp.all(jnp.isfinite(out)))

    # Loose tolerance: kernel matmuls run in bf16 (f32 accumulation), reference is pure f32.
    ref = encoder_reference(x, layer_params, num_heads)
    max_err = float(jnp.max(jnp.abs(out - ref)))
    assert max_err < 1.5e-1, f"mismatch vs reference: max_err={max_err}"

    print("KERNEL_OK")
</pallas_src>

<mosaic_0001>
module attributes {stable_mosaic.version = 11 : i64} {
  func.func @fused_encoder_kernel(%arg0: i32, %arg1: i32, %arg2: memref<32x128xf32, #tpu.memory_space<vmem>>, %arg3: memref<1x128x1536xbf16, #tpu.memory_space<vmem>>, %arg4: memref<1x1x1536xf32, #tpu.memory_space<vmem>>, %arg5: memref<1x512x128xbf16, #tpu.memory_space<vmem>>, %arg6: memref<1x1x128xf32, #tpu.memory_space<vmem>>, %arg7: memref<1x1x128xf32, #tpu.memory_space<vmem>>, %arg8: memref<1x1x128xf32, #tpu.memory_space<vmem>>, %arg9: memref<1x128x128xbf16, #tpu.memory_space<vmem>>, %arg10: memref<1x1x128xf32, #tpu.memory_space<vmem>>, %arg11: memref<1x128x128xbf16, #tpu.memory_space<vmem>>, %arg12: memref<1x1x128xf32, #tpu.memory_space<vmem>>, %arg13: memref<1x1x128xf32, #tpu.memory_space<vmem>>, %arg14: memref<1x1x128xf32, #tpu.memory_space<vmem>>, %arg15: memref<32x128xf32, #tpu.memory_space<vmem>>, %arg16: memref<32x128xf32, #tpu.memory_space<vmem>>, %arg17: memref<32x1536xbf16, #tpu.memory_space<vmem>>, %arg18: memref<32x512xbf16, #tpu.memory_space<vmem>>) attributes {dimension_semantics = [#tpu.dimension_semantics<parallel>, #tpu.dimension_semantics<arbitrary>], iteration_bounds = array<i64: 1, 2>, scalar_prefetch = 0 : i64, scratch_operands = 3 : i64, tpu.core_type = #tpu.core_type<tc>, window_params = [{transform_indices = @transform_0, window_bounds = array<i64: 32, 128>}, {transform_indices = @transform_1, window_bounds = array<i64: 1, 128, 1536>}, {transform_indices = @transform_2, window_bounds = array<i64: 1, 1, 1536>}, {transform_indices = @transform_3, window_bounds = array<i64: 1, 512, 128>}, {transform_indices = @transform_4, window_bounds = array<i64: 1, 1, 128>}, {transform_indices = @transform_5, window_bounds = array<i64: 1, 1, 128>}, {transform_indices = @transform_6, window_bounds = array<i64: 1, 1, 128>}, {transform_indices = @transform_7, window_bounds = array<i64: 1, 128, 128>}, {transform_indices = @transform_8, window_bounds = array<i64: 1, 1, 128>}, {transform_indices = @transform_9, window_bounds = array<i64: 1, 128, 128>}, {transform_indices = @transform_10, window_bounds = array<i64: 1, 1, 128>}, {transform_indices = @transform_11, window_bounds = array<i64: 1, 1, 128>}, {transform_indices = @transform_12, window_bounds = array<i64: 1, 1, 128>}, {transform_indices = @transform_13, window_bounds = array<i64: 32, 128>}]} {
    %c0_i32 = arith.constant 0 : i32
    %0 = arith.cmpi eq, %arg1, %c0_i32 : i32
    %1 = arith.extui %0 : i1 to i32
    %c0_i32_0 = arith.constant 0 : i32
    %2 = arith.cmpi ne, %1, %c0_i32_0 : i32
    scf.if %2 {
      %c0_153 = arith.constant 0 : index
      %c0_154 = arith.constant 0 : index
      %289 = vector.load %arg2[%c0_153, %c0_154] : memref<32x128xf32, #tpu.memory_space<vmem>>, vector<32x128xf32>
      %c0_155 = arith.constant 0 : index
      %c0_156 = arith.constant 0 : index
      %290 = vector.load %arg16[%c0_155, %c0_156] : memref<32x128xf32, #tpu.memory_space<vmem>>, vector<32x128xf32>
      tpu.vector_store %arg16[%c0_155, %c0_156], %289 {strides = array<i32>} : memref<32x128xf32, #tpu.memory_space<vmem>>, vector<32x128xf32>,
    } else {
    }
    %3 = tpu.iota {dimensions = array<i32: 1>} : vector<1x128xi32>
    %c32_i32 = arith.constant 32 : i32
    %4 = vector.broadcast %c32_i32 : i32 to vector<1x128xi32>
    %5 = arith.cmpi slt, %3, %4 : vector<1x128xi32>
    %6 = arith.extui %5 : vector<1x128xi1> to vector<1x128xi32>
    %7 = arith.sitofp %6 : vector<1x128xi32> to vector<1x128xf32>
    %8 = tpu.iota {dimensions = array<i32: 1>} : vector<1x16xi32>
    %c8_i32 = arith.constant 8 : i32
    %9 = vector.broadcast %c8_i32 : i32 to vector<1x16xi32>
    %10 = arith.cmpi slt, %8, %9 : vector<1x16xi32>
    %cst = arith.constant 0.000000e+00 : f32
    %cst_1 = arith.constant -1.000000e+30 : f32
    %11 = vector.broadcast %cst : f32 to vector<1x16xf32>
    %12 = vector.broadcast %cst_1 : f32 to vector<1x16xf32>
    %13 = arith.select %10, %11, %12 : vector<1x16xi1>, vector<1x16xf32>
    %c0 = arith.constant 0 : index
    %c0_2 = arith.constant 0 : index
    %14 = vector.load %arg16[%c0, %c0_2] : memref<32x128xf32, #tpu.memory_space<vmem>>, vector<32x128xf32>
    %15 = arith.truncf %14 : vector<32x128xf32> to vector<32x128xbf16>
    %c0_3 = arith.constant 0 : index
    %c0_4 = arith.constant 0 : index
    %c0_5 = arith.constant 0 : index
    %16 = vector.load %arg3[%c0_3, %c0_4, %c0_5] : memref<1x128x1536xbf16, #tpu.memory_space<vmem>>, vector<1x128x1536xbf16>
    %17 = vector.shape_cast %16 : vector<1x128x1536xbf16> to vector<128x1536xbf16>
    %cst_6 = arith.constant dense<0.000000e+00> : vector<32x1536xf32>
    %18 = tpu.matmul %15, %17, %cst_6 {dimension_numbers = #tpu.dot_dimension_numbers<[1], [0], [0], [1], [0, 0, 1, 1], [], []>} : vector<32x128xbf16>, vector<128x1536xbf16>, vector<32x1536xf32> -> vector<32x1536xf32>
    %c0_7 = arith.constant 0 : index
    %c0_8 = arith.constant 0 : index
    %c0_9 = arith.constant 0 : index
    %19 = vector.load %arg4[%c0_7, %c0_8, %c0_9] : memref<1x1x1536xf32, #tpu.memory_space<vmem>>, vector<1x1x1536xf32>
    %20 = vector.shape_cast %19 : vector<1x1x1536xf32> to vector<1x1536xf32>
    %21 = vector.broadcast %20 : vector<1x1536xf32> to vector<32x1536xf32>
    %22 = arith.addf %18, %21 : vector<32x1536xf32>
    %23 = arith.truncf %22 : vector<32x1536xf32> to vector<32x1536xbf16>
    %c0_10 = arith.constant 0 : index
    %c0_11 = arith.constant 0 : index
    %24 = vector.load %arg17[%c0_10, %c0_11] : memref<32x1536xbf16, #tpu.memory_space<vmem>>, vector<32x1536xbf16>
    tpu.vector_store %arg17[%c0_10, %c0_11], %23 {strides = array<i32>} : memref<32x1536xbf16, #tpu.memory_space<vmem>>, vector<32x1536xbf16>,
    %c0_12 = arith.constant 0 : index
    %c0_13 = arith.constant 0 : index
    %25 = vector.load %arg17[%c0_12, %c0_13] : memref<32x1536xbf16, #tpu.memory_space<vmem>>, vector<16x128xbf16>
    %c0_14 = arith.constant 0 : index
    %c512 = arith.constant 512 : index
    %26 = vector.load %arg17[%c0_14, %c512] : memref<32x1536xbf16, #tpu.memory_space<vmem>>, vector<16x128xbf16>
    %c0_15 = arith.constant 0 : index
    %c1024 = arith.constant 1024 : index
    %27 = vector.load %arg17[%c0_15, %c1024] : memref<32x1536xbf16, #tpu.memory_space<vmem>>, vector<16x128xbf16>
    %cst_16 = arith.constant dense<0.000000e+00> : vector<16x16xf32>
    %28 = tpu.matmul %25, %26, %cst_16 {dimension_numbers = #tpu.dot_dimension_numbers<[1], [1], [0], [0], [0, 0, 1, 0], [], []>} : vector<16x128xbf16>, vector<16x128xbf16>, vector<16x16xf32> -> vector<16x16xf32>
    %cst_17 = arith.constant 0.353553385 : f32
    %29 = vector.broadcast %cst_17 : f32 to vector<16x16xf32>
    %30 = arith.mulf %28, %29 : vector<16x16xf32>
    %31 = vector.broadcast %13 : vector<1x16xf32> to vector<16x16xf32>
    %32 = arith.addf %30, %31 : vector<16x16xf32>
    %cst_18 = arith.constant dense<0xFF800000> : vector<16xf32>
    %33 = vector.multi_reduction <maximumf>, %32, %cst_18 [1] : vector<16x16xf32> to vector<16xf32>
    %34 = vector.shape_cast %33 : vector<16xf32> to vector<16x1xf32>
    %35 = vector.broadcast %34 : vector<16x1xf32> to vector<16x16xf32>
    %36 = arith.subf %32, %35 : vector<16x16xf32>
    %37 = math.exp %36 : vector<16x16xf32>
    %cst_19 = arith.constant dense<0.000000e+00> : vector<16xf32>
    %38 = vector.multi_reduction <add>, %37, %cst_19 [1] : vector<16x16xf32> to vector<16xf32>
    %39 = vector.shape_cast %38 : vector<16xf32> to vector<16x1xf32>
    %40 = arith.truncf %37 : vector<16x16xf32> to vector<16x16xbf16>
    %cst_20 = arith.constant dense<0.000000e+00> : vector<16x128xf32>
    %41 = tpu.matmul %40, %27, %cst_20 {dimension_numbers = #tpu.dot_dimension_numbers<[1], [0], [0], [1], [0, 0, 1, 1], [], []>} : vector<16x16xbf16>, vector<16x128xbf16>, vector<16x128xf32> -> vector<16x128xf32>
    %42 = tpu.reciprocal %39 {approx = true} : vector<16x1xf32> -> vector<16x1xf32>
    %43 = vector.broadcast %42 : vector<16x1xf32> to vector<16x128xf32>
    %44 = arith.mulf %41, %43 : vector<16x128xf32>
    %45 = arith.truncf %44 : vector<16x128xf32> to vector<16x128xbf16>
    %c0_21 = arith.constant 0 : index
    %c0_22 = arith.constant 0 : index
    %46 = vector.load %arg18[%c0_21, %c0_22] : memref<32x512xbf16, #tpu.memory_space<vmem>>, vector<16x128xbf16>
    tpu.vector_store %arg18[%c0_21, %c0_22], %45 {strides = array<i32>} : memref<32x512xbf16, #tpu.memory_space<vmem>>, vector<16x128xbf16>,
    %c0_23 = arith.constant 0 : index
    %c128 = arith.constant 128 : index
    %47 = vector.load %arg17[%c0_23, %c128] : memref<32x1536xbf16, #tpu.memory_space<vmem>>, vector<16x128xbf16>
    %c0_24 = arith.constant 0 : index
    %c640 = arith.constant 640 : index
    %48 = vector.load %arg17[%c0_24, %c640] : memref<32x1536xbf16, #tpu.memory_space<vmem>>, vector<16x128xbf16>
    %c0_25 = arith.constant 0 : index
    %c1152 = arith.constant 1152 : index
    %49 = vector.load %arg17[%c0_25, %c1152] : memref<32x1536xbf16, #tpu.memory_space<vmem>>, vector<16x128xbf16>
    %cst_26 = arith.constant dense<0.000000e+00> : vector<16x16xf32>
    %50 = tpu.matmul %47, %48, %cst_26 {dimension_numbers = #tpu.dot_dimension_numbers<[1], [1], [0], [0], [0, 0, 1, 0], [], []>} : vector<16x128xbf16>, vector<16x128xbf16>, vector<16x16xf32> -> vector<16x16xf32>
    %cst_27 = arith.constant 0.353553385 : f32
    %51 = vector.broadcast %cst_27 : f32 to vector<16x16xf32>
    %52 = arith.mulf %50, %51 : vector<16x16xf32>
    %53 = vector.broadcast %13 : vector<1x16xf32> to vector<16x16xf32>
    %54 = arith.addf %52, %53 : vector<16x16xf32>
    %cst_28 = arith.constant dense<0xFF800000> : vector<16xf32>
    %55 = vector.multi_reduction <maximumf>, %54, %cst_28 [1] : vector<16x16xf32> to vector<16xf32>
    %56 = vector.shape_cast %55 : vector<16xf32> to vector<16x1xf32>
    %57 = vector.broadcast %56 : vector<16x1xf32> to vector<16x16xf32>
    %58 = arith.subf %54, %57 : vector<16x16xf32>
    %59 = math.exp %58 : vector<16x16xf32>
    %cst_29 = arith.constant dense<0.000000e+00> : vector<16xf32>
    %60 = vector.multi_reduction <add>, %59, %cst_29 [1] : vector<16x16xf32> to vector<16xf32>
    %61 = vector.shape_cast %60 : vector<16xf32> to vector<16x1xf32>
    %62 = arith.truncf %59 : vector<16x16xf32> to vector<16x16xbf16>
    %cst_30 = arith.constant dense<0.000000e+00> : vector<16x128xf32>
    %63 = tpu.matmul %62, %49, %cst_30 {dimension_numbers = #tpu.dot_dimension_numbers<[1], [0], [0], [1], [0, 0, 1, 1], [], []>} : vector<16x16xbf16>, vector<16x128xbf16>, vector<16x128xf32> -> vector<16x128xf32>
    %64 = tpu.reciprocal %61 {approx = true} : vector<16x1xf32> -> vector<16x1xf32>
    %65 = vector.broadcast %64 : vector<16x1xf32> to vector<16x128xf32>
    %66 = arith.mulf %63, %65 : vector<16x128xf32>
    %67 = arith.truncf %66 : vector<16x128xf32> to vector<16x128xbf16>
    %c0_31 = arith.constant 0 : index
    %c128_32 = arith.constant 128 : index
    %68 = vector.load %arg18[%c0_31, %c128_32] : memref<32x512xbf16, #tpu.memory_space<vmem>>, vector<16x128xbf16>
    tpu.vector_store %arg18[%c0_31, %c128_32], %67 {strides = array<i32>} : memref<32x512xbf16, #tpu.memory_space<vmem>>, vector<16x128xbf16>,
    %c0_33 = arith.constant 0 : index
    %c256 = arith.constant 256 : index
    %69 = vector.load %arg17[%c0_33, %c256] : memref<32x1536xbf16, #tpu.memory_space<vmem>>, vector<16x128xbf16>
    %c0_34 = arith.constant 0 : index
    %c768 = arith.constant 768 : index
    %70 = vector.load %arg17[%c0_34, %c768] : memref<32x1536xbf16, #tpu.memory_space<vmem>>, vector<16x128xbf16>
    %c0_35 = arith.constant 0 : index
    %c1280 = arith.constant 1280 : index
    %71 = vector.load %arg17[%c0_35, %c1280] : memref<32x1536xbf16, #tpu.memory_space<vmem>>, vector<16x128xbf16>
    %cst_36 = arith.constant dense<0.000000e+00> : vector<16x16xf32>
    %72 = tpu.matmul %69, %70, %cst_36 {dimension_numbers = #tpu.dot_dimension_numbers<[1], [1], [0], [0], [0, 0, 1, 0], [], []>} : vector<16x128xbf16>, vector<16x128xbf16>, vector<16x16xf32> -> vector<16x16xf32>
    %cst_37 = arith.constant 0.353553385 : f32
    %73 = vector.broadcast %cst_37 : f32 to vector<16x16xf32>
    %74 = arith.mulf %72, %73 : vector<16x16xf32>
    %75 = vector.broadcast %13 : vector<1x16xf32> to vector<16x16xf32>
    %76 = arith.addf %74, %75 : vector<16x16xf32>
    %cst_38 = arith.constant dense<0xFF800000> : vector<16xf32>
    %77 = vector.multi_reduction <maximumf>, %76, %cst_38 [1] : vector<16x16xf32> to vector<16xf32>
    %78 = vector.shape_cast %77 : vector<16xf32> to vector<16x1xf32>
    %79 = vector.broadcast %78 : vector<16x1xf32> to vector<16x16xf32>
    %80 = arith.subf %76, %79 : vector<16x16xf32>
    %81 = math.exp %80 : vector<16x16xf32>
    %cst_39 = arith.constant dense<0.000000e+00> : vector<16xf32>
    %82 = vector.multi_reduction <add>, %81, %cst_39 [1] : vector<16x16xf32> to vector<16xf32>
    %83 = vector.shape_cast %82 : vector<16xf32> to vector<16x1xf32>
    %84 = arith.truncf %81 : vector<16x16xf32> to vector<16x16xbf16>
    %cst_40 = arith.constant dense<0.000000e+00> : vector<16x128xf32>
    %85 = tpu.matmul %84, %71, %cst_40 {dimension_numbers = #tpu.dot_dimension_numbers<[1], [0], [0], [1], [0, 0, 1, 1], [], []>} : vector<16x16xbf16>, vector<16x128xbf16>, vector<16x128xf32> -> vector<16x128xf32>
    %86 = tpu.reciprocal %83 {approx = true} : vector<16x1xf32> -> vector<16x1xf32>
    %87 = vector.broadcast %86 : vector<16x1xf32> to vector<16x128xf32>
    %88 = arith.mulf %85, %87 : vector<16x128xf32>
    %89 = arith.truncf %88 : vector<16x128xf32> to vector<16x128xbf16>
    %c0_41 = arith.constant 0 : index
    %c256_42 = arith.constant 256 : index
    %90 = vector.load %arg18[%c0_41, %c256_42] : memref<32x512xbf16, #tpu.memory_space<vmem>>, vector<16x128xbf16>
    tpu.vector_store %arg18[%c0_41, %c256_42], %89 {strides = array<i32>} : memref<32x512xbf16, #tpu.memory_space<vmem>>, vector<16x128xbf16>,
    %c0_43 = arith.constant 0 : index
    %c384 = arith.constant 384 : index
    %91 = vector.load %arg17[%c0_43, %c384] : memref<32x1536xbf16, #tpu.memory_space<vmem>>, vector<16x128xbf16>
    %c0_44 = arith.constant 0 : index
    %c896 = arith.constant 896 : index
    %92 = vector.load %arg17[%c0_44, %c896] : memref<32x1536xbf16, #tpu.memory_space<vmem>>, vector<16x128xbf16>
    %c0_45 = arith.constant 0 : index
    %c1408 = arith.constant 1408 : index
    %93 = vector.load %arg17[%c0_45, %c1408] : memref<32x1536xbf16, #tpu.memory_space<vmem>>, vector<16x128xbf16>
    %cst_46 = arith.constant dense<0.000000e+00> : vector<16x16xf32>
    %94 = tpu.matmul %91, %92, %cst_46 {dimension_numbers = #tpu.dot_dimension_numbers<[1], [1], [0], [0], [0, 0, 1, 0], [], []>} : vector<16x128xbf16>, vector<16x128xbf16>, vector<16x16xf32> -> vector<16x16xf32>
    %cst_47 = arith.constant 0.353553385 : f32
    %95 = vector.broadcast %cst_47 : f32 to vector<16x16xf32>
    %96 = arith.mulf %94, %95 : vector<16x16xf32>
    %97 = vector.broadcast %13 : vector<1x16xf32> to vector<16x16xf32>
    %98 = arith.addf %96, %97 : vector<16x16xf32>
    %cst_48 = arith.constant dense<0xFF800000> : vector<16xf32>
    %99 = vector.multi_reduction <maximumf>, %98, %cst_48 [1] : vector<16x16xf32> to vector<16xf32>
    %100 = vector.shape_cast %99 : vector<16xf32> to vector<16x1xf32>
    %101 = vector.broadcast %100 : vector<16x1xf32> to vector<16x16xf32>
    %102 = arith.subf %98, %101 : vector<16x16xf32>
    %103 = math.exp %102 : vector<16x16xf32>
    %cst_49 = arith.constant dense<0.000000e+00> : vector<16xf32>
    %104 = vector.multi_reduction <add>, %103, %cst_49 [1] : vector<16x16xf32> to vector<16xf32>
    %105 = vector.shape_cast %104 : vector<16xf32> to vector<16x1xf32>
    %106 = arith.truncf %103 : vector<16x16xf32> to vector<16x16xbf16>
    %cst_50 = arith.constant dense<0.000000e+00> : vector<16x128xf32>
    %107 = tpu.matmul %106, %93, %cst_50 {dimension_numbers = #tpu.dot_dimension_numbers<[1], [0], [0], [1], [0, 0, 1, 1], [], []>} : vector<16x16xbf16>, vector<16x128xbf16>, vector<16x128xf32> -> vector<16x128xf32>
    %108 = tpu.reciprocal %105 {approx = true} : vector<16x1xf32> -> vector<16x1xf32>
    %109 = vector.broadcast %108 : vector<16x1xf32> to vector<16x128xf32>
    %110 = arith.mulf %107, %109 : vector<16x128xf32>
    %111 = arith.truncf %110 : vector<16x128xf32> to vector<16x128xbf16>
    %c0_51 = arith.constant 0 : index
    %c384_52 = arith.constant 384 : index
    %112 = vector.load %arg18[%c0_51, %c384_52] : memref<32x512xbf16, #tpu.memory_space<vmem>>, vector<16x128xbf16>
    tpu.vector_store %arg18[%c0_51, %c384_52], %111 {strides = array<i32>} : memref<32x512xbf16, #tpu.memory_space<vmem>>, vector<16x128xbf16>,
    %c16 = arith.constant 16 : index
    %c0_53 = arith.constant 0 : index
    %113 = vector.load %arg17[%c16, %c0_53] : memref<32x1536xbf16, #tpu.memory_space<vmem>>, vector<16x128xbf16>
    %c16_54 = arith.constant 16 : index
    %c512_55 = arith.constant 512 : index
    %114 = vector.load %arg17[%c16_54, %c512_55] : memref<32x1536xbf16, #tpu.memory_space<vmem>>, vector<16x128xbf16>
    %c16_56 = arith.constant 16 : index
    %c1024_57 = arith.constant 1024 : index
    %115 = vector.load %arg17[%c16_56, %c1024_57] : memref<32x1536xbf16, #tpu.memory_space<vmem>>, vector<16x128xbf16>
    %cst_58 = arith.constant dense<0.000000e+00> : vector<16x16xf32>
    %116 = tpu.matmul %113, %114, %cst_58 {dimension_numbers = #tpu.dot_dimension_numbers<[1], [1], [0], [0], [0, 0, 1, 0], [], []>} : vector<16x128xbf16>, vector<16x128xbf16>, vector<16x16xf32> -> vector<16x16xf32>
    %cst_59 = arith.constant 0.353553385 : f32
    %117 = vector.broadcast %cst_59 : f32 to vector<16x16xf32>
    %118 = arith.mulf %116, %117 : vector<16x16xf32>
    %119 = vector.broadcast %13 : vector<1x16xf32> to vector<16x16xf32>
    %120 = arith.addf %118, %119 : vector<16x16xf32>
    %cst_60 = arith.constant dense<0xFF800000> : vector<16xf32>
    %121 = vector.multi_reduction <maximumf>, %120, %cst_60 [1] : vector<16x16xf32> to vector<16xf32>
    %122 = vector.shape_cast %121 : vector<16xf32> to vector<16x1xf32>
    %123 = vector.broadcast %122 : vector<16x1xf32> to vector<16x16xf32>
    %124 = arith.subf %120, %123 : vector<16x16xf32>
    %125 = math.exp %124 : vector<16x16xf32>
    %cst_61 = arith.constant dense<0.000000e+00> : vector<16xf32>
    %126 = vector.multi_reduction <add>, %125, %cst_61 [1] : vector<16x16xf32> to vector<16xf32>
    %127 = vector.shape_cast %126 : vector<16xf32> to vector<16x1xf32>
    %128 = arith.truncf %125 : vector<16x16xf32> to vector<16x16xbf16>
    %cst_62 = arith.constant dense<0.000000e+00> : vector<16x128xf32>
    %129 = tpu.matmul %128, %115, %cst_62 {dimension_numbers = #tpu.dot_dimension_numbers<[1], [0], [0], [1], [0, 0, 1, 1], [], []>} : vector<16x16xbf16>, vector<16x128xbf16>, vector<16x128xf32> -> vector<16x128xf32>
    %130 = tpu.reciprocal %127 {approx = true} : vector<16x1xf32> -> vector<16x1xf32>
    %131 = vector.broadcast %130 : vector<16x1xf32> to vector<16x128xf32>
    %132 = arith.mulf %129, %131 : vector<16x128xf32>
    %133 = arith.truncf %132 : vector<16x128xf32> to vector<16x128xbf16>
    %c16_63 = arith.constant 16 : index
    %c0_64 = arith.constant 0 : index
    %134 = vector.load %arg18[%c16_63, %c0_64] : memref<32x512xbf16, #tpu.memory_space<vmem>>, vector<16x128xbf16>
    tpu.vector_store %arg18[%c16_63, %c0_64], %133 {strides = array<i32>} : memref<32x512xbf16, #tpu.memory_space<vmem>>, vector<16x128xbf16>,
    %c16_65 = arith.constant 16 : index
    %c128_66 = arith.constant 128 : index
    %135 = vector.load %arg17[%c16_65, %c128_66] : memref<32x1536xbf16, #tpu.memory_space<vmem>>, vector<16x128xbf16>
    %c16_67 = arith.constant 16 : index
    %c640_68 = arith.constant 640 : index
    %136 = vector.load %arg17[%c16_67, %c640_68] : memref<32x1536xbf16, #tpu.memory_space<vmem>>, vector<16x128xbf16>
    %c16_69 = arith.constant 16 : index
    %c1152_70 = arith.constant 1152 : index
    %137 = vector.load %arg17[%c16_69, %c1152_70] : memref<32x1536xbf16, #tpu.memory_space<vmem>>, vector<16x128xbf16>
    %cst_71 = arith.constant dense<0.000000e+00> : vector<16x16xf32>
    %138 = tpu.matmul %135, %136, %cst_71 {dimension_numbers = #tpu.dot_dimension_numbers<[1], [1], [0], [0], [0, 0, 1, 0], [], []>} : vector<16x128xbf16>, vector<16x128xbf16>, vector<16x16xf32> -> vector<16x16xf32>
    %cst_72 = arith.constant 0.353553385 : f32
    %139 = vector.broadcast %cst_72 : f32 to vector<16x16xf32>
    %140 = arith.mulf %138, %139 : vector<16x16xf32>
    %141 = vector.broadcast %13 : vector<1x16xf32> to vector<16x16xf32>
    %142 = arith.addf %140, %141 : vector<16x16xf32>
    %cst_73 = arith.constant dense<0xFF800000> : vector<16xf32>
    %143 = vector.multi_reduction <maximumf>, %142, %cst_73 [1] : vector<16x16xf32> to vector<16xf32>
    %144 = vector.shape_cast %143 : vector<16xf32> to vector<16x1xf32>
    %145 = vector.broadcast %144 : vector<16x1xf32> to vector<16x16xf32>
    %146 = arith.subf %142, %145 : vector<16x16xf32>
    %147 = math.exp %146 : vector<16x16xf32>
    %cst_74 = arith.constant dense<0.000000e+00> : vector<16xf32>
    %148 = vector.multi_reduction <add>, %147, %cst_74 [1] : vector<16x16xf32> to vector<16xf32>
    %149 = vector.shape_cast %148 : vector<16xf32> to vector<16x1xf32>
    %150 = arith.truncf %147 : vector<16x16xf32> to vector<16x16xbf16>
    %cst_75 = arith.constant dense<0.000000e+00> : vector<16x128xf32>
    %151 = tpu.matmul %150, %137, %cst_75 {dimension_numbers = #tpu.dot_dimension_numbers<[1], [0], [0], [1], [0, 0, 1, 1], [], []>} : vector<16x16xbf16>, vector<16x128xbf16>, vector<16x128xf32> -> vector<16x128xf32>
    %152 = tpu.reciprocal %149 {approx = true} : vector<16x1xf32> -> vector<16x1xf32>
    %153 = vector.broadcast %152 : vector<16x1xf32> to vector<16x128xf32>
    %154 = arith.mulf %151, %153 : vector<16x128xf32>
    %155 = arith.truncf %154 : vector<16x128xf32> to vector<16x128xbf16>
    %c16_76 = arith.constant 16 : index
    %c128_77 = arith.constant 128 : index
    %156 = vector.load %arg18[%c16_76, %c128_77] : memref<32x512xbf16, #tpu.memory_space<vmem>>, vector<16x128xbf16>
    tpu.vector_store %arg18[%c16_76, %c128_77], %155 {strides = array<i32>} : memref<32x512xbf16, #tpu.memory_space<vmem>>, vector<16x128xbf16>,
    %c16_78 = arith.constant 16 : index
    %c256_79 = arith.constant 256 : index
    %157 = vector.load %arg17[%c16_78, %c256_79] : memref<32x1536xbf16, #tpu.memory_space<vmem>>, vector<16x128xbf16>
    %c16_80 = arith.constant 16 : index
    %c768_81 = arith.constant 768 : index
    %158 = vector.load %arg17[%c16_80, %c768_81] : memref<32x1536xbf16, #tpu.memory_space<vmem>>, vector<16x128xbf16>
    %c16_82 = arith.constant 16 : index
    %c1280_83 = arith.constant 1280 : index
    %159 = vector.load %arg17[%c16_82, %c1280_83] : memref<32x1536xbf16, #tpu.memory_space<vmem>>, vector<16x128xbf16>
    %cst_84 = arith.constant dense<0.000000e+00> : vector<16x16xf32>
    %160 = tpu.matmul %157, %158, %cst_84 {dimension_numbers = #tpu.dot_dimension_numbers<[1], [1], [0], [0], [0, 0, 1, 0], [], []>} : vector<16x128xbf16>, vector<16x128xbf16>, vector<16x16xf32> -> vector<16x16xf32>
    %cst_85 = arith.constant 0.353553385 : f32
    %161 = vector.broadcast %cst_85 : f32 to vector<16x16xf32>
    %162 = arith.mulf %160, %161 : vector<16x16xf32>
    %163 = vector.broadcast %13 : vector<1x16xf32> to vector<16x16xf32>
    %164 = arith.addf %162, %163 : vector<16x16xf32>
    %cst_86 = arith.constant dense<0xFF800000> : vector<16xf32>
    %165 = vector.multi_reduction <maximumf>, %164, %cst_86 [1] : vector<16x16xf32> to vector<16xf32>
    %166 = vector.shape_cast %165 : vector<16xf32> to vector<16x1xf32>
    %167 = vector.broadcast %166 : vector<16x1xf32> to vector<16x16xf32>
    %168 = arith.subf %164, %167 : vector<16x16xf32>
    %169 = math.exp %168 : vector<16x16xf32>
    %cst_87 = arith.constant dense<0.000000e+00> : vector<16xf32>
    %170 = vector.multi_reduction <add>, %169, %cst_87 [1] : vector<16x16xf32> to vector<16xf32>
    %171 = vector.shape_cast %170 : vector<16xf32> to vector<16x1xf32>
    %172 = arith.truncf %169 : vector<16x16xf32> to vector<16x16xbf16>
    %cst_88 = arith.constant dense<0.000000e+00> : vector<16x128xf32>
    %173 = tpu.matmul %172, %159, %cst_88 {dimension_numbers = #tpu.dot_dimension_numbers<[1], [0], [0], [1], [0, 0, 1, 1], [], []>} : vector<16x16xbf16>, vector<16x128xbf16>, vector<16x128xf32> -> vector<16x128xf32>
    %174 = tpu.reciprocal %171 {approx = true} : vector<16x1xf32> -> vector<16x1xf32>
    %175 = vector.broadcast %174 : vector<16x1xf32> to vector<16x128xf32>
    %176 = arith.mulf %173, %175 : vector<16x128xf32>
    %177 = arith.truncf %176 : vector<16x128xf32> to vector<16x128xbf16>
    %c16_89 = arith.constant 16 : index
    %c256_90 = arith.constant 256 : index
    %178 = vector.load %arg18[%c16_89, %c256_90] : memref<32x512xbf16, #tpu.memory_space<vmem>>, vector<16x128xbf16>
    tpu.vector_store %arg18[%c16_89, %c256_90], %177 {strides = array<i32>} : memref<32x512xbf16, #tpu.memory_space<vmem>>, vector<16x128xbf16>,
    %c16_91 = arith.constant 16 : index
    %c384_92 = arith.constant 384 : index
    %179 = vector.load %arg17[%c16_91, %c384_92] : memref<32x1536xbf16, #tpu.memory_space<vmem>>, vector<16x128xbf16>
    %c16_93 = arith.constant 16 : index
    %c896_94 = arith.constant 896 : index
    %180 = vector.load %arg17[%c16_93, %c896_94] : memref<32x1536xbf16, #tpu.memory_space<vmem>>, vector<16x128xbf16>
    %c16_95 = arith.constant 16 : index
    %c1408_96 = arith.constant 1408 : index
    %181 = vector.load %arg17[%c16_95, %c1408_96] : memref<32x1536xbf16, #tpu.memory_space<vmem>>, vector<16x128xbf16>
    %cst_97 = arith.constant dense<0.000000e+00> : vector<16x16xf32>
    %182 = tpu.matmul %179, %180, %cst_97 {dimension_numbers = #tpu.dot_dimension_numbers<[1], [1], [0], [0], [0, 0, 1, 0], [], []>} : vector<16x128xbf16>, vector<16x128xbf16>, vector<16x16xf32> -> vector<16x16xf32>
    %cst_98 = arith.constant 0.353553385 : f32
    %183 = vector.broadcast %cst_98 : f32 to vector<16x16xf32>
    %184 = arith.mulf %182, %183 : vector<16x16xf32>
    %185 = vector.broadcast %13 : vector<1x16xf32> to vector<16x16xf32>
    %186 = arith.addf %184, %185 : vector<16x16xf32>
    %cst_99 = arith.constant dense<0xFF800000> : vector<16xf32>
    %187 = vector.multi_reduction <maximumf>, %186, %cst_99 [1] : vector<16x16xf32> to vector<16xf32>
    %188 = vector.shape_cast %187 : vector<16xf32> to vector<16x1xf32>
    %189 = vector.broadcast %188 : vector<16x1xf32> to vector<16x16xf32>
    %190 = arith.subf %186, %189 : vector<16x16xf32>
    %191 = math.exp %190 : vector<16x16xf32>
    %cst_100 = arith.constant dense<0.000000e+00> : vector<16xf32>
    %192 = vector.multi_reduction <add>, %191, %cst_100 [1] : vector<16x16xf32> to vector<16xf32>
    %193 = vector.shape_cast %192 : vector<16xf32> to vector<16x1xf32>
    %194 = arith.truncf %191 : vector<16x16xf32> to vector<16x16xbf16>
    %cst_101 = arith.constant dense<0.000000e+00> : vector<16x128xf32>
    %195 = tpu.matmul %194, %181, %cst_101 {dimension_numbers = #tpu.dot_dimension_numbers<[1], [0], [0], [1], [0, 0, 1, 1], [], []>} : vector<16x16xbf16>, vector<16x128xbf16>, vector<16x128xf32> -> vector<16x128xf32>
    %196 = tpu.reciprocal %193 {approx = true} : vector<16x1xf32> -> vector<16x1xf32>
    %197 = vector.broadcast %196 : vector<16x1xf32> to vector<16x128xf32>
    %198 = arith.mulf %195, %197 : vector<16x128xf32>
    %199 = arith.truncf %198 : vector<16x128xf32> to vector<16x128xbf16>
    %c16_102 = arith.constant 16 : index
    %c384_103 = arith.constant 384 : index
    %200 = vector.load %arg18[%c16_102, %c384_103] : memref<32x512xbf16, #tpu.memory_space<vmem>>, vector<16x128xbf16>
    tpu.vector_store %arg18[%c16_102, %c384_103], %199 {strides = array<i32>} : memref<32x512xbf16, #tpu.memory_space<vmem>>, vector<16x128xbf16>,
    %c0_104 = arith.constant 0 : index
    %c0_105 = arith.constant 0 : index
    %201 = vector.load %arg18[%c0_104, %c0_105] : memref<32x512xbf16, #tpu.memory_space<vmem>>, vector<32x512xbf16>
    %c0_106 = arith.constant 0 : index
    %c0_107 = arith.constant 0 : index
    %c0_108 = arith.constant 0 : index
    %202 = vector.load %arg5[%c0_106, %c0_107, %c0_108] : memref<1x512x128xbf16, #tpu.memory_space<vmem>>, vector<1x512x128xbf16>
    %203 = vector.shape_cast %202 : vector<1x512x128xbf16> to vector<512x128xbf16>
    %cst_109 = arith.constant dense<0.000000e+00> : vector<32x128xf32>
    %204 = tpu.matmul %201, %203, %cst_109 {dimension_numbers = #tpu.dot_dimension_numbers<[1], [0], [0], [1], [0, 0, 1, 1], [], []>} : vector<32x512xbf16>, vector<512x128xbf16>, vector<32x128xf32> -> vector<32x128xf32>
    %c0_110 = arith.constant 0 : index
    %c0_111 = arith.constant 0 : index
    %c0_112 = arith.constant 0 : index
    %205 = vector.load %arg6[%c0_110, %c0_111, %c0_112] : memref<1x1x128xf32, #tpu.memory_space<vmem>>, vector<1x1x128xf32>
    %206 = vector.shape_cast %205 : vector<1x1x128xf32> to vector<1x128xf32>
    %207 = vector.broadcast %206 : vector<1x128xf32> to vector<32x128xf32>
    %208 = arith.addf %204, %207 : vector<32x128xf32>
    %209 = arith.addf %208, %14 : vector<32x128xf32>
    %c0_113 = arith.constant 0 : index
    %c0_114 = arith.constant 0 : index
    %c0_115 = arith.constant 0 : index
    %210 = vector.load %arg7[%c0_113, %c0_114, %c0_115] : memref<1x1x128xf32, #tpu.memory_space<vmem>>, vector<1x1x128xf32>
    %211 = vector.shape_cast %210 : vector<1x1x128xf32> to vector<1x128xf32>
    %c0_116 = arith.constant 0 : index
    %c0_117 = arith.constant 0 : index
    %c0_118 = arith.constant 0 : index
    %212 = vector.load %arg8[%c0_116, %c0_117, %c0_118] : memref<1x1x128xf32, #tpu.memory_space<vmem>>, vector<1x1x128xf32>
    %213 = vector.shape_cast %212 : vector<1x1x128xf32> to vector<1x128xf32>
    %cst_119 = arith.constant dense<0.000000e+00> : vector<32xf32>
    %214 = vector.multi_reduction <add>, %209, %cst_119 [1] : vector<32x128xf32> to vector<32xf32>
    %215 = vector.shape_cast %214 : vector<32xf32> to vector<32x1xf32>
    %cst_120 = arith.constant 3.125000e-02 : f32
    %216 = vector.broadcast %cst_120 : f32 to vector<32x1xf32>
    %217 = arith.mulf %215, %216 : vector<32x1xf32>
    %218 = vector.broadcast %217 : vector<32x1xf32> to vector<32x128xf32>
    %219 = arith.subf %209, %218 : vector<32x128xf32>
    %220 = vector.broadcast %7 : vector<1x128xf32> to vector<32x128xf32>
    %221 = arith.mulf %219, %220 : vector<32x128xf32>
    %222 = arith.mulf %221, %221 : vector<32x128xf32>
    %cst_121 = arith.constant dense<0.000000e+00> : vector<32xf32>
    %223 = vector.multi_reduction <add>, %222, %cst_121 [1] : vector<32x128xf32> to vector<32xf32>
    %224 = vector.shape_cast %223 : vector<32xf32> to vector<32x1xf32>
    %cst_122 = arith.constant 3.125000e-02 : f32
    %225 = vector.broadcast %cst_122 : f32 to vector<32x1xf32>
    %226 = arith.mulf %224, %225 : vector<32x1xf32>
    %227 = vector.broadcast %217 : vector<32x1xf32> to vector<32x128xf32>
    %228 = arith.subf %209, %227 : vector<32x128xf32>
    %cst_123 = arith.constant 9.99999974E-6 : f32
    %229 = vector.broadcast %cst_123 : f32 to vector<32x1xf32>
    %230 = arith.addf %226, %229 : vector<32x1xf32>
    %231 = math.rsqrt %230 : vector<32x1xf32>
    %232 = vector.broadcast %231 : vector<32x1xf32> to vector<32x128xf32>
    %233 = arith.mulf %228, %232 : vector<32x128xf32>
    %234 = vector.broadcast %211 : vector<1x128xf32> to vector<32x128xf32>
    %235 = arith.mulf %233, %234 : vector<32x128xf32>
    %236 = vector.broadcast %213 : vector<1x128xf32> to vector<32x128xf32>
    %237 = arith.addf %235, %236 : vector<32x128xf32>
    %238 = arith.truncf %237 : vector<32x128xf32> to vector<32x128xbf16>
    %c0_124 = arith.constant 0 : index
    %c0_125 = arith.constant 0 : index
    %c0_126 = arith.constant 0 : index
    %239 = vector.load %arg9[%c0_124, %c0_125, %c0_126] : memref<1x128x128xbf16, #tpu.memory_space<vmem>>, vector<1x128x128xbf16>
    %240 = vector.shape_cast %239 : vector<1x128x128xbf16> to vector<128x128xbf16>
    %cst_127 = arith.constant dense<0.000000e+00> : vector<32x128xf32>
    %241 = tpu.matmul %238, %240, %cst_127 {dimension_numbers = #tpu.dot_dimension_numbers<[1], [0], [0], [1], [0, 0, 1, 1], [], []>} : vector<32x128xbf16>, vector<128x128xbf16>, vector<32x128xf32> -> vector<32x128xf32>
    %c0_128 = arith.constant 0 : index
    %c0_129 = arith.constant 0 : index
    %c0_130 = arith.constant 0 : index
    %242 = vector.load %arg10[%c0_128, %c0_129, %c0_130] : memref<1x1x128xf32, #tpu.memory_space<vmem>>, vector<1x1x128xf32>
    %243 = vector.shape_cast %242 : vector<1x1x128xf32> to vector<1x128xf32>
    %244 = vector.broadcast %243 : vector<1x128xf32> to vector<32x128xf32>
    %245 = arith.addf %241, %244 : vector<32x128xf32>
    %cst_131 = arith.constant 0.000000e+00 : f32
    %246 = vector.broadcast %cst_131 : f32 to vector<32x128xf32>
    %247 = arith.maximumf %245, %246 : vector<32x128xf32>
    %248 = arith.truncf %247 : vector<32x128xf32> to vector<32x128xbf16>
    %c0_132 = arith.constant 0 : index
    %c0_133 = arith.constant 0 : index
    %c0_134 = arith.constant 0 : index
    %249 = vector.load %arg11[%c0_132, %c0_133, %c0_134] : memref<1x128x128xbf16, #tpu.memory_space<vmem>>, vector<1x128x128xbf16>
    %250 = vector.shape_cast %249 : vector<1x128x128xbf16> to vector<128x128xbf16>
    %cst_135 = arith.constant dense<0.000000e+00> : vector<32x128xf32>
    %251 = tpu.matmul %248, %250, %cst_135 {dimension_numbers = #tpu.dot_dimension_numbers<[1], [0], [0], [1], [0, 0, 1, 1], [], []>} : vector<32x128xbf16>, vector<128x128xbf16>, vector<32x128xf32> -> vector<32x128xf32>
    %c0_136 = arith.constant 0 : index
    %c0_137 = arith.constant 0 : index
    %c0_138 = arith.constant 0 : index
    %252 = vector.load %arg12[%c0_136, %c0_137, %c0_138] : memref<1x1x128xf32, #tpu.memory_space<vmem>>, vector<1x1x128xf32>
    %253 = vector.shape_cast %252 : vector<1x1x128xf32> to vector<1x128xf32>
    %254 = vector.broadcast %253 : vector<1x128xf32> to vector<32x128xf32>
    %255 = arith.addf %251, %254 : vector<32x128xf32>
    %256 = arith.addf %255, %237 : vector<32x128xf32>
    %c0_139 = arith.constant 0 : index
    %c0_140 = arith.constant 0 : index
    %c0_141 = arith.constant 0 : index
    %257 = vector.load %arg13[%c0_139, %c0_140, %c0_141] : memref<1x1x128xf32, #tpu.memory_space<vmem>>, vector<1x1x128xf32>
    %258 = vector.shape_cast %257 : vector<1x1x128xf32> to vector<1x128xf32>
    %c0_142 = arith.constant 0 : index
    %c0_143 = arith.constant 0 : index
    %c0_144 = arith.constant 0 : index
    %259 = vector.load %arg14[%c0_142, %c0_143, %c0_144] : memref<1x1x128xf32, #tpu.memory_space<vmem>>, vector<1x1x128xf32>
    %260 = vector.shape_cast %259 : vector<1x1x128xf32> to vector<1x128xf32>
    %cst_145 = arith.constant dense<0.000000e+00> : vector<32xf32>
    %261 = vector.multi_reduction <add>, %256, %cst_145 [1] : vector<32x128xf32> to vector<32xf32>
    %262 = vector.shape_cast %261 : vector<32xf32> to vector<32x1xf32>
    %cst_146 = arith.constant 3.125000e-02 : f32
    %263 = vector.broadcast %cst_146 : f32 to vector<32x1xf32>
    %264 = arith.mulf %262, %263 : vector<32x1xf32>
    %265 = vector.broadcast %264 : vector<32x1xf32> to vector<32x128xf32>
    %266 = arith.subf %256, %265 : vector<32x128xf32>
    %267 = vector.broadcast %7 : vector<1x128xf32> to vector<32x128xf32>
    %268 = arith.mulf %266, %267 : vector<32x128xf32>
    %269 = arith.mulf %268, %268 : vector<32x128xf32>
    %cst_147 = arith.constant dense<0.000000e+00> : vector<32xf32>
    %270 = vector.multi_reduction <add>, %269, %cst_147 [1] : vector<32x128xf32> to vector<32xf32>
    %271 = vector.shape_cast %270 : vector<32xf32> to vector<32x1xf32>
    %cst_148 = arith.constant 3.125000e-02 : f32
    %272 = vector.broadcast %cst_148 : f32 to vector<32x1xf32>
    %273 = arith.mulf %271, %272 : vector<32x1xf32>
    %274 = vector.broadcast %264 : vector<32x1xf32> to vector<32x128xf32>
    %275 = arith.subf %256, %274 : vector<32x128xf32>
    %cst_149 = arith.constant 9.99999974E-6 : f32
    %276 = vector.broadcast %cst_149 : f32 to vector<32x1xf32>
    %277 = arith.addf %273, %276 : vector<32x1xf32>
    %278 = math.rsqrt %277 : vector<32x1xf32>
    %279 = vector.broadcast %278 : vector<32x1xf32> to vector<32x128xf32>
    %280 = arith.mulf %275, %279 : vector<32x128xf32>
    %281 = vector.broadcast %258 : vector<1x128xf32> to vector<32x128xf32>
    %282 = arith.mulf %280, %281 : vector<32x128xf32>
    %283 = vector.broadcast %260 : vector<1x128xf32> to vector<32x128xf32>
    %284 = arith.addf %282, %283 : vector<32x128xf32>
    %c0_150 = arith.constant 0 : index
    %c0_151 = arith.constant 0 : index
    %285 = vector.load %arg16[%c0_150, %c0_151] : memref<32x128xf32, #tpu.memory_space<vmem>>, vector<32x128xf32>
    tpu.vector_store %arg16[%c0_150, %c0_151], %284 {strides = array<i32>} : memref<32x128xf32, #tpu.memory_space<vmem>>, vector<32x128xf32>,
    %c1_i32 = arith.constant 1 : i32
    %286 = arith.cmpi eq, %arg1, %c1_i32 : i32
    %287 = arith.extui %286 : i1 to i32
    %c0_i32_152 = arith.constant 0 : i32
    %288 = arith.cmpi ne, %287, %c0_i32_152 : i32
    scf.if %288 {
      %c0_153 = arith.constant 0 : index
      %c0_154 = arith.constant 0 : index
      %289 = vector.load %arg15[%c0_153, %c0_154] : memref<32x128xf32, #tpu.memory_space<vmem>>, vector<32x128xf32>
      tpu.vector_store %arg15[%c0_153, %c0_154], %284 {strides = array<i32>} : memref<32x128xf32, #tpu.memory_space<vmem>>, vector<32x128xf32>,
    } else {
    }
    return
  }
  func.func @transform_0(%arg0: i32, %arg1: i32) -> (i32, i32) {
    %c0_i32 = arith.constant 0 : i32
    %c0_i32_0 = arith.constant 0 : i32
    return %arg0, %c0_i32 : i32, i32
  }
  func.func @transform_1(%arg0: i32, %arg1: i32) -> (i32, i32, i32) {
    %c0_i32 = arith.constant 0 : i32
    %c0_i32_0 = arith.constant 0 : i32
    %c0_i32_1 = arith.constant 0 : i32
    return %arg1, %c0_i32, %c0_i32_0 : i32, i32, i32
  }
  func.func @transform_2(%arg0: i32, %arg1: i32) -> (i32, i32, i32) {
    %c0_i32 = arith.constant 0 : i32
    %c0_i32_0 = arith.constant 0 : i32
    %c0_i32_1 = arith.constant 0 : i32
    return %arg1, %c0_i32, %c0_i32_0 : i32, i32, i32
  }
  func.func @transform_3(%arg0: i32, %arg1: i32) -> (i32, i32, i32) {
    %c0_i32 = arith.constant 0 : i32
    %c0_i32_0 = arith.constant 0 : i32
    %c0_i32_1 = arith.constant 0 : i32
    return %arg1, %c0_i32, %c0_i32_0 : i32, i32, i32
  }
  func.func @transform_4(%arg0: i32, %arg1: i32) -> (i32, i32, i32) {
    %c0_i32 = arith.constant 0 : i32
    %c0_i32_0 = arith.constant 0 : i32
    %c0_i32_1 = arith.constant 0 : i32
    return %arg1, %c0_i32, %c0_i32_0 : i32, i32, i32
  }
  func.func @transform_5(%arg0: i32, %arg1: i32) -> (i32, i32, i32) {
    %c0_i32 = arith.constant 0 : i32
    %c0_i32_0 = arith.constant 0 : i32
    %c0_i32_1 = arith.constant 0 : i32
    return %arg1, %c0_i32, %c0_i32_0 : i32, i32, i32
  }
  func.func @transform_6(%arg0: i32, %arg1: i32) -> (i32, i32, i32) {
    %c0_i32 = arith.constant 0 : i32
    %c0_i32_0 = arith.constant 0 : i32
    %c0_i32_1 = arith.constant 0 : i32
    return %arg1, %c0_i32, %c0_i32_0 : i32, i32, i32
  }
  func.func @transform_7(%arg0: i32, %arg1: i32) -> (i32, i32, i32) {
    %c0_i32 = arith.constant 0 : i32
    %c0_i32_0 = arith.constant 0 : i32
    %c0_i32_1 = arith.constant 0 : i32
    return %arg1, %c0_i32, %c0_i32_0 : i32, i32, i32
  }
  func.func @transform_8(%arg0: i32, %arg1: i32) -> (i32, i32, i32) {
    %c0_i32 = arith.constant 0 : i32
    %c0_i32_0 = arith.constant 0 : i32
    %c0_i32_1 = arith.constant 0 : i32
    return %arg1, %c0_i32, %c0_i32_0 : i32, i32, i32
  }
  func.func @transform_9(%arg0: i32, %arg1: i32) -> (i32, i32, i32) {
    %c0_i32 = arith.constant 0 : i32
    %c0_i32_0 = arith.constant 0 : i32
    %c0_i32_1 = arith.constant 0 : i32
    return %arg1, %c0_i32, %c0_i32_0 : i32, i32, i32
  }
  func.func @transform_10(%arg0: i32, %arg1: i32) -> (i32, i32, i32) {
    %c0_i32 = arith.constant 0 : i32
    %c0_i32_0 = arith.constant 0 : i32
    %c0_i32_1 = arith.constant 0 : i32
    return %arg1, %c0_i32, %c0_i32_0 : i32, i32, i32
  }
  func.func @transform_11(%arg0: i32, %arg1: i32) -> (i32, i32, i32) {
    %c0_i32 = arith.constant 0 : i32
    %c0_i32_0 = arith.constant 0 : i32
    %c0_i32_1 = arith.constant 0 : i32
    return %arg1, %c0_i32, %c0_i32_0 : i32, i32, i32
  }
  func.func @transform_12(%arg0: i32, %arg1: i32) -> (i32, i32, i32) {
    %c0_i32 = arith.constant 0 : i32
    %c0_i32_0 = arith.constant 0 : i32
    %c0_i32_1 = arith.constant 0 : i32
    return %arg1, %c0_i32, %c0_i32_0 : i32, i32, i32
  }
  func.func @transform_13(%arg0: i32, %arg1: i32) -> (i32, i32) {
    %c0_i32 = arith.constant 0 : i32
    %c0_i32_0 = arith.constant 0 : i32
    return %arg0, %c0_i32 : i32, i32
  }
}

</mosaic_0001>

<bundles_post_ra>
// kernel: tpu_custom_call.1
= control target key start
LH: loop header
LB: loop body
LE: loop exit
PB: predicated region body
PF: predicated region fallthrough
CT: control target
= control target key end

     0   :  { %s6157_s0 = inlined_call_operand.hbm [shape: f32[32,128], index: 0, kind: input, shape index: {}]   ;;  %s6158_s1 = inlined_call_operand.hbm [shape: bf16[2,128,1536], index: 1, kind: input, shape index: {}]   ;;  %s6159_s2 = inlined_call_operand.hbm [shape: f32[2,1,1536], index: 2, kind: input, shape index: {}]   ;;  %s6160_s3 = inlined_call_operand.hbm [shape: bf16[2,512,128], index: 3, kind: input, shape index: {}]   ;;  %s6161_s4 = inlined_call_operand.vmem [shape: f32[2,1,128], index: 4, kind: input, shape index: {}]   ;;  %s6162_s5 = inlined_call_operand.vmem [shape: f32[2,1,128], index: 5, kind: input, shape index: {}]   ;;  %s6163_s6 = inlined_call_operand.vmem [shape: f32[2,1,128], index: 6, kind: input, shape index: {}]   ;;  %s6164_s7 = inlined_call_operand.hbm [shape: bf16[2,128,128], index: 7, kind: input, shape index: {}]   ;;  %s6165_s8 = inlined_call_operand.vmem [shape: f32[2,1,128], index: 8, kind: input, shape index: {}]   ;;  %s6166_s9 = inlined_call_operand.hbm [shape: bf16[2,128,128], index: 9, kind: input, shape index: {}]   ;;  %s6167_s10 = inlined_call_operand.vmem [shape: f32[2,1,128], index: 10, kind: input, shape index: {}]   ;;  %s6168_s11 = inlined_call_operand.vmem [shape: f32[2,1,128], index: 11, kind: input, shape index: {}]   ;;  %s6169_s12 = inlined_call_operand.vmem [shape: f32[2,1,128], index: 12, kind: input, shape index: {}]   ;;  %s6170_s13 = inlined_call_operand.hbm [shape: f32[32,128], index: 13, kind: output, shape index: {}]  }
   0x1   :  { %6181 = sst [smem:[#allocation28_spill]] %s6157_s0 }
   0x2   :  { %6182 = sst [smem:[#allocation29_spill]] %s6158_s1 }
   0x3   :  { %6183 = sst [smem:[#allocation30_spill]] %s6159_s2 }
   0x4   :  { %6184 = sst [smem:[#allocation31_spill]] %s6160_s3 }
   0x5   :  { %6185 = sst [smem:[#allocation32_spill]] %s6162_s5 }
   0x6   :  { %6186 = sst [smem:[#allocation33_spill]] %s6163_s6 }
   0x7   :  { %6187 = sst [smem:[#allocation34_spill]] %s6164_s7 }
   0x8   :  { %6188 = sst [smem:[#allocation35_spill]] %s6165_s8 }
   0x9   :  { %6189 = sst [smem:[#allocation36_spill]] %s6166_s9 }
   0xa   :  { %6190 = sst [smem:[#allocation37_spill]] %s6167_s10 }
   0xb   :  { %6191 = sst [smem:[#allocation38_spill]] %s6168_s11 }
   0xc   :  { %6192 = sst [smem:[#allocation39_spill]] %s6169_s12 }
   0xd   :  { %6193 = sst [smem:[#allocation40_spill]] %s6170_s13 }
   0xe   :  { %18 = vsyncpa [#allocation6], 0 }
   0xf   :  { %19 = vsyncpa [#allocation9], 0 }
  0x10   :  { %21 = vsyncpa [#allocation9 + $0x1], 0 }
  0x11   :  { %22 = vsyncpa [#allocation12], 0 }
  0x12   :  { %24 = vsyncpa [#allocation12 + $0x1], 0 }
  0x13   :  { %25 = vsyncpa [#allocation15], 0 }
  0x14   :  { %27 = vsyncpa [#allocation15 + $0x1], 0 }
  0x15   :  { %28 = vsyncpa [#allocation7], 0  ;;  %s5428_s25 = smov 0   ;;  %s5430_s26 = smov 0  }
  0x16   :  { %s5432_s27 = smov 0   ;;  %s5434_s28 = smov 0  }
  0x17   :  { %s5436_s29 = smov 0   ;;  %s5438_s30 = smov 0  }
  0x18 LB: > { %6194 = sst [smem:[#allocation22_spill]] %s5321_s26  ;;  %s43_s14 = sadd.s32 1, %s5333_s29  ;;  %s5337_s30 = sphi %s5438_s30, %s34_s30   ;;  %s5333_s29 = sphi %s5436_s29, %s6235_s29   ;;  %s5329_s28 = sphi %s5434_s28, %s6234_s28   ;;  %s5325_s27 = sphi %s5432_s27, %s6233_s27   ;;  %s5321_s26 = sphi %s5430_s26, %s6232_s26   ;;  %s5317_s25 = sphi %s5428_s25, %s6231_s25  }
  0x19   : > { %6195 = sst [smem:[#allocation23_spill]] %s5325_s27  ;;  %s79_s15 = sadd.s32 1, %s5325_s27 }
  0x1a   : > { %6196 = sst [smem:[#allocation24_spill]] %s5333_s29  ;;  %p44_p0 = scmp.ge.s32.totalorder %s43_s14, 2 }
  0x1b   : > { %6197 = sst [smem:[#allocation25_spill]] %s5337_s30  ;;  %p86_p1 = scmp.ne.s32.totalorder %s5325_s27, %s5321_s26 }
  0x1c   : > { %p87_p2 = scmp.eq.s32.totalorder %s5337_s30, 0  ;;  %s6237_s14 = smov (%p44_p0, %s43_s14), 0 }
  0x1d   : > { %6198 = sst [smem:[#allocation26_spill]] %s6237_s14  ;;  %p4703_p4 = scmp.lt.s32.totalorder %s5337_s30, 2 }
  0x1e   : > { %p88_p3 = por %p87_p2, %p86_p1  ;;  %s76_s16 = ssub.s32 %s5333_s29, %s6237_s14 }
  0x1f   : > { %s6172_s17 = sand.u32 1, %s5337_s30   ;;  %p77_p5 = scmp.eq.s32.totalorder %s76_s16, 0 }
  0x20   : > { %s5470_s18 = sand.u32 1, %s5325_s27   ;;  %s4659_s19 = smul.u32 12288, %s5333_s29 }
  0x21   : > { %s5474_s20 = scalar_select %p77_p5, %s5325_s27, %s79_s15  }
  0x22   : > { %s4658_s21 = smul.u32 768, %s5470_s18  ;;  %s6200_s1 = sld [smem:[#allocation29_spill]] }
  0x23   : > { %6199 = sst [smem:[#allocation27_spill]] %s5474_s20  ;;  %p5480_p6 = pnand %p4703_p4, %p88_p3 }
  0x24   : > { %s448_s12 = scalar_lea.vmem [#allocation8], %s4658_s21  ;;  %s5486_s16 = scalar_lea.sflag [#allocation9], %s6172_s17 }
  0x25   : > { %s455_s14 = sshll.u32 %s448_s12, 4  ;;  %p5490_p7 = pneg %p5480_p6  ;;  %s456_s14 = int_to_ptr.vmem [resolvable:$true] %s455_s14 }
  0x26   : > { %s5094_s20 = scalar_lea.vmem %s456_s14, 12288 }
  0x27   : > { %p5095_p8 = scmp.ne.s32.totalorder %s456_s14, %s5094_s20 }
  0x28   : > { %s454_s24 = scalar_lea.hbm %s6200_s1, %s4659_s19  ;;  %s5339_s19 = smov [#allocation8]  }
  0x29   : > { %p5097_p9 = pnand %p5095_p8, %p5490_p7  ;;  %s5099_s22 = sshll.u32 %s5339_s19, 4  ;;  %s5100_s22 = int_to_ptr.vmem [resolvable:$false] %s5099_s22 }
  0x2a   : > { %s5101_s21 = scalar_lea.vmem %s5100_s22, 24576  ;;  %p5102_p11 = scmp.lt.s32.totalorder %s456_s14, %s5100_s22 }
  0x2b   : > { %p5098_p10 = pneg %p5097_p9  ;;  %p5103_p12 = scmp.lt.s32.totalorder %s5101_s21, %s5094_s20 }
  0x2d   : > { %p5104_p13 = por %p5103_p12, %p5102_p11 }
  0x2f   : > { %p5105_p0 = pnand %p5104_p13, %p5098_p10 }
  0x31   : > { %5108 = shalt.err (!%p5105_p0)
}
  0x32   : > { %s5340_s12 = smov 768   ;;  %s5341_s23 = smov 48  }
  0x33   : > { %4689 = dma.hbm_to_vmem [thread:$0]  (!%p5480_p6), %s454_s24, 12288, %s456_s14, %s5486_s16, %s5340_s12, %s5340_s12, %s5341_s23  }
  0x34   : > { %s4119_s17 = sshll.u32 %s5470_s18, 8  ;;  %s4371_s1 = sshll.u32 %s5333_s29, 12 }
  0x35   : > { %s6203_s3 = sld [smem:[#allocation31_spill]]  ;;  %s488_s20 = scalar_lea.vmem [#allocation11], %s4119_s17 }
  0x36   : > { %s495_s21 = sshll.u32 %s488_s20, 4  ;;  %s6204_s11 = sand.u32 1, %s5337_s30   ;;  %s496_s21 = int_to_ptr.vmem [resolvable:$true] %s495_s21 }
  0x37   : > { %s5506_s10 = scalar_lea.sflag [#allocation12], %s6204_s11  ;;  %s5122_s8 = scalar_lea.vmem %s496_s21, 4096 }
  0x38   : > { %p5123_p1 = scmp.ne.s32.totalorder %s496_s21, %s5122_s8  ;;  %s5342_s6 = smov [#allocation11]  }
  0x39   : > { %s5127_s5 = sshll.u32 %s5342_s6, 4  ;;  %s5128_s5 = int_to_ptr.vmem [resolvable:$false] %s5127_s5 }
  0x3a   : > { %p5125_p2 = pnand %p5123_p1, %p5490_p7  ;;  %s5129_s14 = scalar_lea.vmem %s5128_s5, 8192 }
  0x3b   : > { %s494_s22 = scalar_lea.hbm %s6203_s3, %s4371_s1  ;;  %p5130_p4 = scmp.lt.s32.totalorder %s496_s21, %s5128_s5 }
  0x3c   : > { %p5126_p3 = pneg %p5125_p2  ;;  %p5131_p5 = scmp.lt.s32.totalorder %s5129_s14, %s5122_s8 }
  0x3e   : > { %p5132_p8 = por %p5131_p5, %p5130_p4 }
  0x40   : > { %p5133_p9 = pnand %p5132_p8, %p5126_p3 }
  0x42   : > { %5136 = shalt.err (!%p5133_p9)
}
  0x43   : > { %s6174_s1 = smov 64   ;;  %s6176_s11 = smov 4  }
  0x44   : > { %4695 = dma.hbm_to_vmem [thread:$0]  (!%p5480_p6), %s494_s22, 4096, %s496_s21, %s5506_s10, %s6174_s1, %s6174_s1, %s6176_s11  }
  0x45   : > { %s5517_s5 = sadd.s32 4294967295, %s5337_s30   ;;  %p92_p10 = scmp.ne.s32.totalorder %s5321_s26, %s5317_s25 }
  0x46   : > { %p93_p11 = scmp.eq.s32.totalorder %s5517_s5, 0  ;;  %p4114_p12 = scmp.ge.s32.totalorder %s5337_s30, 1 }
  0x47   : > { %p415_p13 = scmp.lt.s32.totalorder %s5337_s30, 3  ;;  %s5345_s27 = smov [#allocation5]  }
  0x48   : > { %p5526_p0 = por %p93_p11, %p92_p10  ;;  %s430_s17 = sshll.u32 %s5345_s27, 4  ;;  %s431_s17 = int_to_ptr.vmem [resolvable:$true] %s430_s17 }
  0x49   : > { %p5530_p1 = pnand %p4114_p12, %p415_p13  ;;  %s4660_s24 = smul.u32 12, %s5470_s18 }
  0x4a   : > { %s4661_s23 = smul.u32 192, %s5333_s29  ;;  %s6208_s2 = sld [smem:[#allocation30_spill]] }
  0x4b   : > { %p4682_p2 = pneg %p5530_p1  ;;  %s5148_s21 = scalar_lea.vmem %s431_s17, 512 }
  0x4c   : > { %p5149_p5 = scmp.ne.s32.totalorder %s431_s17, %s5148_s21  ;;  %p5156_p10 = scmp.lt.s32.totalorder %s431_s17, %s431_s17 }
  0x4d   : > { %p5540_p3 = pnand %p4682_p2, %p93_p11  ;;  %p5157_p12 = scmp.lt.s32.totalorder %s5148_s21, %s5148_s21 }
  0x4f   : > { %p5139_p4 = pneg %p5540_p3  ;;  %p5158_p13 = por %p5157_p12, %p5156_p10 }
  0x50   : > { %s5548_s20 = scalar_lea.hbm %s6208_s2, %s4661_s23 }
  0x51   : > { %p5151_p8 = pnand %p5149_p5, %p5139_p4 }
  0x53   : > { %p5152_p9 = pneg %p5151_p8 }
  0x55   : > { %p5159_p2 = pnand %p5158_p13, %p5152_p9 }
  0x57   : > { %5162 = shalt.err (!%p5159_p2)
}
  0x58   : > { %s5346_s14 = smov 128   ;;  %s5347_s27 = smov 8  }
  0x59   : > { %s6209_s0 = sld [smem:[#allocation28_spill]]  ;;  %s469_s22 = scalar_lea.vmem [#allocation10], %s4660_s24 }
  0x5a   : > { %s477_s1 = sshll.u32 %s469_s22, 4  ;;  %s4372_s11 = sshll.u32 %s5333_s29, 10  ;;  %s478_s1 = int_to_ptr.vmem [resolvable:$true] %s477_s1 }
  0x5b   : > { %s6210_s7 = sld [smem:[#allocation34_spill]]  ;;  %s5176_s3 = scalar_lea.vmem %s478_s1, 192 }
  0x5c   : > { %p5177_p4 = scmp.ne.s32.totalorder %s478_s1, %s5176_s3  ;;  %s5348_s12 = smov [#allocation10]  }
  0x5d   : > { %s5181_s30 = sshll.u32 %s5348_s12, 4  ;;  %s5182_s30 = int_to_ptr.vmem [resolvable:$false] %s5181_s30 }
  0x5e   : > { %p5179_p5 = pnand %p5177_p4, %p5490_p7  ;;  %s5183_s23 = scalar_lea.vmem %s5182_s30, 384 }
  0x5f   : > { %4685 = dma.hbm_to_vmem [thread:$0]  (!%p5540_p3), %s6209_s0, 512, %s431_s17, [#allocation6], %s5346_s14, %s5346_s14, %s5347_s27  }
  0x60   : > { %p5180_p8 = pneg %p5179_p5  ;;  %p5184_p3 = scmp.lt.s32.totalorder %s478_s1, %s5182_s30 }
  0x61   : > { %s5563_s2 = scalar_lea.hbm %s6210_s7, %s4372_s11  ;;  %p5185_p9 = scmp.lt.s32.totalorder %s5183_s23, %s5176_s3 }
  0x63   : > { %p5186_p10 = por %p5185_p9, %p5184_p3 }
  0x65   : > { %p5187_p12 = pnand %p5186_p10, %p5180_p8 }
  0x67   : > { %5190 = shalt.err (!%p5187_p12)
}
  0x68   : > { %4692 = dma.hbm_to_vmem [thread:$0]  (!%p5480_p6), %s5548_s20, 192, %s478_s1, %s5486_s16  }
  0x69   : > { %s6211_s17 = sshll.u32 %s5470_s18, 6  ;;  %s5349_s3 = smov [#allocation13]  }
  0x6a   : > { %s527_s24 = scalar_lea.vmem [#allocation13], %s6211_s17  ;;  %s5209_s30 = sshll.u32 %s5349_s3, 4  ;;  %s5210_s30 = int_to_ptr.vmem [resolvable:$false] %s5209_s30 }
  0x6b   : > { %s534_s25 = sshll.u32 %s527_s24, 4  ;;  %s5211_s27 = scalar_lea.vmem %s5210_s30, 2048  ;;  %s535_s25 = int_to_ptr.vmem [resolvable:$true] %s534_s25 }
  0x6c   : > { %s5204_s14 = scalar_lea.vmem %s535_s25, 1024  ;;  %p5212_p5 = scmp.lt.s32.totalorder %s535_s25, %s5210_s30 }
  0x6d   : > { %p5205_p13 = scmp.ne.s32.totalorder %s535_s25, %s5204_s14  ;;  %p5213_p8 = scmp.lt.s32.totalorder %s5211_s27, %s5204_s14 }
  0x6f   : > { %p5207_p2 = pnand %p5205_p13, %p5490_p7  ;;  %p5214_p3 = por %p5213_p8, %p5212_p5 }
  0x71   : > { %p5208_p4 = pneg %p5207_p2 }
  0x73   : > { %p5215_p9 = pnand %p5214_p3, %p5208_p4 }
  0x75   : > { %5218 = shalt.err (!%p5215_p9)
}
  0x76   : > { %s6212_s16 = smov 4   ;;  %s6213_s1 = smov 64  }
  0x77   : > { %4698 = dma.hbm_to_vmem [thread:$0]  (!%p5480_p6), %s5563_s2, 1024, %s535_s25, %s5506_s10, %s6213_s1, %s6213_s1, %s6212_s16  }
  0x78   : > { %s6214_s9 = sld [smem:[#allocation36_spill]]  ;;  %s6215_s21 = smov %s6211_s17 }
  0x79   : > { %s554_s12 = scalar_lea.vmem [#allocation14], %s6215_s21  ;;  %s551_s17 = scalar_lea.sflag [#allocation15], %s5470_s18 }
  0x7a   : > { %s561_s23 = sshll.u32 %s554_s12, 4  ;;  %s5350_s14 = smov [#allocation14]   ;;  %s562_s23 = int_to_ptr.vmem [resolvable:$true] %s561_s23 }
  0x7b   : > { %s5232_s24 = scalar_lea.vmem %s562_s23, 1024  ;;  %s5237_s3 = sshll.u32 %s5350_s14, 4  ;;  %s5238_s3 = int_to_ptr.vmem [resolvable:$false] %s5237_s3 }
  0x7c   : > { %p5233_p10 = scmp.ne.s32.totalorder %s562_s23, %s5232_s24  ;;  %s5239_s30 = scalar_lea.vmem %s5238_s3, 2048 }
  0x7d   : > { %p5240_p2 = scmp.lt.s32.totalorder %s562_s23, %s5238_s3  ;;  %p5241_p4 = scmp.lt.s32.totalorder %s5239_s30, %s5232_s24 }
  0x7e   : > { %s560_s22 = scalar_lea.hbm %s6214_s9, %s4372_s11  ;;  %p5235_p12 = pnand %p5233_p10, %p5490_p7 }
  0x7f   : > { %p5242_p5 = por %p5241_p4, %p5240_p2 }
  0x80   : > { %p5236_p13 = pneg %p5235_p12 }
  0x82   : > { %p5243_p8 = pnand %p5242_p5, %p5236_p13 }
  0x84   : > { %5246 = shalt.err (!%p5243_p8)
}
  0x85   : > { %4701 = dma.hbm_to_vmem [thread:$0]  (!%p5480_p6), %s560_s22, 1024, %s562_s23, %s551_s17, %s6213_s1, %s6213_s1, %s6212_s16  }
  0x86   : > { %591 = sbr.rel (%p5530_p1) target bundleno = 2339 (0x923), region = 72 }
  0x8b   : > { %5296 = dma.done.wait (%p93_p11), [#allocation6], 512  }
  0x8c   : > { %5298 = vsyncadd (%p93_p11), [#allocation6], 4294966784  ;;  %s597_s2 = sand.u32 1, %s5517_s5   ;;  %s599_s10 = sand.u32 1, %s5321_s26  }
  0x8d   : > { %s4662_s18 = smul.u32 768, %s599_s10  ;;  %s598_s13 = scalar_lea.sflag [#allocation9], %s597_s2 }
  0x8f   : > { %s5605_s15 = scalar_lea.vmem [#allocation8], %s4662_s18 }
  0x90   : > { %5300 = dma.done.wait (%p5526_p0), %s598_s13, 12480  }
  0x91   : > { %5302 = vsyncadd (%p5526_p0), %s598_s13, 4294954816  ;;  %s4663_s11 = smul.u32 12, %s599_s10  ;;  %s4130_s8 = sshll.u32 %s599_s10, 8 }
  0x92   : > { %s616_s27 = scalar_lea.sflag [#allocation12], %s597_s2  ;;  %s5613_s16 = scalar_lea.vmem [#allocation11], %s4130_s8 }
  0x93   : > { %s5611_s25 = scalar_lea.vmem [#allocation10], %s4663_s11 }
  0x94   : > { %5304 = dma.done.wait (%p5526_p0), %s616_s27, 5120  }
  0x95   : > { %5306 = vsyncadd (%p5526_p0), %s616_s27, 4294962176  ;;  %s4131_s1 = sshll.u32 %s599_s10, 6  ;;  %s634_s19 = scalar_lea.sflag [#allocation15], %s599_s10 }
  0x96   : > { %s5619_s20 = scalar_lea.vmem [#allocation13], %s4131_s1  ;;  %s5621_s22 = scalar_lea.vmem [#allocation14], %s4131_s1 }
  0x97   : > { %5308 = dma.done.wait (%p5526_p0), %s634_s19, 1024  }
  0x98   : > { %5310 = vsyncadd (%p5526_p0), %s634_s19, 4294966272  ;;  %p717_p6 = scmp.lt.s32.totalorder %s5329_s28, 1  ;;  %s6216_s6 = sld [smem:[#allocation32_spill]] }
  0x99   : > { %s6217_s10 = sld [smem:[#allocation33_spill]]  ;;  %p4133_p7 = scmp.ne.s32.totalorder %s5329_s28, 0 }
  0x9a   : > { %s5629_s21 = scalar_select %p717_p6, %s5329_s28, 1 }
  0x9b   : > { %s6218_s8 = sld [smem:[#allocation35_spill]] }
  0x9c   : > { %s6219_s12 = sld [smem:[#allocation37_spill]] }
  0x9d   : > { %s6220_s9 = sld [smem:[#allocation38_spill]] }
  0x9e   : > { %s722_s3 = scalar_lea.vmem %s6216_s6, %s5629_s21  ;;  %s6221_s24 = sld [smem:[#allocation39_spill]] }
  0x9f   : > { %s725_s18 = scalar_lea.vmem %s6217_s10, %s5629_s21 }
  0xa0   : > { %743 = sbr.rel (%p4133_p7) target bundleno = 168 (0xa8), region = 100 }
  0xa1   : > { %s728_s27 = scalar_lea.vmem %s6218_s8, %s5629_s21 }
  0xa2   : > { %s731_s23 = scalar_lea.vmem %s6219_s12, %s5629_s21 }
  0xa3   : > { %s734_s17 = scalar_lea.vmem %s6220_s9, %s5629_s21 }
  0xa4   : > { %s737_s14 = scalar_lea.vmem %s6221_s24, %s5629_s21 }
  0xa5   : > { %v744_v0 = vld [vmem:[#allocation5] sm:$0xff]  ;;  %v745_v1 = vld [vmem:[#allocation5 + $0x8] sm:$0xff]  ;;  %v746_v2 = vld [vmem:[#allocation5 + $0x10] sm:$0xff] }
  0xa6   : > { %748 = vst [vmem:[#allocation2 + $0x10] sm:$0xff] %v744_v0  ;;  %749 = vst [vmem:[#allocation2] sm:$0xff] %v745_v1  ;;  %v747_v3 = vld [vmem:[#allocation5 + $0x18] sm:$0xff] }
  0xa7   : > { %750 = vst [vmem:[#allocation2 + $0x18] sm:$0xff] %v746_v2  ;;  %751 = vst [vmem:[#allocation2 + $0x8] sm:$0xff] %v747_v3 }
  0xa8 PF: > { %v4769_v4 = vld [vmem:[%s5605_s15 + $0x2a4] ss:$48 sps:$4 sm:$0xff]   ;;  %v4771_v5 = vld [vmem:[%s5605_s15 + $0x2a0] ss:$48 sps:$4 sm:$0xff]   ;;  %v5351_v6 = vmov 0   ;;  %vm5353_vm0 = vmmov 0   ;;  %s6222_s9 = scalar_lea.vmem %s6161_s4, %s5629_s21 }
  0xa9   : > { %1437 = vmatprep.mubr.bf16.mxu0 %v5351_v6  ;;  %1490 = vmatprep.mubr.bf16.mxu1 %v5351_v6  ;;  %v4772_v7 = vld [vmem:[%s5605_s15 + $0x244] ss:$48 sps:$4 sm:$0xff]   ;;  %v4774_v8 = vld [vmem:[%s5605_s15 + $0x240] ss:$48 sps:$4 sm:$0xff]   ;;  %v4783_v11 = vld [vmem:[%s5605_s15 + $0x2ac] ss:$48 sps:$4 sm:$0xff]  }
  0xaa   : > { %1405 = vmatprep.subr.bf16.mxu0 %v4769_v4  ;;  %v4775_v9 = vld [vmem:[%s5605_s15 + $0x1e4] ss:$48 sps:$4 sm:$0xff]   ;;  %v4777_v10 = vld [vmem:[%s5605_s15 + $0x1e0] ss:$48 sps:$4 sm:$0xff]   ;;  %v4786_v12 = vld [vmem:[%s5605_s15 + $0x2a8] ss:$48 sps:$4 sm:$0xff]   ;;  %1458 = vmatprep.subr.bf16.mxu1 %v4783_v11 }
  0xab   : > { %1406 = vmatpush1.bf16.msra.mxu0 %v4771_v5  ;;  %v4778_v13 = vld [vmem:[%s5605_s15 + $0x184] ss:$48 sps:$4 sm:$0xff]   ;;  %v4789_v14 = vld [vmem:[%s5605_s15 + $0x24c] ss:$48 sps:$4 sm:$0xff]   ;;  %1459 = vmatpush1.bf16.msra.mxu1 %v4786_v12  ;;  %v4792_v15 = vld [vmem:[%s5605_s15 + $0x248] ss:$48 sps:$4 sm:$0xff]  }
  0xac   : > { %1407 = vmatprep.subr.bf16.mxu0 %v4772_v7  ;;  %v4780_v16 = vld [vmem:[%s5605_s15 + $0x180] ss:$48 sps:$4 sm:$0xff]   ;;  %1460 = vmatprep.subr.bf16.mxu1 %v4789_v14  ;;  %v4781_v17 = vld [vmem:[%s5605_s15 + $0x124] ss:$48 sps:$4 sm:$0xff]   ;;  %v4795_v18 = vld [vmem:[%s5605_s15 + $0x1ec] ss:$48 sps:$4 sm:$0xff]  }
  0xad   : > { %v4798_v19 = vld [vmem:[%s5605_s15 + $0x1e8] ss:$48 sps:$4 sm:$0xff]   ;;  %v4785_v20 = vld [vmem:[%s5605_s15 + $0x120] ss:$48 sps:$4 sm:$0xff]   ;;  %v4801_v21 = vld [vmem:[%s5605_s15 + $0x18c] ss:$48 sps:$4 sm:$0xff]  }
  0xae   : > { %v4787_v22 = vld [vmem:[%s5605_s15 + $0xc4] ss:$48 sps:$4 sm:$0xff]   ;;  %v4791_v23 = vld [vmem:[%s5605_s15 + $0xc0] ss:$48 sps:$4 sm:$0xff]   ;;  %v4804_v24 = vld [vmem:[%s5605_s15 + $0x188] ss:$48 sps:$4 sm:$0xff]  }
  0xaf   : > { %1408 = vmatpush1.bf16.msra.mxu0 %v4774_v8  ;;  %1461 = vmatpush1.bf16.msra.mxu1 %v4792_v15  ;;  %v4805_v25 = vld [vmem:[%s5605_s15 + $0x12c] ss:$48 sps:$4 sm:$0xff]   ;;  %v4793_v26 = vld [vmem:[%s5605_s15 + $0x64] ss:$48 sps:$4 sm:$0xff]   ;;  %v4797_v27 = vld [vmem:[%s5605_s15 + $0x60] ss:$48 sps:$4 sm:$0xff]  }
  0xb0   : > { %1409 = vmatprep.subr.bf16.mxu0 %v4775_v9  ;;  %1462 = vmatprep.subr.bf16.mxu1 %v4795_v18  ;;  %v4810_v28 = vld [vmem:[%s5605_s15 + $0x128] ss:$48 sps:$4 sm:$0xff]   ;;  %v4811_v29 = vld [vmem:[%s5605_s15 + $0xcc] ss:$48 sps:$4 sm:$0xff]   ;;  %v4799_v30 = vld [vmem:[%s5605_s15 + $0x4] ss:$48 sps:$4 sm:$0xff]  }
  0xb1   : > { %v4803_v31 = vld [vmem:[%s5605_s15] ss:$48 sps:$4 sm:$0xff]   ;;  %v4816_v34 = vld [vmem:[%s5605_s15 + $0xc8] ss:$48 sps:$4 sm:$0xff]   ;;  %v4817_v35 = vld [vmem:[%s5605_s15 + $0x6c] ss:$48 sps:$4 sm:$0xff]  }
  0xb2   : > { %v759_v32 = vld [vmem:[#allocation2 + $0x10] sm:$0xff]  ;;  %v760_v33 = vld [vmem:[#allocation2] sm:$0xff]  ;;  %v4822_v38 = vld [vmem:[%s5605_s15 + $0x68] ss:$48 sps:$4 sm:$0xff]   ;;  %vm1954_vm2 = vcmask 130048   ;;  %p4366_p11 = scmp.ne.s32.totalorder %s5329_s28, 1 }
  0xb3   : > { %1410 = vmatpush1.bf16.msra.mxu0 %v4777_v10  ;;  %1463 = vmatpush1.bf16.msra.mxu1 %v4798_v19  ;;  %v4809_v36 = vld [vmem:[%s5605_s15 + $0x2b4] ss:$48 sps:$4 sm:$0xff]   ;;  %v5692_v37 = vpack.c.bf16 %v760_v33, %v759_v32  ;;  %v4807_v39 = vld [vmem:[%s5605_s15 + $0x2b0] ss:$48 sps:$4 sm:$0xff]   ;;  %v4823_v40 = vld [vmem:[%s5605_s15 + $0xc] ss:$48 sps:$4 sm:$0xff]  }
  0xb4   : > { %1411 = vmatprep.subr.bf16.mxu0 %v4778_v13  ;;  %1464 = vmatprep.subr.bf16.mxu1 %v4801_v21  ;;  %v4815_v41 = vld [vmem:[%s5605_s15 + $0x254] ss:$48 sps:$4 sm:$0xff]   ;;  %v4813_v42 = vld [vmem:[%s5605_s15 + $0x250] ss:$48 sps:$4 sm:$0xff]   ;;  %v4828_v43 = vld [vmem:[%s5605_s15 + $0x8] ss:$48 sps:$4 sm:$0xff]  }
  0xb5   : > { %v4834_v44 = vld [vmem:[%s5605_s15 + $0x2bc] ss:$48 sps:$4 sm:$0xff]   ;;  %v4821_v47 = vld [vmem:[%s5605_s15 + $0x1f4] ss:$48 sps:$4 sm:$0xff]   ;;  %v4832_v48 = vld [vmem:[%s5605_s15 + $0x2b8] ss:$48 sps:$4 sm:$0xff]  }
  0xb6   : > { %v761_v45 = vld [vmem:[#allocation2 + $0x18] sm:$0xff]  ;;  %v762_v46 = vld [vmem:[#allocation2 + $0x8] sm:$0xff]  ;;  %v4819_v50 = vld [vmem:[%s5605_s15 + $0x1f0] ss:$48 sps:$4 sm:$0xff]  }
  0xb7   : > { %1412 = vmatpush1.bf16.msra.mxu0 %v4780_v16  ;;  %1465 = vmatpush1.bf16.msra.mxu1 %v4804_v24  ;;  %v5705_v49 = vpack.c.bf16 %v762_v46, %v761_v45  ;;  %v4840_v51 = vld [vmem:[%s5605_s15 + $0x25c] ss:$48 sps:$4 sm:$0xff]   ;;  %v4827_v52 = vld [vmem:[%s5605_s15 + $0x194] ss:$48 sps:$4 sm:$0xff]   ;;  %v4825_v53 = vld [vmem:[%s5605_s15 + $0x190] ss:$48 sps:$4 sm:$0xff]  }
  0xb8   : > { %1413 = vmatprep.subr.bf16.mxu0 %v4781_v17  ;;  %1466 = vmatprep.subr.bf16.mxu1 %v4805_v25  ;;  %v4838_v54 = vld [vmem:[%s5605_s15 + $0x258] ss:$48 sps:$4 sm:$0xff]   ;;  %v4831_v55 = vld [vmem:[%s5605_s15 + $0x134] ss:$48 sps:$4 sm:$0xff]   ;;  %v4846_v56 = vld [vmem:[%s5605_s15 + $0x1fc] ss:$48 sps:$4 sm:$0xff]  }
  0xb9   : > { %v4844_v57 = vld [vmem:[%s5605_s15 + $0x1f8] ss:$48 sps:$4 sm:$0xff]   ;;  %v4829_v58 = vld [vmem:[%s5605_s15 + $0x130] ss:$48 sps:$4 sm:$0xff]   ;;  %v4852_v59 = vld [vmem:[%s5605_s15 + $0x19c] ss:$48 sps:$4 sm:$0xff]  }
  0xba   : > { %v4837_v60 = vld [vmem:[%s5605_s15 + $0xd4] ss:$48 sps:$4 sm:$0xff]   ;;  %v4850_v61 = vld [vmem:[%s5605_s15 + $0x198] ss:$48 sps:$4 sm:$0xff]   ;;  %v4835_v62 = vld [vmem:[%s5605_s15 + $0xd0] ss:$48 sps:$4 sm:$0xff]  }
  0xbb   : > { %1414 = vmatpush1.bf16.msra.mxu0 %v4785_v20  ;;  %1467 = vmatpush1.bf16.msra.mxu1 %v4810_v28  ;;  %v4855_v63 = vld [vmem:[%s5605_s15 + $0x13c] ss:$48 sps:$4 sm:$0xff]   ;;  %v4843_v0 = vld [vmem:[%s5605_s15 + $0x74] ss:$48 sps:$4 sm:$0xff]   ;;  %v4853_v1 = vld [vmem:[%s5605_s15 + $0x138] ss:$48 sps:$4 sm:$0xff]  }
  0xbc   : > { %1415 = vmatprep.subr.bf16.mxu0 %v4787_v22  ;;  %1468 = vmatprep.subr.bf16.mxu1 %v4811_v29  ;;  %v4841_v2 = vld [vmem:[%s5605_s15 + $0x70] ss:$48 sps:$4 sm:$0xff]   ;;  %v4858_v3 = vld [vmem:[%s5605_s15 + $0xdc] ss:$48 sps:$4 sm:$0xff]   ;;  %v4849_v4 = vld [vmem:[%s5605_s15 + $0x14] ss:$48 sps:$4 sm:$0xff]   ;;  %v752_v29 = vlaneseq }
  0xbd   : > { %v4856_v5 = vld [vmem:[%s5605_s15 + $0xd8] ss:$48 sps:$4 sm:$0xff]   ;;  %v4847_v7 = vld [vmem:[%s5605_s15 + $0x10] ss:$48 sps:$4 sm:$0xff]   ;;  %v4861_v8 = vld [vmem:[%s5605_s15 + $0x7c] ss:$48 sps:$4 sm:$0xff]  }
  0xbe   : > { %v4859_v9 = vld [vmem:[%s5605_s15 + $0x78] ss:$48 sps:$4 sm:$0xff]   ;;  %v4864_v10 = vld [vmem:[%s5605_s15 + $0x1c] ss:$48 sps:$4 sm:$0xff]   ;;  %v4867_v12 = vld [vmem:[%s5605_s15 + $0x2c4] ss:$48 sps:$4 sm:$0xff]  }
  0xbf   : > { %1416 = vmatpush1.bf16.msra.mxu0 %v4791_v23  ;;  %1469 = vmatpush1.bf16.msra.mxu1 %v4816_v34  ;;  %v4862_v11 = vld [vmem:[%s5605_s15 + $0x18] ss:$48 sps:$4 sm:$0xff]   ;;  %v4865_v13 = vld [vmem:[%s5605_s15 + $0x2c0] ss:$48 sps:$4 sm:$0xff]   ;;  %v4870_v14 = vld [vmem:[%s5605_s15 + $0x264] ss:$48 sps:$4 sm:$0xff]  }
  0xc0   : > { %1417 = vmatprep.subr.bf16.mxu0 %v4793_v26  ;;  %1470 = vmatprep.subr.bf16.mxu1 %v4817_v35  ;;  %v4868_v15 = vld [vmem:[%s5605_s15 + $0x260] ss:$48 sps:$4 sm:$0xff]   ;;  %v4873_v16 = vld [vmem:[%s5605_s15 + $0x204] ss:$48 sps:$4 sm:$0xff]   ;;  %v5352_v28 = vmov 0.0   ;;  %v5772_v33 = vshrl.u32 %v752_v29, 7 }
  0xc1   : > { %v4871_v17 = vld [vmem:[%s5605_s15 + $0x200] ss:$48 sps:$4 sm:$0xff]   ;;  %v4876_v18 = vld [vmem:[%s5605_s15 + $0x1a4] ss:$48 sps:$4 sm:$0xff]   ;;  %v4910_v32 = vld [vmem:[%s5605_s15 + $0x26c] ss:$48 sps:$4 sm:$0xff]  }
  0xc2   : > { %v4874_v19 = vld [vmem:[%s5605_s15 + $0x1a0] ss:$48 sps:$4 sm:$0xff]   ;;  %v4879_v21 = vld [vmem:[%s5605_s15 + $0x144] ss:$48 sps:$4 sm:$0xff]   ;;  %v4908_v34 = vld [vmem:[%s5605_s15 + $0x268] ss:$48 sps:$4 sm:$0xff]  }
  0xc3   : > { %1418 = vmatpush1.bf16.msra.mxu0 %v4797_v27  ;;  %1471 = vmatpush1.bf16.msra.mxu1 %v4822_v38  ;;  %v4877_v20 = vld [vmem:[%s5605_s15 + $0x140] ss:$48 sps:$4 sm:$0xff]   ;;  %v4882_v22 = vld [vmem:[%s5605_s15 + $0xe4] ss:$48 sps:$4 sm:$0xff]   ;;  %v4913_v35 = vld [vmem:[%s5605_s15 + $0x20c] ss:$48 sps:$4 sm:$0xff]  }
  0xc4   : > { %1419 = vmatprep.subr.bf16.mxu0 %v4799_v30  ;;  %1472 = vmatprep.subr.bf16.mxu1 %v4823_v40  ;;  %v4880_v23 = vld [vmem:[%s5605_s15 + $0xe0] ss:$48 sps:$4 sm:$0xff]   ;;  %v4885_v24 = vld [vmem:[%s5605_s15 + $0x84] ss:$48 sps:$4 sm:$0xff]   ;;  %v4905_v30 = vld [vmem:[%s5605_s15 + $0x2c8] ss:$48 sps:$4 sm:$0xff]  }
  0xc5   : > { %v4883_v25 = vld [vmem:[%s5605_s15 + $0x80] ss:$48 sps:$4 sm:$0xff]   ;;  %v4888_v26 = vld [vmem:[%s5605_s15 + $0x24] ss:$48 sps:$4 sm:$0xff]   ;;  %v871_v40 = vsub.s32 1, %v5772_v33 }
  0xc6   : > { %v4886_v27 = vld [vmem:[%s5605_s15 + $0x20] ss:$48 sps:$4 sm:$0xff]   ;;  %v4919_v45 = vld [vmem:[%s5605_s15 + $0x14c] ss:$48 sps:$4 sm:$0xff]  }
  0xc7   : > { %1420 = vmatpush1.bf16.msra.mxu0 %v4803_v31  ;;  %1473 = vmatpush1.bf16.msra.mxu1 %v4828_v43  ;;  %v4907_v31 = vld [vmem:[%s5605_s15 + $0x2cc] ss:$48 sps:$4 sm:$0xff]   ;;  %v4914_v43 = vld [vmem:[%s5605_s15 + $0x1a8] ss:$48 sps:$4 sm:$0xff]  }
  0xc8   : > { %1511 = vmatprep.subr.bf16.mxu0 %v4809_v36  ;;  %1564 = vmatprep.subr.bf16.mxu1 %v4834_v44  ;;  %v867_v36 = vsub.s32 0, %v5772_v33  ;;  %v5778_v38 = vld [vmem:[%s5611_s25] sm:$0xff] }
  0xc9   : > { %v872_v44 = vrot.slane %v5778_v38, %v871_v40 }
  0xca   : > { %1438 = vmatmul.mubr.bf16.vlgmr.msra.gmra.mxu0 %v5692_v37  ;;  %1491 = vmatmul.mubr.bf16.vlgmr.msra.gmra.mxu1 %v5692_v37 }
  0xcb   : > { %1512 = vmatpush1.bf16.msra.mxu0 %v4807_v39  ;;  %1447 = vmatprep.mubr.bf16.mxu0 %v5351_v6  ;;  %v4911_v39 = vld [vmem:[%s5605_s15 + $0x208] ss:$48 sps:$4 sm:$0xff]  }
  0xcc   : > { %1513 = vmatprep.subr.bf16.mxu0 %v4815_v41  ;;  %1565 = vmatpush1.bf16.msra.mxu1 %v4832_v48  ;;  %v4916_v41 = vld [vmem:[%s5605_s15 + $0x1ac] ss:$48 sps:$4 sm:$0xff]  }
  0xcd   : > { %1566 = vmatprep.subr.bf16.mxu1 %v4840_v51  ;;  %1500 = vmatprep.mubr.bf16.mxu1 %v5351_v6  ;;  %v879_v51 = vsub.s32 3, %v5772_v33 }
  0xcf   : > { %1514 = vmatpush1.bf16.msra.mxu0 %v4813_v42  ;;  %v868_v42 = vrot.slane %v5778_v38, %v867_v36 }
  0xd0   : > { %1515 = vmatprep.subr.bf16.mxu0 %v4821_v47  ;;  %1567 = vmatpush1.bf16.msra.mxu1 %v4838_v54  ;;  %v875_v47 = vsub.s32 2, %v5772_v33  ;;  %v4922_v54 = vld [vmem:[%s5605_s15 + $0xec] ss:$48 sps:$4 sm:$0xff]  }
  0xd1   : > { %1568 = vmatprep.subr.bf16.mxu1 %v4846_v56 }
  0xd2   : > { %1448 = vmatmul.mubr.bf16.gmra.mxu0 %v5705_v49  ;;  %1501 = vmatmul.mubr.bf16.gmra.mxu1 %v5705_v49  ;;  %v876_v56 = vrot.slane %v5778_v38, %v875_v47 }
  0xd3   : > { %1516 = vmatpush1.bf16.msra.mxu0 %v4819_v50  ;;  %1543 = vmatprep.mubr.bf16.mxu0 %v5351_v6 }
  0xd4   : > { %1517 = vmatprep.subr.bf16.mxu0 %v4827_v52  ;;  %1569 = vmatpush1.bf16.msra.mxu1 %v4844_v57  ;;  %v4917_v52 = vld [vmem:[%s5605_s15 + $0x148] ss:$48 sps:$4 sm:$0xff]  }
  0xd5   : > { %1596 = vmatprep.mubr.bf16.mxu1 %v5351_v6  ;;  %1570 = vmatprep.subr.bf16.mxu1 %v4852_v59  ;;  %v880_v59 = vrot.slane %v5778_v38, %v879_v51 }
  0xd7   : > { %1518 = vmatpush1.bf16.msra.mxu0 %v4825_v53 }
  0xd8   : > { %1519 = vmatprep.subr.bf16.mxu0 %v4831_v55  ;;  %1571 = vmatpush1.bf16.msra.mxu1 %v4850_v61 }
  0xd9   : > { %1572 = vmatprep.subr.bf16.mxu1 %v4855_v63 }
  0xdb   : > { %1520 = vmatpush1.bf16.msra.mxu0 %v4829_v58 }
  0xdc   : > { %1521 = vmatprep.subr.bf16.mxu0 %v4837_v60  ;;  %1573 = vmatpush1.bf16.msra.mxu1 %v4853_v1  ;;  %v4920_v60 = vld [vmem:[%s5605_s15 + $0xe8] ss:$48 sps:$4 sm:$0xff]  }
  0xdd   : > { %1574 = vmatprep.subr.bf16.mxu1 %v4858_v3 }
  0xdf   : > { %1522 = vmatpush1.bf16.msra.mxu0 %v4835_v62 }
  0xe0   : > { %1523 = vmatprep.subr.bf16.mxu0 %v4843_v0  ;;  %1575 = vmatpush1.bf16.msra.mxu1 %v4856_v5  ;;  %v4925_v0 = vld [vmem:[%s5605_s15 + $0x8c] ss:$48 sps:$4 sm:$0xff]  }
  0xe1   : > { %1576 = vmatprep.subr.bf16.mxu1 %v4861_v8 }
  0xe3   : > { %1524 = vmatpush1.bf16.msra.mxu0 %v4841_v2 }
  0xe4   : > { %1525 = vmatprep.subr.bf16.mxu0 %v4849_v4  ;;  %1577 = vmatpush1.bf16.msra.mxu1 %v4859_v9  ;;  %v4923_v9 = vld [vmem:[%s5605_s15 + $0x88] ss:$48 sps:$4 sm:$0xff]  }
  0xe5   : > { %1578 = vmatprep.subr.bf16.mxu1 %v4864_v10 }
  0xe7   : > { %1526 = vmatpush1.bf16.msra.mxu0 %v4847_v7 }
  0xe8   : > { %1579 = vmatpush1.bf16.msra.mxu1 %v4862_v11  ;;  %1617 = vmatprep.subr.bf16.mxu0 %v4867_v12  ;;  %v4928_v12 = vld [vmem:[%s5605_s15 + $0x2c] ss:$48 sps:$4 sm:$0xff]  }
  0xe9   : > { %1670 = vmatprep.subr.bf16.mxu1 %v4907_v31 }
  0xea   : > { %1544 = vmatmul.mubr.bf16.vlgmr.msra.gmra.mxu0 %v5692_v37 }
  0xeb   : > { %1553 = vmatprep.mubr.bf16.mxu0 %v5351_v6  ;;  %1597 = vmatmul.mubr.bf16.vlgmr.msra.gmra.mxu1 %v5692_v37 }
  0xec   : > { %1606 = vmatprep.mubr.bf16.mxu1 %v5351_v6  ;;  %1618 = vmatpush1.bf16.msra.mxu0 %v4865_v13 }
  0xed   : > { %1619 = vmatprep.subr.bf16.mxu0 %v4870_v14  ;;  %1671 = vmatpush1.bf16.msra.mxu1 %v4905_v30 }
  0xee   : > { %1672 = vmatprep.subr.bf16.mxu1 %v4910_v32 }
  0xf0   : > { %1620 = vmatpush1.bf16.msra.mxu0 %v4868_v15 }
  0xf1   : > { %1621 = vmatprep.subr.bf16.mxu0 %v4873_v16  ;;  %1673 = vmatpush1.bf16.msra.mxu1 %v4908_v34 }
  0xf2   : > { %1554 = vmatmul.mubr.bf16.gmra.mxu0 %v5705_v49  ;;  %1674 = vmatprep.subr.bf16.mxu1 %v4913_v35 }
  0xf3   : > { %1649 = vmatprep.mubr.bf16.mxu0 %v5351_v6  ;;  %1607 = vmatmul.mubr.bf16.gmra.mxu1 %v5705_v49 }
  0xf4   : > { %1702 = vmatprep.mubr.bf16.mxu1 %v5351_v6  ;;  %1622 = vmatpush1.bf16.msra.mxu0 %v4871_v17 }
  0xf5   : > { %1623 = vmatprep.subr.bf16.mxu0 %v4876_v18  ;;  %1675 = vmatpush1.bf16.msra.mxu1 %v4911_v39 }
  0xf6   : > { %1676 = vmatprep.subr.bf16.mxu1 %v4916_v41 }
  0xf8   : > { %1624 = vmatpush1.bf16.msra.mxu0 %v4874_v19 }
  0xf9   : > { %1625 = vmatprep.subr.bf16.mxu0 %v4879_v21  ;;  %1677 = vmatpush1.bf16.msra.mxu1 %v4914_v43  ;;  %v4926_v21 = vld [vmem:[%s5605_s15 + $0x28] ss:$48 sps:$4 sm:$0xff]   ;;  %v887_v43 = vsub.s32 5, %v5772_v33 }
  0xfa   : > { %1678 = vmatprep.subr.bf16.mxu1 %v4919_v45 }
  0xfb   : > { %v888_v45 = vrot.slane %v5778_v38, %v887_v43 }
  0xfc   : > { %1626 = vmatpush1.bf16.msra.mxu0 %v4877_v20 }
  0xfd   : > { %1627 = vmatprep.subr.bf16.mxu0 %v4882_v22  ;;  %1679 = vmatpush1.bf16.msra.mxu1 %v4917_v52 }
  0xfe   : > { %1680 = vmatprep.subr.bf16.mxu1 %v4922_v54 }
 0x100   : > { %1628 = vmatpush1.bf16.msra.mxu0 %v4880_v23 }
 0x101   : > { %1629 = vmatprep.subr.bf16.mxu0 %v4885_v24  ;;  %1681 = vmatpush1.bf16.msra.mxu1 %v4920_v60 }
 0x102   : > { %1682 = vmatprep.subr.bf16.mxu1 %v4925_v0 }
 0x104   : > { %1630 = vmatpush1.bf16.msra.mxu0 %v4883_v25 }
 0x105   : > { %1631 = vmatprep.subr.bf16.mxu0 %v4888_v26  ;;  %1683 = vmatpush1.bf16.msra.mxu1 %v4923_v9 }
 0x106   : > { %1684 = vmatprep.subr.bf16.mxu1 %v4928_v12 }
 0x108   : > { %1632 = vmatpush1.bf16.msra.mxu0 %v4886_v27 }
 0x109   : > { %4522 = vmatprep.subr.bf16.mxu0 %v5352_v28  ;;  %1685 = vmatpush1.bf16.msra.mxu1 %v4926_v21 }
 0x10a   : > { %4528 = vmatprep.subr.bf16.mxu1 %v5352_v28 }
 0x10b   : > { %1650 = vmatmul.mubr.bf16.vlgmr.msra.gmra.mxu0 %v5692_v37 }
 0x10c   : > { %1659 = vmatprep.mubr.bf16.mxu0 %v5351_v6  ;;  %1703 = vmatmul.mubr.bf16.vlgmr.msra.gmra.mxu1 %v5692_v37 }
 0x10d   : > { %1712 = vmatprep.mubr.bf16.mxu1 %v5351_v6  ;;  %v895_v6 = vsub.s32 7, %v5772_v33 }
 0x113   : > { %1660 = vmatmul.mubr.bf16.gmra.mxu0 %v5705_v49 }
 0x114   : > { %4524 = vmatprep.mubr.msk.bf16.mxu0 %vm5353_vm0, %v5352_v28  ;;  %1713 = vmatmul.mubr.bf16.gmra.mxu1 %v5705_v49 }
 0x115   : > { %4530 = vmatprep.mubr.msk.bf16.mxu1 %vm5353_vm0, %v5352_v28 }
 0x18a   : > { %v1439_v46 = vpop.f32.mrf.mxu0  ;;  %v1492_v63 = vpop.f32.mrf.mxu1 }
 0x18b   : > { %v1440_v48 = vadd.f32 %v1439_v46, %v868_v42  ;;  %v1493_v2 = vadd.f32 %v1492_v63, %v876_v56  ;;  %v891_v46 = vsub.s32 6, %v5772_v33 }
 0x18c   : > { %v1441_v50 = vpop.f32.mrf.mxu0  ;;  %v1494_v5 = vpop.f32.mrf.mxu1 }
 0x18d   : > { %v1442_v53 = vadd.f32 %v1441_v50, %v872_v44  ;;  %v1495_v8 = vadd.f32 %v1494_v5, %v880_v59  ;;  %v892_v54 = vrot.slane %v5778_v38, %v891_v46 }
 0x18e   : > { %v1443_v55 = vpop.f32.mrf.mxu0  ;;  %v1496_v11 = vpop.f32.mrf.mxu1 }
 0x18f   : > { %v4374_v57 = vpack.c.bf16 %v1442_v53, %v1440_v48  ;;  %v1444_v61 = vadd.f32 %v1443_v55, %v868_v42  ;;  %v4375_v13 = vpack.c.bf16 %v1495_v8, %v1493_v2  ;;  %v1497_v15 = vadd.f32 %v1496_v11, %v876_v56 }
 0x190   : > { %v1445_v58 = vpop.f32.mrf.mxu0  ;;  %v1498_v18 = vpop.f32.mrf.mxu1 }
 0x191   : > { %1867 = vst [vmem:[#allocation3] sm:$0xff] %v4374_v57  ;;  %v1446_v62 = vadd.f32 %v1445_v58, %v872_v44  ;;  %1868 = vst [vmem:[#allocation3 + $0x8] sm:$0xff] %v4375_v13  ;;  %v1499_v20 = vadd.f32 %v1498_v18, %v880_v59 }
 0x192   : > { %v1449_v1 = vpop.f32.mrf.mxu0  ;;  %v1502_v23 = vpop.f32.mrf.mxu1 }
 0x193   : > { %v4380_v3 = vpack.c.bf16 %v1446_v62, %v1444_v61  ;;  %v1450_v4 = vadd.f32 %v1449_v1, %v868_v42  ;;  %v4381_v24 = vpack.c.bf16 %v1499_v20, %v1497_v15  ;;  %v1503_v25 = vadd.f32 %v1502_v23, %v876_v56 }
 0x194   : > { %v1451_v7 = vpop.f32.mrf.mxu0  ;;  %v1504_v27 = vpop.f32.mrf.mxu1 }
 0x195   : > { %1873 = vst [vmem:[#allocation3 + $0x30] sm:$0xff] %v4380_v3  ;;  %v1452_v10 = vadd.f32 %v1451_v7, %v872_v44  ;;  %1874 = vst [vmem:[#allocation3 + $0x38] sm:$0xff] %v4381_v24  ;;  %v1505_v30 = vadd.f32 %v1504_v27, %v880_v59 }
 0x196   : > { %v1453_v14 = vpop.f32.mrf.mxu0  ;;  %v1506_v31 = vpop.f32.mrf.mxu1 }
 0x197   : > { %v4386_v16 = vpack.c.bf16 %v1452_v10, %v1450_v4  ;;  %v1454_v17 = vadd.f32 %v1453_v14, %v868_v42  ;;  %v4387_v32 = vpack.c.bf16 %v1505_v30, %v1503_v25  ;;  %v1507_v34 = vadd.f32 %v1506_v31, %v876_v56 }
 0x198   : > { %v1455_v19 = vpop.f32.mrf.mxu0  ;;  %v1508_v35 = vpop.f32.mrf.mxu1  ;;  %v883_v42 = vsub.s32 4, %v5772_v33  ;;  %v896_v56 = vrot.slane %v5778_v38, %v895_v6 }
 0x199   : > { %1879 = vst [vmem:[#allocation3 + $0x60] sm:$0xff] %v4386_v16  ;;  %v1456_v22 = vadd.f32 %v1455_v19, %v872_v44  ;;  %1880 = vst [vmem:[#allocation3 + $0x68] sm:$0xff] %v4387_v32  ;;  %v1509_v39 = vadd.f32 %v1508_v35, %v880_v59 }
 0x19a   : > { %v884_v44 = vrot.slane %v5778_v38, %v883_v42 }
 0x19b   : > { %v4392_v26 = vpack.c.bf16 %v1456_v22, %v1454_v17  ;;  %v4393_v41 = vpack.c.bf16 %v1509_v39, %v1507_v34 }
 0x19c   : > { %v4890_v27 = vld [vmem:[#allocation3] ss:$48 sps:$4 sm:$0xff]   ;;  %v4892_v31 = vld [vmem:[#allocation3 + $0x4] ss:$48 sps:$4 sm:$0xff]   ;;  %v4894_v34 = vld [vmem:[#allocation3 + $0x8] ss:$48 sps:$4 sm:$0xff]  }
 0x19d   : > { %1885 = vst [vmem:[#allocation3 + $0x90] sm:$0xff] %v4392_v26  ;;  %1886 = vst [vmem:[#allocation3 + $0x98] sm:$0xff] %v4393_v41  ;;  %v4896_v39 = vld [vmem:[#allocation3 + $0xc] ss:$48 sps:$4 sm:$0xff]  }
 0x1a4   : > { %v4898_v42 = vld [vmem:[#allocation3 + $0x60] ss:$48 sps:$4 sm:$0xff]  }
 0x1aa   : > { %v1545_v37 = vpop.f32.mrf.mxu0 }
 0x1ab   : > { %v1546_v50 = vadd.f32 %v1545_v37, %v884_v44  ;;  %v1598_v59 = vpop.f32.mrf.mxu1 }
 0x1ac   : > { %v1547_v48 = vpop.f32.mrf.mxu0  ;;  %v1599_v60 = vadd.f32 %v1598_v59, %v892_v54 }
 0x1ad   : > { %v1548_v52 = vadd.f32 %v1547_v48, %v888_v45  ;;  %v1600_v63 = vpop.f32.mrf.mxu1 }
 0x1ae   : > { %v1549_v53 = vpop.f32.mrf.mxu0  ;;  %v1601_v1 = vadd.f32 %v1600_v63, %v896_v56  ;;  %v4904_v63 = vld [vmem:[#allocation3 + $0x6c] ss:$48 sps:$4 sm:$0xff]  }
 0x1af   : > { %v4376_v55 = vpack.c.bf16 %v1548_v52, %v1546_v50  ;;  %v1550_v57 = vadd.f32 %v1549_v53, %v884_v44  ;;  %v1602_v3 = vpop.f32.mrf.mxu1 }
 0x1b0   : > { %v1551_v49 = vpop.f32.mrf.mxu0  ;;  %v4377_v5 = vpack.c.bf16 %v1601_v1, %v1599_v60  ;;  %v1603_v7 = vadd.f32 %v1602_v3, %v892_v54 }
 0x1b1   : > { %1869 = vst [vmem:[#allocation3 + $0x10] sm:$0xff] %v4376_v55  ;;  %v1552_v58 = vadd.f32 %v1551_v49, %v888_v45  ;;  %v1604_v9 = vpop.f32.mrf.mxu1 }
 0x1b2   : > { %v1555_v61 = vpop.f32.mrf.mxu0  ;;  %1870 = vst [vmem:[#allocation3 + $0x18] sm:$0xff] %v4377_v5  ;;  %v1605_v11 = vadd.f32 %v1604_v9, %v896_v56  ;;  %v5354_v9 = vmov -1e+30  }
 0x1b3   : > { %v4382_v62 = vpack.c.bf16 %v1552_v58, %v1550_v57  ;;  %v1556_v0 = vadd.f32 %v1555_v61, %v884_v44  ;;  %v1608_v14 = vpop.f32.mrf.mxu1 }
 0x1b4   : > { %v1557_v2 = vpop.f32.mrf.mxu0  ;;  %v4383_v15 = vpack.c.bf16 %v1605_v11, %v1603_v7  ;;  %v1609_v16 = vadd.f32 %v1608_v14, %v892_v54 }
 0x1b5   : > { %1875 = vst [vmem:[#allocation3 + $0x40] sm:$0xff] %v4382_v62  ;;  %v1558_v4 = vadd.f32 %v1557_v2, %v888_v45  ;;  %v1610_v18 = vpop.f32.mrf.mxu1 }
 0x1b6   : > { %v1559_v8 = vpop.f32.mrf.mxu0  ;;  %1876 = vst [vmem:[#allocation3 + $0x48] sm:$0xff] %v4383_v15  ;;  %v1611_v20 = vadd.f32 %v1610_v18, %v896_v56 }
 0x1b7   : > { %v4388_v10 = vpack.c.bf16 %v1558_v4, %v1556_v0  ;;  %v1560_v38 = vadd.f32 %v1559_v8, %v884_v44  ;;  %v1612_v21 = vpop.f32.mrf.mxu1  ;;  %v5837_v44 = vld [vmem:[%s5611_s25 + $0x8] sm:$0xf]  ;;  %v5852_v8 = vand.u32 127, %v752_v29 }
 0x1b8   : > { %v1561_v12 = vpop.f32.mrf.mxu0  ;;  %v4389_v22 = vpack.c.bf16 %v1611_v20, %v1609_v16  ;;  %v1613_v23 = vadd.f32 %v1612_v21, %v892_v54  ;;  %v900_v46 = vrot.slane %v5837_v44, %v867_v36  ;;  %v904_v48 = vrot.slane %v5837_v44, %v871_v40  ;;  %v4902_v54 = vld [vmem:[#allocation3 + $0x68] ss:$48 sps:$4 sm:$0xff]  }
 0x1b9   : > { %1881 = vst [vmem:[#allocation3 + $0x70] sm:$0xff] %v4388_v10  ;;  %v1562_v13 = vadd.f32 %v1561_v12, %v888_v45  ;;  %v1614_v24 = vpop.f32.mrf.mxu1  ;;  %v4900_v45 = vld [vmem:[#allocation3 + $0x64] ss:$48 sps:$4 sm:$0xff]   ;;  %vm757_vm1 = vcmp.lt.s32.totalorder %v5852_v8, 8  ;;  %vm754_vm3 = vcmp.lt.s32.totalorder %v5852_v8, 32 }
 0x1ba   : > { %1882 = vst [vmem:[#allocation3 + $0x78] sm:$0xff] %v4389_v22  ;;  %v1615_v25 = vadd.f32 %v1614_v24, %v896_v56  ;;  %v5855_v10 = vsel %vm757_vm1, 0.0, %v5354_v9 }
 0x1bb   : > { %v4394_v17 = vpack.c.bf16 %v1562_v13, %v1560_v38 }
 0x1bc   : > { %v4889_v19 = vld [vmem:[#allocation3 + $0x10] ss:$48 sps:$4 sm:$0xff]   ;;  %v4395_v26 = vpack.c.bf16 %v1615_v25, %v1613_v23  ;;  %v4891_v30 = vld [vmem:[#allocation3 + $0x14] ss:$48 sps:$4 sm:$0xff]  }
 0x1bd   : > { %1887 = vst [vmem:[#allocation3 + $0xa0] sm:$0xff] %v4394_v17  ;;  %4523 = vmatpush3.bf16.xpose.msra.mxu0 %v4889_v19  ;;  %v4893_v32 = vld [vmem:[#allocation3 + $0x18] ss:$48 sps:$4 sm:$0xff]   ;;  %v4895_v35 = vld [vmem:[#allocation3 + $0x1c] ss:$48 sps:$4 sm:$0xff]  }
 0x1be   : > { %4534 = vmatprep.subr.bf16.mxu0 %v5352_v28  ;;  %1888 = vst [vmem:[#allocation3 + $0xa8] sm:$0xff] %v4395_v26 }
 0x1c4   : > { %4525 = vmatmul.mubr.bf16.vlgmr.msra.gmra.mxu0 %v4890_v27  ;;  %v4897_v41 = vld [vmem:[#allocation3 + $0x70] ss:$48 sps:$4 sm:$0xff]   ;;  %v4899_v43 = vld [vmem:[#allocation3 + $0x74] ss:$48 sps:$4 sm:$0xff]  }
 0x1c5   : > { %4535 = vmatpush3.bf16.xpose.msra.mxu0 %v4891_v30  ;;  %4536 = vmatprep.mubr.msk.bf16.mxu0 %vm5353_vm0, %v5352_v28  ;;  %v4901_v37 = vld [vmem:[#allocation3 + $0x78] ss:$48 sps:$4 sm:$0xff]   ;;  %v4903_v49 = vld [vmem:[#allocation3 + $0x7c] ss:$48 sps:$4 sm:$0xff]  }
 0x1c6   : > { %4546 = vmatprep.subr.bf16.mxu0 %v5352_v28 }
 0x1cb   : > { %v1651_v6 = vpop.f32.mrf.mxu0 }
 0x1cc   : > { %4537 = vmatmul.mubr.bf16.vlgmr.msra.gmra.mxu0 %v4892_v31  ;;  %v1652_v50 = vadd.f32 %v1651_v6, %v900_v46 }
 0x1cd   : > { %4547 = vmatpush3.bf16.xpose.msra.mxu0 %v4893_v32  ;;  %4548 = vmatprep.mubr.msk.bf16.mxu0 %vm5353_vm0, %v5352_v28  ;;  %v1653_v52 = vpop.f32.mrf.mxu0 }
 0x1ce   : > { %4558 = vmatprep.subr.bf16.mxu0 %v5352_v28  ;;  %v1654_v53 = vadd.f32 %v1653_v52, %v904_v48 }
 0x1cf   : > { %v1655_v55 = vpop.f32.mrf.mxu0 }
 0x1d0   : > { %v4378_v56 = vpack.c.bf16 %v1654_v53, %v1652_v50  ;;  %v1656_v36 = vadd.f32 %v1655_v55, %v900_v46  ;;  %v1704_v53 = vpop.f32.mrf.mxu1 }
 0x1d1   : > { %v1657_v57 = vpop.f32.mrf.mxu0 }
 0x1d2   : > { %1871 = vst [vmem:[#allocation3 + $0x20] sm:$0xff] %v4378_v56  ;;  %v1658_v58 = vadd.f32 %v1657_v57, %v904_v48  ;;  %v1706_v56 = vpop.f32.mrf.mxu1 }
 0x1d3   : > { %v1661_v40 = vpop.f32.mrf.mxu0 }
 0x1d4   : > { %4549 = vmatmul.mubr.bf16.vlgmr.msra.gmra.mxu0 %v4894_v34  ;;  %v4384_v59 = vpack.c.bf16 %v1658_v58, %v1656_v36  ;;  %v1662_v60 = vadd.f32 %v1661_v40, %v900_v46  ;;  %v1708_v58 = vpop.f32.mrf.mxu1 }
 0x1d5   : > { %4559 = vmatpush3.bf16.xpose.msra.mxu0 %v4895_v35  ;;  %4560 = vmatprep.mubr.msk.bf16.mxu0 %vm5353_vm0, %v5352_v28  ;;  %v1663_v61 = vpop.f32.mrf.mxu0 }
 0x1d6   : > { %4570 = vmatprep.subr.bf16.mxu0 %v5352_v28  ;;  %1877 = vst [vmem:[#allocation3 + $0x50] sm:$0xff] %v4384_v59  ;;  %v1664_v62 = vadd.f32 %v1663_v61, %v904_v48  ;;  %v5905_v61 = vrot.slane %v5837_v44, %v879_v51 }
 0x1d7   : > { %v1665_v0 = vpop.f32.mrf.mxu0 }
 0x1d8   : > { %v4390_v1 = vpack.c.bf16 %v1664_v62, %v1662_v60  ;;  %v1666_v2 = vadd.f32 %v1665_v0, %v900_v46  ;;  %v5900_v60 = vrot.slane %v5837_v44, %v875_v47 }
 0x1d9   : > { %v1667_v3 = vpop.f32.mrf.mxu0 }
 0x1da   : > { %1883 = vst [vmem:[#allocation3 + $0x80] sm:$0xff] %v4390_v1  ;;  %v1668_v4 = vadd.f32 %v1667_v3, %v904_v48  ;;  %v1705_v1 = vadd.f32 %v1704_v53, %v5900_v60  ;;  %v1709_v3 = vadd.f32 %v1708_v58, %v5900_v60 }
 0x1dc   : > { %4561 = vmatmul.mubr.bf16.vlgmr.msra.gmra.mxu0 %v4896_v39  ;;  %v4396_v5 = vpack.c.bf16 %v1668_v4, %v1666_v2  ;;  %v1707_v2 = vadd.f32 %v1706_v56, %v5905_v61 }
 0x1dd   : > { %4571 = vmatpush3.bf16.xpose.msra.mxu0 %v4897_v41  ;;  %4572 = vmatprep.mubr.msk.bf16.mxu0 %vm5353_vm0, %v5352_v28  ;;  %v4929_v7 = vld [vmem:[#allocation3 + $0x20] ss:$48 sps:$4 sm:$0xff]  }
 0x1de   : > { %4582 = vmatprep.subr.bf16.mxu0 %v5352_v28  ;;  %1889 = vst [vmem:[#allocation3 + $0xb0] sm:$0xff] %v4396_v5  ;;  %4529 = vmatpush3.bf16.msra.mxu1 %v4929_v7  ;;  %v4379_v51 = vpack.c.bf16 %v1707_v2, %v1705_v1 }
 0x1df   : > { %4540 = vmatprep.subr.bf16.mxu1 %v5352_v28 }
 0x1e0   : > { %1872 = vst [vmem:[#allocation3 + $0x28] sm:$0xff] %v4379_v51 }
 0x1e4   : > { %4573 = vmatmul.mubr.bf16.vlgmr.msra.gmra.mxu0 %v4898_v42 }
 0x1e5   : > { %4583 = vmatpush3.bf16.xpose.msra.mxu0 %v4899_v43  ;;  %4584 = vmatprep.mubr.msk.bf16.mxu0 %vm5353_vm0, %v5352_v28 }
 0x1e6   : > { %4594 = vmatprep.subr.bf16.mxu0 %v5352_v28 }
 0x1ec   : > { %4585 = vmatmul.mubr.bf16.vlgmr.msra.gmra.mxu0 %v4900_v45 }
 0x1ed   : > { %4595 = vmatpush3.bf16.xpose.msra.mxu0 %v4901_v37  ;;  %4596 = vmatprep.mubr.msk.bf16.mxu0 %vm5353_vm0, %v5352_v28 }
 0x1ee   : > { %4606 = vmatprep.subr.bf16.mxu0 %v5352_v28 }
 0x1f4   : > { %4597 = vmatmul.mubr.bf16.vlgmr.msra.gmra.mxu0 %v4902_v54 }
 0x1f5   : > { %4607 = vmatpush3.bf16.xpose.msra.mxu0 %v4903_v49  ;;  %4608 = vmatprep.mubr.msk.bf16.mxu0 %vm5353_vm0, %v5352_v28 }
 0x1fc   : > { %4609 = vmatmul.mubr.bf16.vlgmr.msra.gmra.mxu0 %v4904_v63  ;;  %v1710_v63 = vpop.f32.mrf.mxu1 }
 0x1fd   : > { %v1711_v47 = vadd.f32 %v1710_v63, %v5905_v61 }
 0x1ff   : > { %v4385_v7 = vpack.c.bf16 %v1711_v47, %v1709_v3 }
 0x201   : > { %1878 = vst [vmem:[#allocation3 + $0x58] sm:$0xff] %v4385_v7 }
 0x284   : > { %v1943_v38 = vpop.f32.mrf.mxu0 }
 0x285   : > { %v1950_v11 = vmul.f32 0.35355338, %v1943_v38 }
 0x286   : > { %v4526_v12 = vpop.f32.mrf.mxu0 }
 0x287   : > { %v5858_v13 = vadd.f32 %v1950_v11, %v5855_v10 }
 0x288   : > { %v1946_v14 = vpop.f32.mrf.mxu0 }
 0x289   : > { %v1951_v15 = vmul.f32 0.35355338, %v1946_v14  ;;  %v1955_v16 = vsel %vm1954_vm2, %v5858_v13, -inf }
 0x28a   : > { %v4527_v17 = vpop.f32.mrf.mxu0  ;;  %1956 = vmax.xlane.f32.xlu0 %v1955_v16 }
 0x28b   : > { %v5863_v29 = vadd.f32 %v1951_v15, %v5855_v10 }
 0x28c   : > { %v2090_v18 = vpop.f32.mrf.mxu0 }
 0x28d   : > { %v2097_v19 = vmul.f32 0.35355338, %v2090_v18  ;;  %v1958_v20 = vsel %vm1954_vm2, %v5863_v29, -inf }
 0x28e   : > { %v4538_v21 = vpop.f32.mrf.mxu0  ;;  %1959 = vmax.xlane.f32.xlu0 %v1958_v20 }
 0x28f   : > { %v5868_v22 = vadd.f32 %v2097_v19, %v5855_v10 }
 0x290   : > { %v2093_v23 = vpop.f32.mrf.mxu0 }
 0x291   : > { %v2098_v24 = vmul.f32 0.35355338, %v2093_v23  ;;  %v2101_v25 = vsel %vm1954_vm2, %v5868_v22, -inf }
 0x292   : > { %v4539_v26 = vpop.f32.mrf.mxu0  ;;  %2102 = vmax.xlane.f32.xlu1 %v2101_v25 }
 0x293   : > { %v5873_v27 = vadd.f32 %v2098_v24, %v5855_v10 }
 0x294   : > { %v2236_v30 = vpop.f32.mrf.mxu0 }
 0x295   : > { %v2243_v31 = vmul.f32 0.35355338, %v2236_v30  ;;  %v2104_v32 = vsel %vm1954_vm2, %v5873_v27, -inf }
 0x296   : > { %v4550_v34 = vpop.f32.mrf.mxu0  ;;  %2105 = vmax.xlane.f32.xlu1 %v2104_v32 }
 0x297   : > { %v5878_v35 = vadd.f32 %v2243_v31, %v5855_v10 }
 0x298   : > { %v2239_v39 = vpop.f32.mrf.mxu0 }
 0x299   : > { %v2244_v41 = vmul.f32 0.35355338, %v2239_v39  ;;  %v2247_v42 = vsel %vm1954_vm2, %v5878_v35, -inf }
 0x29a   : > { %v4551_v43 = vpop.f32.mrf.mxu0  ;;  %2248 = vmax.xlane.f32.xlu0 %v2247_v42 }
 0x29b   : > { %v5883_v45 = vadd.f32 %v2244_v41, %v5855_v10 }
 0x29c   : > { %v2382_v37 = vpop.f32.mrf.mxu0 }
 0x29d   : > { %v2389_v46 = vmul.f32 0.35355338, %v2382_v37  ;;  %v2250_v48 = vsel %vm1954_vm2, %v5883_v45, -inf }
 0x29e   : > { %v4562_v6 = vpop.f32.mrf.mxu0  ;;  %2251 = vmax.xlane.f32.xlu1 %v2250_v48 }
 0x29f   : > { %v5888_v50 = vadd.f32 %v2389_v46, %v5855_v10  ;;  %v1714_v6 = vpop.f32.mrf.mxu1 }
 0x2a0   : > { %v2385_v52 = vpop.f32.mrf.mxu0  ;;  %v1715_v58 = vadd.f32 %v1714_v6, %v5900_v60 }
 0x2a1   : > { %v2390_v54 = vmul.f32 0.35355338, %v2385_v52  ;;  %v2393_v55 = vsel %vm1954_vm2, %v5888_v50, -inf }
 0x2a2   : > { %v4563_v49 = vpop.f32.mrf.mxu0  ;;  %2394 = vmax.xlane.f32.xlu0 %v2393_v55  ;;  %v1716_v55 = vpop.f32.mrf.mxu1 }
 0x2a3   : > { %v5893_v36 = vadd.f32 %v2390_v54, %v5855_v10 }
 0x2a4   : > { %v2528_v57 = vpop.f32.mrf.mxu0  ;;  %v1718_v56 = vpop.f32.mrf.mxu1 }
 0x2a5   : > { %v2535_v40 = vmul.f32 0.35355338, %v2528_v57  ;;  %v2396_v59 = vsel %vm1954_vm2, %v5893_v36, -inf }
 0x2a6   : > { %v4574_v62 = vpop.f32.mrf.mxu0  ;;  %2397 = vmax.xlane.f32.xlu1 %v2396_v59  ;;  %v1717_v59 = vadd.f32 %v1716_v55, %v5905_v61 }
 0x2a7   : > { %v5908_v0 = vadd.f32 %v2535_v40, %v5855_v10  ;;  %v1720_v40 = vpop.f32.mrf.mxu1  ;;  %v1719_v62 = vadd.f32 %v1718_v56, %v5900_v60 }
 0x2a8   : > { %v2531_v4 = vpop.f32.mrf.mxu0  ;;  %v1721_v63 = vadd.f32 %v1720_v40, %v5905_v61  ;;  %v4391_v1 = vpack.c.bf16 %v1717_v59, %v1715_v58  ;;  %v4932_v58 = vld [vmem:[#allocation3 + $0x2c] ss:$48 sps:$4 sm:$0xff]  }
 0x2a9   : > { %v2536_v5 = vmul.f32 0.35355338, %v2531_v4  ;;  %v2539_v33 = vsel %vm1954_vm2, %v5908_v0, -inf }
 0x2aa   : > { %v4575_v44 = vpop.f32.mrf.mxu0  ;;  %2540 = vmax.xlane.f32.xlu0 %v2539_v33  ;;  %v4397_v2 = vpack.c.bf16 %v1721_v63, %v1719_v62  ;;  %1884 = vst [vmem:[#allocation3 + $0x88] sm:$0xff] %v4391_v1 }
 0x2ab   : > { %v5917_v9 = vadd.f32 %v2536_v5, %v5855_v10 }
 0x2ac   : > { %v2674_v38 = vpop.f32.mrf.mxu0  ;;  %1890 = vst [vmem:[#allocation3 + $0xb8] sm:$0xff] %v4397_v2 }
 0x2ad   : > { %v2681_v11 = vmul.f32 0.35355338, %v2674_v38  ;;  %v2542_v12 = vsel %vm1954_vm2, %v5917_v9, -inf }
 0x2ae   : > { %v4586_v14 = vpop.f32.mrf.mxu0  ;;  %2543 = vmax.xlane.f32.xlu1 %v2542_v12 }
 0x2af   : > { %v5922_v15 = vadd.f32 %v2681_v11, %v5855_v10 }
 0x2b0   : > { %v2677_v16 = vpop.f32.mrf.mxu0 }
 0x2b1   : > { %v2682_v17 = vmul.f32 0.35355338, %v2677_v16  ;;  %v2685_v18 = vsel %vm1954_vm2, %v5922_v15, -inf }
 0x2b2   : > { %v4587_v19 = vpop.f32.mrf.mxu0  ;;  %2686 = vmax.xlane.f32.xlu0 %v2685_v18 }
 0x2b3   : > { %v5927_v20 = vadd.f32 %v2682_v17, %v5855_v10 }
 0x2b4   : > { %v2820_v21 = vpop.f32.mrf.mxu0 }
 0x2b5   : > { %v2827_v23 = vmul.f32 0.35355338, %v2820_v21  ;;  %v2688_v24 = vsel %vm1954_vm2, %v5927_v20, -inf }
 0x2b6   : > { %v4598_v25 = vpop.f32.mrf.mxu0  ;;  %2689 = vmax.xlane.f32.xlu1 %v2688_v24 }
 0x2b7   : > { %v5932_v26 = vadd.f32 %v2827_v23, %v5855_v10  ;;  %v4930_v23 = vld [vmem:[#allocation3 + $0x24] ss:$48 sps:$4 sm:$0xff]  }
 0x2b8   : > { %v2823_v30 = vpop.f32.mrf.mxu0 }
 0x2b9   : > { %v2828_v31 = vmul.f32 0.35355338, %v2823_v30  ;;  %v2831_v32 = vsel %vm1954_vm2, %v5932_v26, -inf }
 0x2ba   : > { %v4599_v34 = vpop.f32.mrf.mxu0  ;;  %2832 = vmax.xlane.f32.xlu0 %v2831_v32 }
 0x2bb   : > { %v5937_v39 = vadd.f32 %v2828_v31, %v5855_v10  ;;  %v4931_v34 = vld [vmem:[#allocation3 + $0x28] ss:$48 sps:$4 sm:$0xff]  }
 0x2bc   : > { %v2966_v41 = vpop.f32.mrf.mxu0 }
 0x2bd   : > { %v2973_v42 = vmul.f32 0.35355338, %v2966_v41  ;;  %v2834_v43 = vsel %vm1954_vm2, %v5937_v39, -inf }
 0x2be   : > { %v4610_v37 = vpop.f32.mrf.mxu0  ;;  %2835 = vmax.xlane.f32.xlu1 %v2834_v43 }
 0x2bf   : > { %v5942_v46 = vadd.f32 %v2973_v42, %v5855_v10 }
 0x2c0   : > { %v2969_v48 = vpop.f32.mrf.mxu0 }
 0x2c1   : > { %v2974_v52 = vmul.f32 0.35355338, %v2969_v48  ;;  %v2977_v53 = vsel %vm1954_vm2, %v5942_v46, -inf }
 0x2c2   : > { %v4611_v54 = vpop.f32.mrf.mxu0  ;;  %2978 = vmax.xlane.f32.xlu0 %v2977_v53 }
 0x2c3   : > { %v5947_v49 = vadd.f32 %v2974_v52, %v5855_v10 }
 0x2c5   : > { %v2980_v57 = vsel %vm1954_vm2, %v5947_v49, -inf }
 0x2c6   : > { %2981 = vmax.xlane.f32.xlu1 %v2980_v57 }
 0x313   : > { %v1957_v10 = vpop.xlane.xlu0 %1956 }
 0x314   : > { %v1961_v3 = vsub.f32 %v5858_v13, %v1957_v10 }
 0x316   : > { %v1963_v4 = vmul.f32 1.442695, %v1961_v3 }
 0x317   : > { %v1960_v47 = vpop.xlane.xlu0 %1959 }
 0x318   : > { %4997 = vpow2.f32 %v1963_v4  ;;  %v1962_v5 = vsub.f32 %v5863_v29, %v1960_v47  ;;  %v4933_v47 = vld [vmem:[#allocation3 + $0x80] ss:$48 sps:$4 sm:$0xff]  }
 0x31a   : > { %v1965_v33 = vmul.f32 1.442695, %v1962_v5 }
 0x31b   : > { %v2103_v51 = vpop.xlane.xlu1 %2102 }
 0x31c   : > { %4999 = vpow2.f32 %v1965_v33  ;;  %v2107_v44 = vsub.f32 %v5868_v22, %v2103_v51 }
 0x31e   : > { %v2109_v60 = vmul.f32 1.442695, %v2107_v44 }
 0x31f   : > { %v2106_v7 = vpop.xlane.xlu1 %2105 }
 0x320   : > { %5001 = vpow2.f32 %v2109_v60  ;;  %v2108_v61 = vsub.f32 %v5873_v27, %v2106_v7 }
 0x322   : > { %v2111_v38 = vmul.f32 1.442695, %v2108_v61 }
 0x323   : > { %v2249_v11 = vpop.xlane.xlu0 %2248 }
 0x324   : > { %5003 = vpow2.f32 %v2111_v38  ;;  %v2253_v13 = vsub.f32 %v5878_v35, %v2249_v11 }
 0x325   : > { %v4998_v12 = vpop.eup %4997 }
 0x326   : > { %v2255_v14 = vmul.f32 1.442695, %v2253_v13  ;;  %v1967_v16 = vsel %vm1954_vm2, %v4998_v12, 0.0  ;;  %v4934_v13 = vld [vmem:[#allocation3 + $0x84] ss:$48 sps:$4 sm:$0xff]  }
 0x327   : > { %v2252_v29 = vpop.xlane.xlu1 %2251  ;;  %1968 = vadd.xlane.f32.xlu0 %v1967_v16 }
 0x328   : > { %5005 = vpow2.f32 %v2255_v14  ;;  %v2254_v17 = vsub.f32 %v5883_v45, %v2252_v29 }
 0x329   : > { %v5000_v22 = vpop.eup %4999 }
 0x32a   : > { %v1973_v18 = vpack.c.bf16 %v5000_v22, %v4998_v12  ;;  %v2257_v19 = vmul.f32 1.442695, %v2254_v17  ;;  %v1970_v21 = vsel %vm1954_vm2, %v5000_v22, 0.0 }
 0x32b   : > { %1971 = vadd.xlane.f32.xlu1 %v1970_v21  ;;  %v2395_v27 = vpop.xlane.xlu0 %2394 }
 0x32c   : > { %5007 = vpow2.f32 %v2257_v19  ;;  %v2399_v35 = vsub.f32 %v5888_v50, %v2395_v27  ;;  %4531 = vmatmul.mubr.msk.bf16.vlgmr.msra.gmra.mxu1 %vm1954_vm2, %v1973_v18  ;;  %v4935_v18 = vld [vmem:[#allocation3 + $0x88] ss:$48 sps:$4 sm:$0xff]  }
 0x32d   : > { %v5002_v24 = vpop.eup %5001  ;;  %4541 = vmatpush3.bf16.msra.mxu1 %v4930_v23  ;;  %4542 = vmatprep.mubr.msk.bf16.mxu1 %vm5353_vm0, %v5352_v28 }
 0x32e   : > { %v2401_v25 = vmul.f32 1.442695, %v2399_v35  ;;  %v2113_v45 = vsel %vm1954_vm2, %v5002_v24, 0.0  ;;  %4552 = vmatprep.subr.bf16.mxu1 %v5352_v28 }
 0x32f   : > { %v2398_v30 = vpop.xlane.xlu1 %2397  ;;  %2114 = vadd.xlane.f32.xlu0 %v2113_v45 }
 0x330   : > { %5009 = vpow2.f32 %v2401_v25  ;;  %v2400_v31 = vsub.f32 %v5893_v36, %v2398_v30  ;;  %v4936_v25 = vld [vmem:[#allocation3 + $0x8c] ss:$48 sps:$4 sm:$0xff]  }
 0x331   : > { %v5004_v32 = vpop.eup %5003 }
 0x332   : > { %v2403_v50 = vmul.f32 1.442695, %v2400_v31  ;;  %v2116_v41 = vsel %vm1954_vm2, %v5004_v32, 0.0  ;;  %v2119_v42 = vpack.c.bf16 %v5004_v32, %v5002_v24 }
 0x333   : > { %2117 = vadd.xlane.f32.xlu1 %v2116_v41  ;;  %v2541_v43 = vpop.xlane.xlu0 %2540  ;;  %v4938_v41 = vld [vmem:[%s5613_s16 + $0x38] sm:$0xff]  }
 0x334   : > { %5011 = vpow2.f32 %v2403_v50  ;;  %v2545_v37 = vsub.f32 %v5908_v0, %v2541_v43  ;;  %4543 = vmatmul.mubr.msk.bf16.vlgmr.msra.gmra.mxu1 %vm1954_vm2, %v2119_v42  ;;  %v4937_v50 = vld [vmem:[%s5613_s16 + $0x78] sm:$0xff]   ;;  %v4939_v42 = vld [vmem:[%s5613_s16 + $0x70] sm:$0xff]  }
 0x335   : > { %v5006_v48 = vpop.eup %5005  ;;  %4553 = vmatpush3.bf16.msra.mxu1 %v4931_v34  ;;  %4554 = vmatprep.mubr.msk.bf16.mxu1 %vm5353_vm0, %v5352_v28  ;;  %v4940_v43 = vld [vmem:[%s5613_s16 + $0x30] sm:$0xff]  }
 0x336   : > { %v2547_v6 = vmul.f32 1.442695, %v2545_v37  ;;  %v2259_v36 = vsel %vm1954_vm2, %v5006_v48, 0.0  ;;  %4564 = vmatprep.subr.bf16.mxu1 %v5352_v28  ;;  %4446 = vmatprep.subr.bf16.mxu0 %v4937_v50  ;;  %v4941_v37 = vld [vmem:[%s5613_s16 + $0x68] sm:$0xff]  }
 0x337   : > { %v2544_v52 = vpop.xlane.xlu1 %2543  ;;  %2260 = vadd.xlane.f32.xlu0 %v2259_v36  ;;  %4447 = vmatpush3.bf16.msra.mxu0 %v4938_v41  ;;  %v4944_v36 = vld [vmem:[%s5613_s16 + $0x20] sm:$0xff]  }
 0x338   : > { %5013 = vpow2.f32 %v2547_v6  ;;  %v2546_v53 = vsub.f32 %v5917_v9, %v2544_v52  ;;  %4448 = vmatprep.subr.bf16.mxu0 %v4939_v42  ;;  %v4943_v6 = vld [vmem:[%s5613_s16 + $0x60] sm:$0xff]   ;;  %v4945_v52 = vld [vmem:[%s5613_s16 + $0x58] sm:$0xff]  }
 0x339   : > { %v5008_v54 = vpop.eup %5007 }
 0x33a   : > { %v2549_v55 = vmul.f32 1.442695, %v2546_v53  ;;  %v2262_v0 = vsel %vm1954_vm2, %v5008_v54, 0.0  ;;  %v2265_v56 = vpack.c.bf16 %v5008_v54, %v5006_v48  ;;  %v4942_v48 = vld [vmem:[%s5613_s16 + $0x28] sm:$0xff]   ;;  %v4946_v53 = vld [vmem:[%s5613_s16 + $0xf8] sm:$0xff]  }
 0x33b   : > { %2263 = vadd.xlane.f32.xlu1 %v2262_v0  ;;  %v2687_v57 = vpop.xlane.xlu0 %2686  ;;  %4449 = vmatpush3.bf16.msra.mxu0 %v4940_v43  ;;  %v4947_v54 = vld [vmem:[%s5613_s16 + $0x18] sm:$0xff]   ;;  %v4949_v0 = vld [vmem:[%s5613_s16 + $0x50] sm:$0xff]  }
 0x33c   : > { %5015 = vpow2.f32 %v2549_v55  ;;  %v2691_v40 = vsub.f32 %v5922_v15, %v2687_v57  ;;  %4555 = vmatmul.mubr.msk.bf16.vlgmr.msra.gmra.mxu1 %vm1954_vm2, %v2265_v56  ;;  %4450 = vmatprep.subr.bf16.mxu0 %v4941_v37  ;;  %v4948_v55 = vld [vmem:[%s5613_s16 + $0xb8] sm:$0xff]   ;;  %v4950_v56 = vld [vmem:[%s5613_s16 + $0xf0] sm:$0xff]  }
 0x33d   : > { %v5010_v59 = vpop.eup %5009  ;;  %4565 = vmatpush3.bf16.msra.mxu1 %v4932_v58  ;;  %4566 = vmatprep.mubr.msk.bf16.mxu1 %vm5353_vm0, %v5352_v28  ;;  %v4951_v57 = vld [vmem:[%s5613_s16 + $0x10] sm:$0xff]  }
 0x33e   : > { %v2693_v62 = vmul.f32 1.442695, %v2691_v40  ;;  %v2405_v9 = vsel %vm1954_vm2, %v5010_v59, 0.0  ;;  %4576 = vmatprep.subr.bf16.mxu1 %v5352_v28  ;;  %v4952_v58 = vld [vmem:[%s5613_s16 + $0xb0] sm:$0xff]   ;;  %v4953_v40 = vld [vmem:[%s5613_s16 + $0x48] sm:$0xff]  }
 0x33f   : > { %v2690_v63 = vpop.xlane.xlu1 %2689  ;;  %2406 = vadd.xlane.f32.xlu0 %v2405_v9  ;;  %4451 = vmatpush3.bf16.msra.mxu0 %v4942_v48  ;;  %v4956_v9 = vld [vmem:[%s5613_s16 + $0xa8] sm:$0xff]  }
 0x340   : > { %5017 = vpow2.f32 %v2693_v62  ;;  %v2692_v1 = vsub.f32 %v5927_v20, %v2690_v63  ;;  %4452 = vmatprep.subr.bf16.mxu0 %v4943_v6  ;;  %v4955_v62 = vld [vmem:[%s5613_s16 + $0x8] sm:$0xff]   ;;  %v4957_v63 = vld [vmem:[%s5613_s16 + $0x40] sm:$0xff]  }
 0x341   : > { %v5012_v2 = vpop.eup %5011 }
 0x342   : > { %v2695_v10 = vmul.f32 1.442695, %v2692_v1  ;;  %v2408_v15 = vsel %vm1954_vm2, %v5012_v2, 0.0  ;;  %v2411_v3 = vpack.c.bf16 %v5012_v2, %v5010_v59  ;;  %v4954_v59 = vld [vmem:[%s5613_s16 + $0xe8] sm:$0xff]   ;;  %v4958_v1 = vld [vmem:[%s5613_s16 + $0xe0] sm:$0xff]  }
 0x343   : > { %2409 = vadd.xlane.f32.xlu1 %v2408_v15  ;;  %v2833_v4 = vpop.xlane.xlu0 %2832  ;;  %4453 = vmatpush3.bf16.msra.mxu0 %v4944_v36  ;;  %v4959_v2 = vld [vmem:[%s5613_s16] sm:$0xff]   ;;  %v4964_v15 = vld [vmem:[%s5613_s16 + $0xd8] sm:$0xff]  }
 0x344   : > { %5019 = vpow2.f32 %v2695_v10  ;;  %v2837_v5 = vsub.f32 %v5932_v26, %v2833_v4  ;;  %4567 = vmatmul.mubr.msk.bf16.vlgmr.msra.gmra.mxu1 %vm1954_vm2, %v2411_v3  ;;  %4454 = vmatprep.subr.bf16.mxu0 %v4945_v52  ;;  %v4960_v10 = vld [vmem:[%s5613_s16 + $0xa0] sm:$0xff]   ;;  %v4965_v3 = vld [vmem:[%s5613_s16 + $0x98] sm:$0xff]   ;;  %v4966_v4 = vld [vmem:[%s5613_s16 + $0xd0] sm:$0xff]  }
 0x345   : > { %v5014_v33 = vpop.eup %5013  ;;  %4577 = vmatpush3.bf16.msra.mxu1 %v4933_v47  ;;  %4578 = vmatprep.mubr.msk.bf16.mxu1 %vm5353_vm0, %v5352_v28  ;;  %v4967_v47 = vld [vmem:[%s5613_s16 + $0x90] sm:$0xff]  }
 0x346   : > { %v2839_v51 = vmul.f32 1.442695, %v2837_v5  ;;  %v2551_v20 = vsel %vm1954_vm2, %v5014_v33, 0.0  ;;  %4588 = vmatprep.subr.bf16.mxu1 %v5352_v28  ;;  %v4968_v5 = vld [vmem:[%s5613_s16 + $0xc8] sm:$0xff]  }
 0x347   : > { %v2836_v44 = vpop.xlane.xlu1 %2835  ;;  %2552 = vadd.xlane.f32.xlu0 %v2551_v20  ;;  %4455 = vmatpush3.bf16.msra.mxu0 %v4947_v54  ;;  %v4971_v20 = vld [vmem:[%s5613_s16 + $0x80] sm:$0xff]  }
 0x348   : > { %5021 = vpow2.f32 %v2839_v51  ;;  %v2838_v60 = vsub.f32 %v5937_v39, %v2836_v44  ;;  %4456 = vmatprep.subr.bf16.mxu0 %v4949_v0  ;;  %v4970_v51 = vld [vmem:[%s5613_s16 + $0xc0] sm:$0xff]  }
 0x349   : > { %v5016_v7 = vpop.eup %5015 }
 0x34a   : > { %v2841_v61 = vmul.f32 1.442695, %v2838_v60  ;;  %v2554_v26 = vsel %vm1954_vm2, %v5016_v7, 0.0  ;;  %v2557_v38 = vpack.c.bf16 %v5016_v7, %v5014_v33  ;;  %v4969_v33 = vld [vmem:[%s5613_s16 + $0x88] sm:$0xff]  }
 0x34b   : > { %2555 = vadd.xlane.f32.xlu1 %v2554_v26  ;;  %v2979_v11 = vpop.xlane.xlu0 %2978  ;;  %4457 = vmatpush3.bf16.msra.mxu0 %v4951_v57 }
 0x34c   : > { %5023 = vpow2.f32 %v2841_v61  ;;  %v2983_v12 = vsub.f32 %v5942_v46, %v2979_v11  ;;  %4579 = vmatmul.mubr.msk.bf16.vlgmr.msra.gmra.mxu1 %vm1954_vm2, %v2557_v38  ;;  %4458 = vmatprep.subr.bf16.mxu0 %v4953_v40 }
 0x34d   : > { %v5018_v14 = vpop.eup %5017  ;;  %4589 = vmatpush3.bf16.msra.mxu1 %v4934_v13  ;;  %4590 = vmatprep.mubr.msk.bf16.mxu1 %vm5353_vm0, %v5352_v28 }
 0x34e   : > { %v2985_v16 = vmul.f32 1.442695, %v2983_v12  ;;  %v2697_v39 = vsel %vm1954_vm2, %v5018_v14, 0.0  ;;  %4600 = vmatprep.subr.bf16.mxu1 %v5352_v28 }
 0x34f   : > { %v2982_v29 = vpop.xlane.xlu1 %2981  ;;  %2698 = vadd.xlane.f32.xlu0 %v2697_v39  ;;  %4459 = vmatpush3.bf16.msra.mxu0 %v4955_v62 }
 0x350   : > { %5025 = vpow2.f32 %v2985_v16  ;;  %v2984_v17 = vsub.f32 %v5947_v49, %v2982_v29  ;;  %4460 = vmatprep.subr.bf16.mxu0 %v4957_v63 }
 0x351   : > { %v5020_v22 = vpop.eup %5019 }
 0x352   : > { %v2987_v46 = vmul.f32 1.442695, %v2984_v17  ;;  %v2700_v19 = vsel %vm1954_vm2, %v5020_v22, 0.0  ;;  %v2703_v21 = vpack.c.bf16 %v5020_v22, %v5018_v14 }
 0x353   : > { %2701 = vadd.xlane.f32.xlu1 %v2700_v19  ;;  %4461 = vmatpush3.bf16.msra.mxu0 %v4959_v2 }
 0x354   : > { %5027 = vpow2.f32 %v2987_v46  ;;  %4591 = vmatmul.mubr.msk.bf16.vlgmr.msra.gmra.mxu1 %vm1954_vm2, %v2703_v21 }
 0x355   : > { %v5022_v27 = vpop.eup %5021  ;;  %4601 = vmatpush3.bf16.msra.mxu1 %v4935_v18  ;;  %4602 = vmatprep.mubr.msk.bf16.mxu1 %vm5353_vm0, %v5352_v28 }
 0x356   : > { %v2843_v23 = vsel %vm1954_vm2, %v5022_v27, 0.0  ;;  %4612 = vmatprep.subr.bf16.mxu1 %v5352_v28 }
 0x357   : > { %2844 = vadd.xlane.f32.xlu0 %v2843_v23 }
 0x359   : > { %v5024_v49 = vpop.eup %5023 }
 0x35a   : > { %v2846_v35 = vsel %vm1954_vm2, %v5024_v49, 0.0  ;;  %v2849_v24 = vpack.c.bf16 %v5024_v49, %v5022_v27 }
 0x35b   : > { %2847 = vadd.xlane.f32.xlu1 %v2846_v35 }
 0x35c   : > { %4603 = vmatmul.mubr.msk.bf16.vlgmr.msra.gmra.mxu1 %vm1954_vm2, %v2849_v24 }
 0x35d   : > { %v5026_v45 = vpop.eup %5025  ;;  %4613 = vmatpush3.bf16.msra.mxu1 %v4936_v25  ;;  %4614 = vmatprep.mubr.msk.bf16.mxu1 %vm5353_vm0, %v5352_v28 }
 0x35e   : > { %v2989_v30 = vsel %vm1954_vm2, %v5026_v45, 0.0  ;;  %4474 = vmatprep.subr.bf16.mxu1 %v4946_v53 }
 0x35f   : > { %2990 = vadd.xlane.f32.xlu0 %v2989_v30 }
 0x361   : > { %v5028_v31 = vpop.eup %5027 }
 0x362   : > { %v2992_v32 = vsel %vm1954_vm2, %v5028_v31, 0.0  ;;  %v2995_v34 = vpack.c.bf16 %v5028_v31, %v5026_v45 }
 0x363   : > { %2993 = vadd.xlane.f32.xlu1 %v2992_v32 }
 0x364   : > { %4615 = vmatmul.mubr.msk.bf16.vlgmr.msra.gmra.mxu1 %vm1954_vm2, %v2995_v34 }
 0x365   : > { %4475 = vmatpush3.bf16.msra.mxu1 %v4948_v55 }
 0x366   : > { %4476 = vmatprep.subr.bf16.mxu1 %v4950_v56 }
 0x369   : > { %4477 = vmatpush3.bf16.msra.mxu1 %v4952_v58 }
 0x36a   : > { %4478 = vmatprep.subr.bf16.mxu1 %v4954_v59 }
 0x36d   : > { %4479 = vmatpush3.bf16.msra.mxu1 %v4956_v9 }
 0x36e   : > { %4480 = vmatprep.subr.bf16.mxu1 %v4958_v1 }
 0x371   : > { %4481 = vmatpush3.bf16.msra.mxu1 %v4960_v10 }
 0x372   : > { %4482 = vmatprep.subr.bf16.mxu1 %v4964_v15 }
 0x375   : > { %4483 = vmatpush3.bf16.msra.mxu1 %v4965_v3 }
 0x376   : > { %4484 = vmatprep.subr.bf16.mxu1 %v4966_v4 }
 0x379   : > { %4485 = vmatpush3.bf16.msra.mxu1 %v4967_v47 }
 0x37a   : > { %4486 = vmatprep.subr.bf16.mxu1 %v4968_v5 }
 0x37d   : > { %4487 = vmatpush3.bf16.msra.mxu1 %v4969_v33 }
 0x37e   : > { %4488 = vmatprep.subr.bf16.mxu1 %v4970_v51 }
 0x381   : > { %4489 = vmatpush3.bf16.msra.mxu1 %v4971_v20 }
 0x3b0   : > { %v1969_v44 = vpop.xlane.xlu0 %1968 }
 0x3b1   : > { %5029 = vrcp.f32 %v1969_v44 }
 0x3b4   : > { %v1972_v60 = vpop.xlane.xlu1 %1971 }
 0x3b5   : > { %5031 = vrcp.f32 %v1972_v60 }
 0x3b8   : > { %v2115_v7 = vpop.xlane.xlu0 %2114 }
 0x3b9   : > { %5033 = vrcp.f32 %v2115_v7 }
 0x3bc   : > { %v2118_v61 = vpop.xlane.xlu1 %2117 }
 0x3bd   : > { %5035 = vrcp.f32 %v2118_v61 }
 0x3be   : > { %v5030_v26 = vpop.eup %5029 }
 0x3c0   : > { %v2261_v38 = vpop.xlane.xlu0 %2260 }
 0x3c1   : > { %5037 = vrcp.f32 %v2261_v38 }
 0x3c2   : > { %v5032_v16 = vpop.eup %5031 }
 0x3c4   : > { %v2264_v39 = vpop.xlane.xlu1 %2263 }
 0x3c5   : > { %5039 = vrcp.f32 %v2264_v39 }
 0x3c6   : > { %v5034_v46 = vpop.eup %5033 }
 0x3c8   : > { %v2407_v19 = vpop.xlane.xlu0 %2406 }
 0x3c9   : > { %5041 = vrcp.f32 %v2407_v19 }
 0x3ca   : > { %v5036_v35 = vpop.eup %5035 }
 0x3cc   : > { %v2410_v24 = vpop.xlane.xlu1 %2409 }
 0x3cd   : > { %5043 = vrcp.f32 %v2410_v24 }
 0x3ce   : > { %v5038_v32 = vpop.eup %5037 }
 0x3d0   : > { %v2553_v34 = vpop.xlane.xlu0 %2552 }
 0x3d1   : > { %5045 = vrcp.f32 %v2553_v34 }
 0x3d2   : > { %v5040_v37 = vpop.eup %5039 }
 0x3d4   : > { %v2556_v48 = vpop.xlane.xlu1 %2555 }
 0x3d5   : > { %5047 = vrcp.f32 %v2556_v48 }
 0x3d6   : > { %v5042_v54 = vpop.eup %5041 }
 0x3d8   : > { %v2699_v55 = vpop.xlane.xlu0 %2698 }
 0x3d9   : > { %5049 = vrcp.f32 %v2699_v55 }
 0x3da   : > { %v5044_v62 = vpop.eup %5043 }
 0x3dc   : > { %v2702_v9 = vpop.xlane.xlu1 %2701 }
 0x3dd   : > { %5051 = vrcp.f32 %v2702_v9 }
 0x3de   : > { %v5046_v15 = vpop.eup %5045 }
 0x3e0   : > { %v2845_v3 = vpop.xlane.xlu0 %2844 }
 0x3e1   : > { %5053 = vrcp.f32 %v2845_v3 }
 0x3e2   : > { %v5048_v51 = vpop.eup %5047 }
 0x3e4   : > { %v2848_v20 = vpop.xlane.xlu1 %2847 }
 0x3e5   : > { %5055 = vrcp.f32 %v2848_v20  ;;  %v5078_v20 = vld [vmem:[#allocation2] sm:$0xff] }
 0x3e8   : > { %v2991_v38 = vpop.xlane.xlu0 %2990 }
 0x3e9   : > { %5057 = vrcp.f32 %v2991_v38 }
 0x3ec   : > { %v2017_v11 = vpop.f32.mrf.mxu1 }
 0x3ed   : > { %v2026_v13 = vmul.f32 %v5030_v26, %v2017_v11  ;;  %v5050_v26 = vpop.eup %5049 }
 0x3ee   : > { %v4532_v12 = vpop.f32.mrf.mxu1 }
 0x3ef   : > { %v4398_v14 = vpack.c.bf16 %v2026_v13, %v2026_v13 }
 0x3f0   : > { %v2020_v29 = vpop.f32.mrf.mxu1 }
 0x3f1   : > { %2036 = vst [vmem:[#allocation4] sm:$0xf] %v4398_v14  ;;  %v2027_v17 = vmul.f32 %v5032_v16, %v2020_v29  ;;  %v5052_v29 = vpop.eup %5051 }
 0x3f2   : > { %v4533_v22 = vpop.f32.mrf.mxu1 }
 0x3f3   : > { %v4399_v18 = vpack.c.bf16 %v2027_v17, %v2027_v17  ;;  %v2994_v17 = vpop.xlane.xlu1 %2993 }
 0x3f4   : > { %v2163_v21 = vpop.f32.mrf.mxu1  ;;  %5059 = vrcp.f32 %v2994_v17 }
 0x3f5   : > { %2037 = vst [vmem:[#allocation4 + $0x10] sm:$0xf] %v4399_v18  ;;  %v2172_v27 = vmul.f32 %v5034_v46, %v2163_v21  ;;  %v5054_v21 = vpop.eup %5053 }
 0x3f6   : > { %v4544_v23 = vpop.f32.mrf.mxu1  ;;  %v5056_v24 = vpop.eup %5055 }
 0x3f7   : > { %v4400_v49 = vpack.c.bf16 %v2172_v27, %v2172_v27 }
 0x3f8   : > { %v2166_v25 = vpop.f32.mrf.mxu1 }
 0x3f9   : > { %2182 = vst [vmem:[#allocation4 + $0x4] sm:$0xf] %v4400_v49  ;;  %v2173_v45 = vmul.f32 %v5036_v35, %v2166_v25 }
 0x3fa   : > { %v4545_v30 = vpop.f32.mrf.mxu1 }
 0x3fb   : > { %v4401_v31 = vpack.c.bf16 %v2173_v45, %v2173_v45 }
 0x3fc   : > { %v2309_v50 = vpop.f32.mrf.mxu1  ;;  %v4961_v56 = vld [vmem:[#allocation4] ss:$16 sps:$4 sm:$0xff]  }
 0x3fd   : > { %2183 = vst [vmem:[#allocation4 + $0x14] sm:$0xf] %v4401_v31  ;;  %v2318_v41 = vmul.f32 %v5038_v32, %v2309_v50  ;;  %v5058_v32 = vpop.eup %5057 }
 0x3fe   : > { %v4556_v42 = vpop.f32.mrf.mxu1 }
 0x3ff   : > { %v4402_v43 = vpack.c.bf16 %v2318_v41, %v2318_v41 }
 0x400   : > { %v2312_v6 = vpop.f32.mrf.mxu1 }
 0x401   : > { %2328 = vst [vmem:[#allocation4 + $0x8] sm:$0xf] %v4402_v43  ;;  %v2319_v36 = vmul.f32 %v5040_v37, %v2312_v6  ;;  %v5060_v48 = vpop.eup %5059 }
 0x402   : > { %v4557_v52 = vpop.f32.mrf.mxu1 }
 0x403   : > { %v4403_v53 = vpack.c.bf16 %v2319_v36, %v2319_v36 }
 0x404   : > { %v2455_v0 = vpop.f32.mrf.mxu1  ;;  %v4963_v57 = vld [vmem:[#allocation4 + $0x4] ss:$16 sps:$4 sm:$0xff]  }
 0x405   : > { %2329 = vst [vmem:[#allocation4 + $0x18] sm:$0xf] %v4403_v53  ;;  %v2464_v58 = vmul.f32 %v5042_v54, %v2455_v0  ;;  %3403 = vmatprep.mubr.bf16.mxu0 %v4963_v57 }
 0x406   : > { %v4568_v40 = vpop.f32.mrf.mxu1  ;;  %3404 = vmatmul.mubr.bf16.vlgmr.msra.gmra.mxu0 %v4961_v56 }
 0x407   : > { %v4404_v59 = vpack.c.bf16 %v2464_v58, %v2464_v58  ;;  %v4303_v40 = vld [vmem:[%s6222_s9] ss:$0 sm:$0xff] }
 0x408   : > { %v2458_v63 = vpop.f32.mrf.mxu1 }
 0x409   : > { %2474 = vst [vmem:[#allocation4 + $0xc] sm:$0xf] %v4404_v59  ;;  %v2465_v1 = vmul.f32 %v5044_v62, %v2458_v63 }
 0x40a   : > { %v4569_v2 = vpop.f32.mrf.mxu1 }
 0x40b   : > { %v4405_v10 = vpack.c.bf16 %v2465_v1, %v2465_v1 }
 0x40c   : > { %v2601_v4 = vpop.f32.mrf.mxu1  ;;  %v4972_v13 = vld [vmem:[#allocation4 + $0x8] ss:$16 sps:$4 sm:$0xff]  }
 0x40d   : > { %2475 = vst [vmem:[#allocation4 + $0x1c] sm:$0xf] %v4405_v10  ;;  %v2610_v47 = vmul.f32 %v5046_v15, %v2601_v4 }
 0x40e   : > { %v4580_v5 = vpop.f32.mrf.mxu1 }
 0x40f   : > { %v4406_v33 = vpack.c.bf16 %v2610_v47, %v2610_v47  ;;  %v5077_v5 = vld [vmem:[#allocation2 + $0x10] sm:$0xff] }
 0x410   : > { %v2604_v44 = vpop.f32.mrf.mxu1 }
 0x411   : > { %2620 = vst [vmem:[#allocation4 + $0x20] sm:$0xf] %v4406_v33  ;;  %v2611_v60 = vmul.f32 %v5048_v51, %v2604_v44 }
 0x412   : > { %v4581_v7 = vpop.f32.mrf.mxu1 }
 0x413   : > { %v4407_v61 = vpack.c.bf16 %v2611_v60, %v2611_v60 }
 0x414   : > { %v2747_v11 = vpop.f32.mrf.mxu1  ;;  %v4974_v12 = vld [vmem:[#allocation4 + $0xc] ss:$16 sps:$4 sm:$0xff]  }
 0x415   : > { %2621 = vst [vmem:[#allocation4 + $0x30] sm:$0xf] %v4407_v61  ;;  %v2756_v14 = vmul.f32 %v5050_v26, %v2747_v11  ;;  %3452 = vmatprep.mubr.bf16.mxu1 %v4974_v12 }
 0x416   : > { %v4592_v16 = vpop.f32.mrf.mxu1  ;;  %3453 = vmatmul.mubr.bf16.vlgmr.msra.gmra.mxu1 %v4972_v13 }
 0x417   : > { %v4408_v39 = vpack.c.bf16 %v2756_v14, %v2756_v14 }
 0x418   : > { %v2750_v22 = vpop.f32.mrf.mxu1 }
 0x419   : > { %2766 = vst [vmem:[#allocation4 + $0x24] sm:$0xf] %v4408_v39  ;;  %v2757_v18 = vmul.f32 %v5052_v29, %v2750_v22 }
 0x41a   : > { %v4593_v46 = vpop.f32.mrf.mxu1 }
 0x41b   : > { %v4409_v19 = vpack.c.bf16 %v2757_v18, %v2757_v18  ;;  %v5079_v46 = vld [vmem:[#allocation2 + $0x18] sm:$0xff] }
 0x41c   : > { %v2893_v27 = vpop.f32.mrf.mxu1  ;;  %v4977_v41 = vld [vmem:[#allocation4 + $0x20] ss:$16 sps:$4 sm:$0xff]  }
 0x41d   : > { %2767 = vst [vmem:[#allocation4 + $0x34] sm:$0xf] %v4409_v19  ;;  %v2902_v23 = vmul.f32 %v5054_v21, %v2893_v27  ;;  %v5080_v27 = vld [vmem:[#allocation2 + $0x8] sm:$0xff] }
 0x41e   : > { %v4604_v49 = vpop.f32.mrf.mxu1 }
 0x41f   : > { %v4410_v35 = vpack.c.bf16 %v2902_v23, %v2902_v23 }
 0x420   : > { %v2896_v25 = vpop.f32.mrf.mxu1 }
 0x421   : > { %2912 = vst [vmem:[#allocation4 + $0x28] sm:$0xf] %v4410_v35  ;;  %v2903_v45 = vmul.f32 %v5056_v24, %v2896_v25  ;;  %v6054_v24 = vsel %vm754_vm3, 1.0, %v5352_v28 }
 0x422   : > { %v4605_v30 = vpop.f32.mrf.mxu1 }
 0x423   : > { %v4411_v31 = vpack.c.bf16 %v2903_v45, %v2903_v45 }
 0x424   : > { %v3039_v34 = vpop.f32.mrf.mxu1  ;;  %v4975_v50 = vld [vmem:[#allocation4 + $0x24] ss:$16 sps:$4 sm:$0xff]  }
 0x425   : > { %2913 = vst [vmem:[#allocation4 + $0x38] sm:$0xf] %v4411_v31  ;;  %v3048_v42 = vmul.f32 %v5058_v32, %v3039_v34  ;;  %3411 = vmatprep.mubr.bf16.mxu0 %v4975_v50 }
 0x426   : > { %v4616_v43 = vpop.f32.mrf.mxu1  ;;  %3412 = vmatmul.mubr.bf16.gmra.mxu0 %v4977_v41  ;;  %v4981_v41 = vld [vmem:[%s5619_s20 + $0x38] sm:$0xff]  }
 0x427   : > { %v4412_v37 = vpack.c.bf16 %v3048_v42, %v3048_v42  ;;  %4618 = vmatprep.subr.bf16.mxu0 %v4981_v41 }
 0x428   : > { %v3042_v6 = vpop.f32.mrf.mxu1  ;;  %4619 = vmatpush3.bf16.msra.mxu0 %v4981_v41 }
 0x429   : > { %3058 = vst [vmem:[#allocation4 + $0x2c] sm:$0xf] %v4412_v37  ;;  %v3049_v36 = vmul.f32 %v5060_v48, %v3042_v6 }
 0x42a   : > { %v4617_v52 = vpop.f32.mrf.mxu1 }
 0x42b   : > { %v4413_v53 = vpack.c.bf16 %v3049_v36, %v3049_v36 }
 0x42c   : > { %v4980_v55 = vld [vmem:[#allocation4 + $0x28] ss:$16 sps:$4 sm:$0xff]  }
 0x42d   : > { %3059 = vst [vmem:[#allocation4 + $0x3c] sm:$0xf] %v4413_v53 }
 0x434   : > { %v4978_v54 = vld [vmem:[#allocation4 + $0x2c] ss:$16 sps:$4 sm:$0xff]  }
 0x435   : > { %3460 = vmatprep.mubr.bf16.mxu1 %v4978_v54 }
 0x436   : > { %3461 = vmatmul.mubr.bf16.gmra.mxu1 %v4980_v55  ;;  %v4982_v55 = vld [vmem:[%s5619_s20 + $0x30] sm:$0xff]  }
 0x437   : > { %4620 = vmatprep.subr.bf16.mxu0 %v4982_v55 }
 0x438   : > { %4621 = vmatpush3.bf16.msra.mxu0 %v4982_v55  ;;  %v4355_v55 = vld [vmem:[%s731_s23] ss:$0 sm:$0xff] }
 0x4c6   : > { %v4462_v0 = vpop.f32.mrf.mxu0 }
 0x4c8   : > { %v4463_v56 = vpop.f32.mrf.mxu0 }
 0x4c9   : > { %v4464_v58 = vadd.f32 %v4463_v56, %v4462_v0  ;;  %v4983_v0 = vld [vmem:[%s5619_s20 + $0x28] sm:$0xff]   ;;  %v4984_v56 = vld [vmem:[%s5619_s20 + $0x20] sm:$0xff]  }
 0x4ca   : > { %v4465_v57 = vpop.f32.mrf.mxu0  ;;  %4622 = vmatprep.subr.bf16.mxu0 %v4983_v0 }
 0x4cb   : > { %v3406_v63 = vadd.f32 %v4464_v58, %v4303_v40  ;;  %4623 = vmatpush3.bf16.msra.mxu0 %v4983_v0  ;;  %v4986_v58 = vld [vmem:[%s5619_s20 + $0x10] sm:$0xff]  }
 0x4cc   : > { %v4466_v59 = vpop.f32.mrf.mxu0  ;;  %4624 = vmatprep.subr.bf16.mxu0 %v4984_v56 }
 0x4cd   : > { %v4467_v1 = vadd.f32 %v4466_v59, %v4465_v57  ;;  %v4985_v57 = vld [vmem:[%s5619_s20 + $0x18] sm:$0xff]   ;;  %v4988_v59 = vld [vmem:[%s5619_s20] sm:$0xff]  }
 0x4cf   : > { %v3409_v4 = vadd.f32 %v4467_v1, %v4303_v40  ;;  %4625 = vmatpush3.bf16.msra.mxu0 %v4984_v56  ;;  %v4992_v1 = vld [vmem:[%s5621_s22 + $0x20] sm:$0xff]  }
 0x4d0   : > { %4626 = vmatprep.subr.bf16.mxu0 %v4985_v57 }
 0x4d3   : > { %4627 = vmatpush3.bf16.msra.mxu0 %v4985_v57 }
 0x4d4   : > { %4628 = vmatprep.subr.bf16.mxu0 %v4986_v58 }
 0x4d6   : > { %v4490_v62 = vpop.f32.mrf.mxu1 }
 0x4d7   : > { %4629 = vmatpush3.bf16.msra.mxu0 %v4986_v58 }
 0x4d8   : > { %v4491_v9 = vpop.f32.mrf.mxu1 }
 0x4d9   : > { %v4492_v2 = vadd.f32 %v4491_v9, %v4490_v62  ;;  %v4989_v62 = vld [vmem:[%s5621_s22 + $0x38] sm:$0xff]   ;;  %v4990_v9 = vld [vmem:[%s5621_s22 + $0x30] sm:$0xff]  }
 0x4da   : > { %v4493_v10 = vpop.f32.mrf.mxu1  ;;  %4638 = vmatprep.subr.bf16.mxu1 %v4989_v62 }
 0x4db   : > { %v3455_v15 = vadd.f32 %v4492_v2, %v3406_v63  ;;  %4639 = vmatpush3.bf16.msra.mxu1 %v4989_v62  ;;  %v4991_v63 = vld [vmem:[%s5621_s22 + $0x28] sm:$0xff]   ;;  %v4993_v2 = vld [vmem:[%s5621_s22 + $0x18] sm:$0xff]  }
 0x4dc   : > { %v4494_v3 = vpop.f32.mrf.mxu1  ;;  %4640 = vmatprep.subr.bf16.mxu1 %v4990_v9 }
 0x4dd   : > { %v4495_v47 = vadd.f32 %v4494_v3, %v4493_v10  ;;  %v3469_v33 = vadd.f32 %v5077_v5, %v3455_v15 }
 0x4df   : > { %v3458_v51 = vadd.f32 %v4495_v47, %v3409_v4  ;;  %3475 = vadd.xlane.f32.xlu0 %v3469_v33  ;;  %4641 = vmatpush3.bf16.msra.mxu1 %v4990_v9 }
 0x4e0   : > { %4642 = vmatprep.subr.bf16.mxu1 %v4991_v63 }
 0x4e1   : > { %v3470_v44 = vadd.f32 %v5078_v20, %v3458_v51  ;;  %v4344_v20 = vld [vmem:[%s722_s3] ss:$0 sm:$0xff] }
 0x4e3   : > { %3477 = vadd.xlane.f32.xlu1 %v3470_v44  ;;  %4643 = vmatpush3.bf16.msra.mxu1 %v4991_v63 }
 0x4e4   : > { %4644 = vmatprep.subr.bf16.mxu1 %v4992_v1 }
 0x4e6   : > { %v4468_v60 = vpop.f32.mrf.mxu0 }
 0x4e7   : > { %4645 = vmatpush3.bf16.msra.mxu1 %v4992_v1 }
 0x4e8   : > { %v4469_v7 = vpop.f32.mrf.mxu0  ;;  %4646 = vmatprep.subr.bf16.mxu1 %v4993_v2 }
 0x4e9   : > { %v4470_v26 = vadd.f32 %v4469_v7, %v4468_v60 }
 0x4ea   : > { %v4471_v61 = vpop.f32.mrf.mxu0 }
 0x4eb   : > { %v3414_v12 = vadd.f32 %v4470_v26, %v4303_v40  ;;  %4647 = vmatpush3.bf16.msra.mxu1 %v4993_v2 }
 0x4ec   : > { %v4472_v38 = vpop.f32.mrf.mxu0 }
 0x4ed   : > { %v4473_v14 = vadd.f32 %v4472_v38, %v4471_v61  ;;  %v4345_v61 = vld [vmem:[%s725_s18] ss:$0 sm:$0xff] }
 0x4ef   : > { %v3417_v22 = vadd.f32 %v4473_v14, %v4303_v40  ;;  %v4987_v40 = vld [vmem:[%s5619_s20 + $0x8] sm:$0xff]  }
 0x4f0   : > { %4630 = vmatprep.subr.bf16.mxu0 %v4987_v40 }
 0x4f1   : > { %4631 = vmatpush3.bf16.msra.mxu0 %v4987_v40 }
 0x4f2   : > { %4632 = vmatprep.subr.bf16.mxu0 %v4988_v59 }
 0x4f5   : > { %4633 = vmatpush3.bf16.msra.mxu0 %v4988_v59 }
 0x4f6   : > { %v4496_v11 = vpop.f32.mrf.mxu1 }
 0x4f8   : > { %v4497_v13 = vpop.f32.mrf.mxu1 }
 0x4f9   : > { %v4498_v16 = vadd.f32 %v4497_v13, %v4496_v11 }
 0x4fa   : > { %v4499_v39 = vpop.f32.mrf.mxu1 }
 0x4fb   : > { %v3463_v29 = vadd.f32 %v4498_v16, %v3414_v12 }
 0x4fc   : > { %v4500_v17 = vpop.f32.mrf.mxu1 }
 0x4fd   : > { %v4501_v18 = vadd.f32 %v4500_v17, %v4499_v39  ;;  %v3471_v19 = vadd.f32 %v5079_v46, %v3463_v29 }
 0x4ff   : > { %v3466_v21 = vadd.f32 %v4501_v18, %v3417_v22  ;;  %3479 = vadd.xlane.f32.xlu0 %v3471_v19 }
 0x501   : > { %v3472_v23 = vadd.f32 %v5080_v27, %v3466_v21 }
 0x503   : > { %3481 = vadd.xlane.f32.xlu1 %v3472_v23 }
 0x568   : > { %v3476_v49 = vpop.xlane.xlu0 %3475 }
 0x569   : > { %v3483_v35 = vmul.f32 0.03125, %v3476_v49 }
 0x56b   : > { %v6056_v25 = vsub.f32 %v3469_v33, %v3483_v35 }
 0x56c   : > { %v3478_v45 = vpop.xlane.xlu1 %3477 }
 0x56d   : > { %v3484_v30 = vmul.f32 0.03125, %v3478_v45  ;;  %v3491_v31 = vmul.f32 %v6054_v24, %v6056_v25  ;;  %v4995_v45 = vld [vmem:[%s5621_s22 + $0x8] sm:$0xff]  }
 0x56f   : > { %v6060_v32 = vsub.f32 %v3470_v44, %v3484_v30  ;;  %v3495_v34 = vmul.f32 %v3491_v31, %v3491_v31  ;;  %v4996_v30 = vld [vmem:[%s5621_s22] sm:$0xff]  }
 0x571   : > { %3499 = vadd.xlane.f32.xlu0 %v3495_v34  ;;  %v3492_v50 = vmul.f32 %v6054_v24, %v6060_v32  ;;  %v4346_v34 = vld [vmem:[%s728_s27] ss:$0 sm:$0xff] }
 0x573   : > { %v3496_v8 = vmul.f32 %v3492_v50, %v3492_v50 }
 0x575   : > { %3501 = vadd.xlane.f32.xlu1 %v3496_v8 }
 0x588   : > { %v3480_v28 = vpop.xlane.xlu0 %3479 }
 0x589   : > { %v3485_v42 = vmul.f32 0.03125, %v3480_v28 }
 0x58b   : > { %v6065_v43 = vsub.f32 %v3471_v19, %v3485_v42 }
 0x58c   : > { %v3482_v37 = vpop.xlane.xlu1 %3481 }
 0x58d   : > { %v3486_v48 = vmul.f32 0.03125, %v3482_v37  ;;  %v3493_v6 = vmul.f32 %v6054_v24, %v6065_v43 }
 0x58f   : > { %v6069_v36 = vsub.f32 %v3472_v23, %v3486_v48  ;;  %v3497_v52 = vmul.f32 %v3493_v6, %v3493_v6 }
 0x591   : > { %3503 = vadd.xlane.f32.xlu0 %v3497_v52  ;;  %v3494_v53 = vmul.f32 %v6054_v24, %v6069_v36 }
 0x593   : > { %v3498_v54 = vmul.f32 %v3494_v53, %v3494_v53 }
 0x595   : > { %3505 = vadd.xlane.f32.xlu1 %v3498_v54 }
 0x5fa   : > { %v3500_v10 = vpop.xlane.xlu0 %3499 }
 0x5fb   : > { %v3507_v15 = vmul.f32 0.03125, %v3500_v10 }
 0x5fd   : > { %v3511_v3 = vadd.f32 1e-05, %v3507_v15 }
 0x5fe   : > { %v3502_v4 = vpop.xlane.xlu1 %3501 }
 0x5ff   : > { %5061 = vrsqrt.f32 %v3511_v3  ;;  %v3508_v47 = vmul.f32 0.03125, %v3502_v4 }
 0x601   : > { %v3512_v5 = vadd.f32 1e-05, %v3508_v47 }
 0x603   : > { %5063 = vrsqrt.f32 %v3512_v5 }
 0x60c   : > { %v5062_v33 = vpop.eup %5061 }
 0x60d   : > { %v3519_v51 = vmul.f32 %v5062_v33, %v6056_v25  ;;  %v4994_v25 = vld [vmem:[%s5621_s22 + $0x10] sm:$0xff]  }
 0x60e   : > { %4648 = vmatprep.subr.bf16.mxu1 %v4994_v25 }
 0x60f   : > { %v3529_v7 = vmul.f32 %v4344_v20, %v3519_v51  ;;  %4649 = vmatpush3.bf16.msra.mxu1 %v4994_v25  ;;  %v4364_v25 = vld [vmem:[%s734_s17] ss:$0 sm:$0xff] }
 0x610   : > { %v5064_v44 = vpop.eup %5063  ;;  %4650 = vmatprep.subr.bf16.mxu1 %v4995_v45 }
 0x611   : > { %v3520_v60 = vmul.f32 %v5064_v44, %v6060_v32  ;;  %v3539_v38 = vadd.f32 %v4345_v61, %v3529_v7 }
 0x613   : > { %v3530_v26 = vmul.f32 %v4344_v20, %v3520_v60  ;;  %4651 = vmatpush3.bf16.msra.mxu1 %v4995_v45 }
 0x614   : > { %4652 = vmatprep.subr.bf16.mxu1 %v4996_v30 }
 0x615   : > { %v3540_v11 = vadd.f32 %v4345_v61, %v3530_v26 }
 0x617   : > { %v3543_v13 = vpack.c.bf16 %v3540_v11, %v3539_v38  ;;  %4653 = vmatpush3.bf16.msra.mxu1 %v4996_v30  ;;  %v4365_v30 = vld [vmem:[%s737_s14] ss:$0 sm:$0xff] }
 0x619   : > { %4634 = vmatprep.mubr.bf16.mxu0 %v3543_v13 }
 0x61a   : > { %v3504_v12 = vpop.xlane.xlu0 %3503 }
 0x61b   : > { %v3509_v14 = vmul.f32 0.03125, %v3504_v12 }
 0x61d   : > { %v3513_v16 = vadd.f32 1e-05, %v3509_v14 }
 0x61e   : > { %v3506_v39 = vpop.xlane.xlu1 %3505 }
 0x61f   : > { %5065 = vrsqrt.f32 %v3513_v16  ;;  %v3510_v29 = vmul.f32 0.03125, %v3506_v39 }
 0x621   : > { %v3514_v17 = vadd.f32 1e-05, %v3510_v29 }
 0x623   : > { %5067 = vrsqrt.f32 %v3514_v17 }
 0x62c   : > { %v5066_v22 = vpop.eup %5065 }
 0x62d   : > { %v3521_v18 = vmul.f32 %v5066_v22, %v6065_v43 }
 0x62f   : > { %v3531_v21 = vmul.f32 %v4344_v20, %v3521_v18 }
 0x630   : > { %v5068_v46 = vpop.eup %5067 }
 0x631   : > { %v3522_v19 = vmul.f32 %v5068_v46, %v6069_v36  ;;  %v3541_v23 = vadd.f32 %v4345_v61, %v3531_v21 }
 0x633   : > { %v3532_v27 = vmul.f32 %v4344_v20, %v3522_v19 }
 0x635   : > { %v3542_v49 = vadd.f32 %v4345_v61, %v3532_v27 }
 0x637   : > { %v3544_v35 = vpack.c.bf16 %v3542_v49, %v3541_v23 }
 0x639   : > { %4635 = vmatmul.mubr.bf16.vlgmr.msra.gmra.mxu0 %v3544_v35 }
 0x6f9   : > { %v4636_v31 = vpop.f32.mrf.mxu0 }
 0x6fa   : > { %v3659_v28 = vadd.f32 %v4636_v31, %v4346_v34 }
 0x6fb   : > { %v3650_v32 = vpop.f32.mrf.mxu0 }
 0x6fc   : > { %v3651_v8 = vadd.f32 %v4346_v34, %v3650_v32  ;;  %v3667_v36 = vmax.f32 %v3659_v28, 0.0 }
 0x6fd   : > { %v4637_v50 = vpop.f32.mrf.mxu0 }
 0x6fe   : > { %v3662_v41 = vadd.f32 %v4637_v50, %v4346_v34  ;;  %v3665_v48 = vmax.f32 %v3651_v8, 0.0 }
 0x6ff   : > { %v3653_v42 = vpop.f32.mrf.mxu0 }
 0x700   : > { %v3654_v43 = vadd.f32 %v4346_v34, %v3653_v42  ;;  %v3668_v37 = vmax.f32 %v3662_v41, 0.0 }
 0x702   : > { %v3666_v6 = vmax.f32 %v3654_v43, 0.0  ;;  %v3670_v53 = vpack.c.bf16 %v3668_v37, %v3667_v36 }
 0x704   : > { %v3669_v52 = vpack.c.bf16 %v3666_v6, %v3665_v48 }
 0x706   : > { %4654 = vmatprep.mubr.bf16.mxu1 %v3669_v52 }
 0x707   : > { %4655 = vmatmul.mubr.bf16.vlgmr.msra.gmra.mxu1 %v3670_v53 }
 0x7c7   : > { %v4656_v54 = vpop.f32.mrf.mxu1 }
 0x7c8   : > { %v3785_v58 = vadd.f32 %v4656_v54, %v4355_v55 }
 0x7c9   : > { %v3776_v0 = vpop.f32.mrf.mxu1 }
 0x7ca   : > { %v3777_v56 = vadd.f32 %v4355_v55, %v3776_v0  ;;  %v3793_v1 = vadd.f32 %v3785_v58, %v3541_v23 }
 0x7cb   : > { %v4657_v57 = vpop.f32.mrf.mxu1 }
 0x7cc   : > { %v3791_v40 = vadd.f32 %v3777_v56, %v3539_v38  ;;  %v3788_v9 = vadd.f32 %v4657_v57, %v4355_v55 }
 0x7cd   : > { %v3779_v59 = vpop.f32.mrf.mxu1 }
 0x7ce   : > { %v3780_v62 = vadd.f32 %v4355_v55, %v3779_v59  ;;  %3797 = vadd.xlane.f32.xlu0 %v3791_v40  ;;  %v3794_v2 = vadd.f32 %v3788_v9, %v3542_v49 }
 0x7d0   : > { %v3792_v63 = vadd.f32 %v3780_v62, %v3540_v11 }
 0x7d2   : > { %3799 = vadd.xlane.f32.xlu1 %v3792_v63  ;;  %3801 = vadd.xlane.f32.xlu0 %v3793_v1 }
 0x7d6   : > { %3803 = vadd.xlane.f32.xlu1 %v3794_v2 }
 0x857   : > { %v3798_v10 = vpop.xlane.xlu0 %3797 }
 0x858   : > { %v3805_v15 = vmul.f32 0.03125, %v3798_v10 }
 0x85a   : > { %v3809_v3 = vsub.f32 %v3791_v40, %v3805_v15 }
 0x85b   : > { %v3800_v4 = vpop.xlane.xlu1 %3799  ;;  %v3802_v47 = vpop.xlane.xlu0 %3801 }
 0x85c   : > { %v3806_v5 = vmul.f32 0.03125, %v3800_v4  ;;  %v3807_v33 = vmul.f32 0.03125, %v3802_v47  ;;  %v3813_v51 = vmul.f32 %v6054_v24, %v3809_v3 }
 0x85e   : > { %v3810_v20 = vsub.f32 %v3792_v63, %v3806_v5  ;;  %v3811_v44 = vsub.f32 %v3793_v1, %v3807_v33  ;;  %v3817_v60 = vmul.f32 %v3813_v51, %v3813_v51 }
 0x85f   : > { %v3804_v7 = vpop.xlane.xlu1 %3803 }
 0x860   : > { %v3808_v61 = vmul.f32 0.03125, %v3804_v7  ;;  %3821 = vadd.xlane.f32.xlu0 %v3817_v60  ;;  %v3814_v26 = vmul.f32 %v6054_v24, %v3810_v20  ;;  %v3815_v38 = vmul.f32 %v6054_v24, %v3811_v44 }
 0x862   : > { %v3812_v11 = vsub.f32 %v3794_v2, %v3808_v61  ;;  %v3818_v13 = vmul.f32 %v3814_v26, %v3814_v26  ;;  %v3819_v12 = vmul.f32 %v3815_v38, %v3815_v38 }
 0x864   : > { %3823 = vadd.xlane.f32.xlu1 %v3818_v13  ;;  %3825 = vadd.xlane.f32.xlu0 %v3819_v12  ;;  %v3816_v14 = vmul.f32 %v6054_v24, %v3812_v11 }
 0x866   : > { %v3820_v16 = vmul.f32 %v3816_v14, %v3816_v14 }
 0x868   : > { %3827 = vadd.xlane.f32.xlu1 %v3820_v16 }
 0x8e9   : > { %v3822_v39 = vpop.xlane.xlu0 %3821 }
 0x8ea   : > { %v3829_v29 = vmul.f32 0.03125, %v3822_v39 }
 0x8ec   : > { %v3833_v17 = vadd.f32 1e-05, %v3829_v29 }
 0x8ed   : > { %v3824_v22 = vpop.xlane.xlu1 %3823  ;;  %v3826_v18 = vpop.xlane.xlu0 %3825 }
 0x8ee   : > { %5069 = vrsqrt.f32 %v3833_v17  ;;  %v3830_v46 = vmul.f32 0.03125, %v3824_v22  ;;  %v3831_v19 = vmul.f32 0.03125, %v3826_v18 }
 0x8f0   : > { %v3834_v21 = vadd.f32 1e-05, %v3830_v46  ;;  %v3835_v27 = vadd.f32 1e-05, %v3831_v19 }
 0x8f1   : > { %v3828_v23 = vpop.xlane.xlu1 %3827 }
 0x8f2   : > { %5071 = vrsqrt.f32 %v3834_v21  ;;  %v3832_v49 = vmul.f32 0.03125, %v3828_v23 }
 0x8f3   : > { %5073 = vrsqrt.f32 %v3835_v27 }
 0x8f4   : > { %v3836_v35 = vadd.f32 1e-05, %v3832_v49 }
 0x8f6   : > { %5075 = vrsqrt.f32 %v3836_v35 }
 0x8fb   : > { %v5070_v24 = vpop.eup %5069 }
 0x8fc   : > { %v3841_v45 = vmul.f32 %v5070_v24, %v3809_v3 }
 0x8fe   : > { %v3851_v31 = vmul.f32 %v4364_v25, %v3841_v45 }
 0x8ff   : > { %v5072_v32 = vpop.eup %5071 }
 0x900   : > { %v5074_v34 = vpop.eup %5073  ;;  %v3861_v50 = vadd.f32 %v4365_v30, %v3851_v31  ;;  %v3842_v8 = vmul.f32 %v5072_v32, %v3810_v20 }
 0x901   : > { %v3843_v41 = vmul.f32 %v5074_v34, %v3811_v44 }
 0x902   : > { %3865 = vst [vmem:[#allocation2 + $0x10] sm:$0xff] %v3861_v50  ;;  %v3852_v28 = vmul.f32 %v4364_v25, %v3842_v8 }
 0x903   : > { %v5076_v42 = vpop.eup %5075  ;;  %v3853_v43 = vmul.f32 %v4364_v25, %v3843_v41 }
 0x904   : > { %v3862_v37 = vadd.f32 %v4365_v30, %v3852_v28  ;;  %v3844_v48 = vmul.f32 %v5076_v42, %v3812_v11 }
 0x905   : > { %v3863_v6 = vadd.f32 %v4365_v30, %v3853_v43 }
 0x906   : > { %3866 = vst [vmem:[#allocation2] sm:$0xff] %v3862_v37  ;;  %v3854_v36 = vmul.f32 %v4364_v25, %v3844_v48  ;;  %3872 = sbr.rel (%p4366_p11) target bundleno = 2317 (0x90d), region = 104 }
 0x907   : > { %3867 = vst [vmem:[#allocation2 + $0x18] sm:$0xff] %v3863_v6 }
 0x908   : > { %v3864_v52 = vadd.f32 %v4365_v30, %v3854_v36 }
 0x90a   : > { %3868 = vst [vmem:[#allocation2 + $0x8] sm:$0xff] %v3864_v52 }
 0x90b   : > { %3873 = vst [vmem:[#allocation16] sm:$0xff] %v3861_v50  ;;  %3874 = vst [vmem:[#allocation16 + $0x8] sm:$0xff] %v3862_v37 }
 0x90c   : > { %3875 = vst [vmem:[#allocation16 + $0x10] sm:$0xff] %v3863_v6  ;;  %3876 = vst [vmem:[#allocation16 + $0x18] sm:$0xff] %v3864_v52 }
 0x90d PF: > { %p4705_p0 = scmp.eq.s32.totalorder %s5517_s5, 1  ;;  %s5355_s21 = smov [#allocation16]  }
 0x90e   : > { %s3886_s17 = sshll.u32 %s5355_s21, 4  ;;  %s3887_s17 = int_to_ptr.vmem [resolvable:$true] %s3886_s17 }
 0x90f   : > { %s5247_s19 = scalar_lea.vmem %s3887_s17, 512  ;;  %p5254_p10 = scmp.lt.s32.totalorder %s3887_s17, %s3887_s17 }
 0x910   : > { %p5248_p1 = scmp.ne.s32.totalorder %s3887_s17, %s5247_s19  ;;  %p5255_p12 = scmp.lt.s32.totalorder %s5247_s19, %s5247_s19 }
 0x912   : > { %p5249_p3 = pnand %p5248_p1, %p4705_p0  ;;  %p5256_p13 = por %p5255_p12, %p5254_p10 }
 0x914   : > { %p5250_p9 = pneg %p5249_p3 }
 0x916   : > { %p5257_p2 = pnand %p5256_p13, %p5250_p9 }
 0x918   : > { %5260 = shalt.err (!%p5257_p2)
}
 0x919   : > { %s5356_s28 = smov 128   ;;  %s5357_s12 = smov 8  }
 0x91a   : > { %s6229_s14 = sld [smem:[#allocation40_spill]] }
 0x920   : > { %4679 = dma.vmem_to_hbm [thread:$0]  (%p4705_p0), %s3887_s17, 512, %s6229_s14, [#allocation7], %s5356_s28, %s5356_s28, %s5357_s12  }
 0x921   : > { %5312 = dma.done.wait (%p4705_p0), [#allocation7], 512  }
 0x922   : > { %5314 = vsyncadd (%p4705_p0), [#allocation7], 4294966784 }
 0x923 PF: > { %s6230_s0 = sld [smem:[#allocation25_spill]] }
 0x924   : > { %s6231_s25 = sld [smem:[#allocation22_spill]] }
 0x925   : > { %s6232_s26 = sld [smem:[#allocation23_spill]] }
 0x926   : > { %s6233_s27 = sld [smem:[#allocation27_spill]] }
 0x927   : > { %s6234_s28 = sld [smem:[#allocation24_spill]] }
 0x928   : > { %s6235_s29 = sld [smem:[#allocation26_spill]] }
 0x929   : > { %s34_s30 = sadd.s32 1, %s6230_s0  }
 0x92a   : > { %p31_p4 = scmp.ge.s32.totalorder %s34_s30, 4  }
 0x92c   :  { %33 = sbr.rel (!%p31_p4) target bundleno = 24 (0x18), region = 193 }
 0x931   :  { %3902 = vsyncpa [#allocation6], 1 }
 0x932   :  { %3904 = vsyncpa [#allocation6 + $0x1], 1 }
 0x933   :  { %3905 = vsyncpa [#allocation9], 1 }
 0x934   :  { %3907 = vsyncpa [#allocation9 + $0x1], 1 }
 0x935   :  { %3908 = vsyncpa [#allocation12], 1 }
 0x936   :  { %3910 = vsyncpa [#allocation12 + $0x1], 1 }
 0x937   :  { %3911 = vsyncpa [#allocation15], 1 }
 0x938   :  { %3913 = vsyncpa [#allocation15 + $0x1], 1 }
 0x939   :  { %3914 = vsyncpa [#allocation7], 1 }
 0x93a   :  { %3916 = vsyncpa [#allocation7 + $0x1], 1 }

</bundles_post_ra>
